<compile_context>
chip_gen: v7x
topology: tpu7x:2x2x1
jax: 0.10.0
libtpu: 0.0.40
codegen_flags: <defaults>
</compile_context>

<pallas_src>
import jax
import jax.numpy as jnp
import numpy as np
from jax import lax
from jax.experimental import pallas as pl
from jax.experimental.pallas import tpu as pltpu

H = 128      # hidden size
NL = 10      # number of LSTM layers (paired for the 2-deep wavefront)
D_IN = 5     # LSTM input_size
BP = 8       # batch padded to one sublane tile (per-timestep slices 8-aligned)
NPAIRS = NL // 2
assert NL % 2 == 0

# PyTorch gate order along 4H is [i, f, g, o]; kernel uses [i, f, o, g] so the three
# sigmoid gates form one contiguous (BP, 3H) slab (single wide EUP launch).
_GATE_PERM = np.concatenate([np.arange(0, H), np.arange(H, 2 * H),
                             np.arange(3 * H, 4 * H), np.arange(2 * H, 3 * H)])


def lstm_mlp_kernel(x_ref, w_ref, b_ref,
                    fc1w_ref, fc1b_ref, fc2w_ref, fc2b_ref, fc3w_ref, fc3b_ref,
                    out_ref, hout_ref):
    """One grid step = one pair of LSTM layers (2p, 2p+1), wavefront-interleaved.

    Shapes (f32):
      x_ref    : (T*BP, H)    time-major input, batch padded to BP, features 5 -> H
      w_ref    : (2, 2H, 4H)  fused [W_ih; W_hh] (transposed, gate-permuted) of the pair
      b_ref    : (2, 1, 4H)   b_ih + b_hh of the pair (gate-permuted)
      fc*_ref  : MLP head (in, out) weights / (1, out) biases
      out_ref  : (BP, 1)
      hout_ref : (T*BP, H)    persistent scratch: previous layer's h for every t,
                              overwritten in place with this pair's layer-b outputs
    """
    p = pl.program_id(0)
    T = hout_ref.shape[0] // BP

    @pl.when(p == 0)
    def _():                               # seed the ping buffer with the padded input
        hout_ref[...] = x_ref[...]

    w_a = w_ref[0]                         # (2H, 4H) layer 2p
    w_b = w_ref[1]                         # (2H, 4H) layer 2p+1
    b_a = b_ref[0]                         # (1, 4H)
    b_b = b_ref[1]

    # TODO(synk): if the bundle dump shows the RHS re-streamed from VMEM every step,
    # drive the MXU explicitly (pltpu.matmul_push_rhs once per layer + matmul_acc_lhs
    # per timestep + matmul_pop) to keep W resident in the weight registers.
    def cell(inp, h, c, w, b):
        lhs = jnp.concatenate([inp, h], axis=1)                  # (BP, 2H), K = 256
        gates = jnp.dot(lhs, w, preferred_element_type=jnp.float32) + b
        sig = jax.nn.sigmoid(gates[:, :3 * H])                   # [i | f | o]
        i_g = sig[:, 0 * H:1 * H]
        f_g = sig[:, 1 * H:2 * H]
        o_g = sig[:, 2 * H:3 * H]
        g_g = jnp.tanh(gates[:, 3 * H:4 * H])
        c_new = f_g * c + i_g * g_g
        h_new = o_g * jnp.tanh(c_new)
        return h_new, c_new

    zeros = jnp.zeros((BP, H), jnp.float32)

    # Wavefront prologue: layer a at t = 0.
    h_a, c_a = cell(hout_ref[pl.ds(0, BP), :], zeros, zeros, w_a, b_a)

    def step(d, carry):
        # carry = (layer-a state at time d, layer-b state at time d-1).
        h_a, c_a, h_b, c_b = carry
        row_n = pl.multiple_of((d + 1) * BP, BP)
        inp_a = hout_ref[pl.ds(row_n, BP), :]
        # The two cells below are independent -> back-to-back MXU / EUP issue.
        h_a_n, c_a_n = cell(inp_a, h_a, c_a, w_a, b_a)   # layer a, time d+1
        h_b_n, c_b_n = cell(h_a, h_b, c_b, w_b, b_b)     # layer b, time d
        row_d = pl.multiple_of(d * BP, BP)
        hout_ref[pl.ds(row_d, BP), :] = h_b_n            # row d already consumed: safe
        return h_a_n, c_a_n, h_b_n, c_b_n

    h_a, c_a, h_b, c_b = lax.fori_loop(0, T - 1, step, (h_a, c_a, zeros, zeros),
                                       unroll=True)

    # Wavefront epilogue: layer b at t = T-1.  (Stores on the last pair are never
    # read; left unconditional — 1 vreg store/step, negligible.)
    h_b, c_b = cell(h_a, h_b, c_b, w_b, b_b)
    row_l = pl.multiple_of((T - 1) * BP, BP)
    hout_ref[pl.ds(row_l, BP), :] = h_b

    @pl.when(p == pl.num_programs(0) - 1)
    def _():
        # Head on hn[-1]: relu -> fc1 -> relu -> fc2 -> relu -> fc3
        z = jnp.maximum(h_b, 0.0)
        z = jnp.maximum(jnp.dot(z, fc1w_ref[...], preferred_element_type=jnp.float32)
                        + fc1b_ref[...], 0.0)
        z = jnp.maximum(jnp.dot(z, fc2w_ref[...], preferred_element_type=jnp.float32)
                        + fc2b_ref[...], 0.0)
        out_ref[...] = (jnp.dot(z, fc3w_ref[...], preferred_element_type=jnp.float32)
                        + fc3b_ref[...])                         # (BP, 1)


@jax.jit
def net_forward(x, kparams):
    """x: (B, T, D_IN) batch_first, like the PyTorch module. Returns (B,)."""
    (w_fused, b, fc1w, fc1b, fc2w, fc2b, fc3w, fc3b) = kparams
    B, T, D = x.shape
    assert B <= BP and D == D_IN
    # Time-major, pad batch -> BP and features -> H, flatten to (T*BP, H) so row
    # block [t*BP, (t+1)*BP) is timestep t and layer 0 uses the same fused (2H, 4H)
    # weight as every other layer.
    x_tm = jnp.transpose(x, (1, 0, 2))
    x_tm = jnp.pad(x_tm, ((0, 0), (0, BP - B), (0, H - D)))
    x_flat = x_tm.reshape(T * BP, H)

    args = (x_flat, w_fused, b, fc1w, fc1b, fc2w, fc2b, fc3w, fc3b)
    flops = 2 * NL * T * BP * (2 * H) * (4 * H) + 2 * BP * (H * 64 + 64 * 32 + 32)
    transcendentals = 5 * NL * T * BP * H
    bytes_accessed = sum(int(a.size) * a.dtype.itemsize for a in args) + BP * 4

    vmem_spec = pl.BlockSpec(memory_space=pltpu.MemorySpace.VMEM)
    out = pl.pallas_call(
        lstm_mlp_kernel,
        out_shape=jax.ShapeDtypeStruct((BP, 1), jnp.float32),
        grid_spec=pltpu.PrefetchScalarGridSpec(
            num_scalar_prefetch=0,
            grid=(NPAIRS,),
            in_specs=[
                vmem_spec,                                             # x (resident)
                pl.BlockSpec((2, 2 * H, 4 * H), lambda p: (p, 0, 0)),  # pair weights
                pl.BlockSpec((2, 1, 4 * H), lambda p: (p, 0, 0)),      # pair biases
                vmem_spec, vmem_spec, vmem_spec, vmem_spec, vmem_spec, vmem_spec,
            ],
            out_specs=pl.BlockSpec((BP, 1), lambda p: (0, 0)),
            scratch_shapes=[pltpu.VMEM((T * BP, H), jnp.float32)],     # ping buffer
        ),
        compiler_params=pltpu.CompilerParams(
            dimension_semantics=("arbitrary",)),
        cost_estimate=pl.CostEstimate(flops=flops,
                                      transcendentals=transcendentals,
                                      bytes_accessed=bytes_accessed),
    )(*args)
    # TODO(synk): for B > 8, add a "parallel" batch grid axis (uses both v7x TCs)
    # instead of padding a single sublane tile.
    return out[:B, 0]                                        # == x.view(-1)


def init_torch_params(key):
    """Deterministic synthetic parameters in PyTorch layout."""
    s = float(1.0 / np.sqrt(H))
    keys = jax.random.split(key, 4 * NL + 6)
    w_ih, w_hh, b_ih, b_hh = [], [], [], []
    k = 0
    for l in range(NL):
        in_dim = D_IN if l == 0 else H
        w_ih.append(jax.random.uniform(keys[k], (4 * H, in_dim), jnp.float32, -s, s)); k += 1
        w_hh.append(jax.random.uniform(keys[k], (4 * H, H), jnp.float32, -s, s)); k += 1
        b_ih.append(jax.random.uniform(keys[k], (4 * H,), jnp.float32, -s, s)); k += 1
        b_hh.append(jax.random.uniform(keys[k], (4 * H,), jnp.float32, -s, s)); k += 1
    fc1_w = jax.random.uniform(keys[k], (64, H), jnp.float32, -s, s); k += 1
    fc1_b = jax.random.uniform(keys[k], (64,), jnp.float32, -s, s); k += 1
    fc2_w = jax.random.uniform(keys[k], (32, 64), jnp.float32, -0.125, 0.125); k += 1
    fc2_b = jax.random.uniform(keys[k], (32,), jnp.float32, -0.125, 0.125); k += 1
    fc3_w = jax.random.uniform(keys[k], (1, 32), jnp.float32, -0.17, 0.17); k += 1
    fc3_b = jax.random.uniform(keys[k], (1,), jnp.float32, -0.17, 0.17); k += 1
    return dict(w_ih=w_ih, w_hh=w_hh, b_ih=b_ih, b_hh=b_hh,
                fc1_w=fc1_w, fc1_b=fc1_b, fc2_w=fc2_w, fc2_b=fc2_b,
                fc3_w=fc3_w, fc3_b=fc3_b)


def prepare_kernel_params(tp):
    """Stack [W_ih; W_hh] per layer (transposed, gate-permuted to [i,f,o,g]),
    zero-pad layer-0's 5 input rows to H, and fold the two biases together."""
    perm = _GATE_PERM
    w_fused, b = [], []
    for l in range(NL):
        wihT = tp["w_ih"][l].T                                       # (in_dim, 4H)
        if l == 0:
            wihT = jnp.zeros((H, 4 * H), jnp.float32).at[:D_IN, :].set(wihT)
        whhT = tp["w_hh"][l].T                                       # (H, 4H)
        w_fused.append(jnp.concatenate([wihT, whhT], axis=0)[:, perm])   # (2H, 4H)
        b.append(((tp["b_ih"][l] + tp["b_hh"][l])[perm]).reshape(1, 4 * H))
    w_fused = jnp.stack(w_fused)                                     # (NL, 2H, 4H)
    b = jnp.stack(b)                                                 # (NL, 1, 4H)
    fc1w = tp["fc1_w"].T; fc1b = tp["fc1_b"].reshape(1, -1)
    fc2w = tp["fc2_w"].T; fc2b = tp["fc2_b"].reshape(1, -1)
    fc3w = tp["fc3_w"].T; fc3b = tp["fc3_b"].reshape(1, -1)
    return (w_fused, b, fc1w, fc1b, fc2w, fc2b, fc3w, fc3b)


def net_forward_ref(x, tp):
    """Pure-JAX reference with exact PyTorch semantics (gate order i,f,g,o)."""
    B, T, _ = x.shape
    h = [jnp.zeros((B, H), jnp.float32) for _ in range(NL)]
    c = [jnp.zeros((B, H), jnp.float32) for _ in range(NL)]
    for t in range(T):
        inp = x[:, t, :]
        for l in range(NL):
            gates = (inp @ tp["w_ih"][l].T + h[l] @ tp["w_hh"][l].T
                     + tp["b_ih"][l] + tp["b_hh"][l])
            i_g = jax.nn.sigmoid(gates[:, 0 * H:1 * H])
            f_g = jax.nn.sigmoid(gates[:, 1 * H:2 * H])
            g_g = jnp.tanh(gates[:, 2 * H:3 * H])
            o_g = jax.nn.sigmoid(gates[:, 3 * H:4 * H])
            c[l] = f_g * c[l] + i_g * g_g
            h[l] = o_g * jnp.tanh(c[l])
            inp = h[l]
    z = jnp.maximum(h[-1], 0.0)
    z = jnp.maximum(z @ tp["fc1_w"].T + tp["fc1_b"], 0.0)
    z = jnp.maximum(z @ tp["fc2_w"].T + tp["fc2_b"], 0.0)
    z = z @ tp["fc3_w"].T + tp["fc3_b"]
    return z.reshape(-1)


if __name__ == "__main__":
    key = jax.random.PRNGKey(0)
    k_x, k_p = jax.random.split(key)
    B, T = 2, 8
    x = jax.random.normal(k_x, (B, T, D_IN), jnp.float32)

    torch_params = init_torch_params(k_p)
    kernel_params = prepare_kernel_params(torch_params)

    out = jax.block_until_ready(net_forward(x, kernel_params))
    ref = net_forward_ref(x, torch_params)

    assert out.shape == (B,), out.shape
    assert jnp.allclose(out, ref, atol=1e-3, rtol=1e-3), (out, ref)
    print("KERNEL_OK")
</pallas_src>

<mosaic_0001>
module attributes {stable_mosaic.version = 11 : i64} {
  func.func @lstm_mlp_kernel(%arg0: i32, %arg1: memref<64x128xf32, #tpu.memory_space<vmem>>, %arg2: memref<2x256x512xf32, #tpu.memory_space<vmem>>, %arg3: memref<2x1x512xf32, #tpu.memory_space<vmem>>, %arg4: memref<128x64xf32, #tpu.memory_space<vmem>>, %arg5: memref<1x64xf32, #tpu.memory_space<vmem>>, %arg6: memref<64x32xf32, #tpu.memory_space<vmem>>, %arg7: memref<1x32xf32, #tpu.memory_space<vmem>>, %arg8: memref<32x1xf32, #tpu.memory_space<vmem>>, %arg9: memref<1x1xf32, #tpu.memory_space<vmem>>, %arg10: memref<8x1xf32, #tpu.memory_space<vmem>>, %arg11: memref<64x128xf32, #tpu.memory_space<vmem>>) attributes {dimension_semantics = [#tpu.dimension_semantics<arbitrary>], iteration_bounds = array<i64: 5>, scalar_prefetch = 0 : i64, scratch_operands = 1 : i64, tpu.core_type = #tpu.core_type<tc>, window_params = [{pipeline_mode = #tpu.pipeline_mode<synchronous>, transform_indices = @transform_0, window_bounds = array<i64: 64, 128>}, {transform_indices = @transform_1, window_bounds = array<i64: 2, 256, 512>}, {transform_indices = @transform_2, window_bounds = array<i64: 2, 1, 512>}, {pipeline_mode = #tpu.pipeline_mode<synchronous>, transform_indices = @transform_3, window_bounds = array<i64: 128, 64>}, {pipeline_mode = #tpu.pipeline_mode<synchronous>, transform_indices = @transform_4, window_bounds = array<i64: 1, 64>}, {pipeline_mode = #tpu.pipeline_mode<synchronous>, transform_indices = @transform_5, window_bounds = array<i64: 64, 32>}, {pipeline_mode = #tpu.pipeline_mode<synchronous>, transform_indices = @transform_6, window_bounds = array<i64: 1, 32>}, {pipeline_mode = #tpu.pipeline_mode<synchronous>, transform_indices = @transform_7, window_bounds = array<i64: 32, 1>}, {pipeline_mode = #tpu.pipeline_mode<synchronous>, transform_indices = @transform_8, window_bounds = array<i64: 1, 1>}, {pipeline_mode = #tpu.pipeline_mode<synchronous>, transform_indices = @transform_9, window_bounds = array<i64: 8, 1>}]} {
    %c0_i32 = arith.constant 0 : i32
    %0 = arith.cmpi eq, %arg0, %c0_i32 : i32
    %1 = arith.extui %0 : i1 to i32
    %c0_i32_0 = arith.constant 0 : i32
    %2 = arith.cmpi ne, %1, %c0_i32_0 : i32
    scf.if %2 {
      %c0_83 = arith.constant 0 : index
      %c0_84 = arith.constant 0 : index
      %402 = vector.load %arg1[%c0_83, %c0_84] : memref<64x128xf32, #tpu.memory_space<vmem>>, vector<64x128xf32>
      %c0_85 = arith.constant 0 : index
      %c0_86 = arith.constant 0 : index
      %403 = vector.load %arg11[%c0_85, %c0_86] : memref<64x128xf32, #tpu.memory_space<vmem>>, vector<64x128xf32>
      tpu.vector_store %arg11[%c0_85, %c0_86], %402 {strides = array<i32>} : memref<64x128xf32, #tpu.memory_space<vmem>>, vector<64x128xf32>,
    } else {
    }
    %c0 = arith.constant 0 : index
    %c0_1 = arith.constant 0 : index
    %c0_2 = arith.constant 0 : index
    %3 = vector.load %arg2[%c0, %c0_1, %c0_2] : memref<2x256x512xf32, #tpu.memory_space<vmem>>, vector<1x256x512xf32>
    %4 = vector.shape_cast %3 : vector<1x256x512xf32> to vector<256x512xf32>
    %c1 = arith.constant 1 : index
    %c0_3 = arith.constant 0 : index
    %c0_4 = arith.constant 0 : index
    %5 = vector.load %arg2[%c1, %c0_3, %c0_4] : memref<2x256x512xf32, #tpu.memory_space<vmem>>, vector<1x256x512xf32>
    %6 = vector.shape_cast %5 : vector<1x256x512xf32> to vector<256x512xf32>
    %c0_5 = arith.constant 0 : index
    %c0_6 = arith.constant 0 : index
    %c0_7 = arith.constant 0 : index
    %7 = vector.load %arg3[%c0_5, %c0_6, %c0_7] : memref<2x1x512xf32, #tpu.memory_space<vmem>>, vector<1x1x512xf32>
    %8 = vector.shape_cast %7 : vector<1x1x512xf32> to vector<1x512xf32>
    %c1_8 = arith.constant 1 : index
    %c0_9 = arith.constant 0 : index
    %c0_10 = arith.constant 0 : index
    %9 = vector.load %arg3[%c1_8, %c0_9, %c0_10] : memref<2x1x512xf32, #tpu.memory_space<vmem>>, vector<1x1x512xf32>
    %10 = vector.shape_cast %9 : vector<1x1x512xf32> to vector<1x512xf32>
    %cst = arith.constant 0.000000e+00 : f32
    %11 = vector.broadcast %cst : f32 to vector<8x128xf32>
    %c0_11 = arith.constant 0 : index
    %c0_12 = arith.constant 0 : index
    %12 = vector.load %arg11[%c0_11, %c0_12] : memref<64x128xf32, #tpu.memory_space<vmem>>, vector<8x128xf32>
    %13 = tpu.concatenate %12, %11 in 1 : vector<8x128xf32>, vector<8x128xf32> -> vector<8x256xf32>
    %cst_13 = arith.constant dense<0.000000e+00> : vector<8x512xf32>
    %14 = tpu.matmul %13, %4, %cst_13 {dimension_numbers = #tpu.dot_dimension_numbers<[1], [0], [0], [1], [0, 0, 1, 1], [], []>} : vector<8x256xf32>, vector<256x512xf32>, vector<8x512xf32> -> vector<8x512xf32>
    %15 = vector.broadcast %8 : vector<1x512xf32> to vector<8x512xf32>
    %16 = arith.addf %14, %15 : vector<8x512xf32>
    %17 = vector.extract_strided_slice %16 {offsets = [0, 0], sizes = [8, 384], strides = [1, 1]} : vector<8x512xf32> to vector<8x384xf32>
    %18 = arith.negf %17 : vector<8x384xf32>
    %19 = math.exp %18 : vector<8x384xf32>
    %cst_14 = arith.constant 1.000000e+00 : f32
    %20 = vector.broadcast %cst_14 : f32 to vector<8x384xf32>
    %21 = arith.addf %20, %19 : vector<8x384xf32>
    %22 = arith.divf %20, %21 : vector<8x384xf32>
    %23 = vector.extract_strided_slice %22 {offsets = [0, 0], sizes = [8, 128], strides = [1, 1]} : vector<8x384xf32> to vector<8x128xf32>
    %24 = vector.extract_strided_slice %22 {offsets = [0, 128], sizes = [8, 128], strides = [1, 1]} : vector<8x384xf32> to vector<8x128xf32>
    %25 = vector.extract_strided_slice %22 {offsets = [0, 256], sizes = [8, 128], strides = [1, 1]} : vector<8x384xf32> to vector<8x128xf32>
    %26 = vector.extract_strided_slice %16 {offsets = [0, 384], sizes = [8, 128], strides = [1, 1]} : vector<8x512xf32> to vector<8x128xf32>
    %27 = math.tanh %26 : vector<8x128xf32>
    %28 = arith.mulf %24, %11 : vector<8x128xf32>
    %29 = arith.mulf %23, %27 : vector<8x128xf32>
    %30 = arith.addf %28, %29 : vector<8x128xf32>
    %31 = math.tanh %30 : vector<8x128xf32>
    %32 = arith.mulf %25, %31 : vector<8x128xf32>
    %c0_i32_15 = arith.constant 0 : i32
    %c1_i32 = arith.constant 1 : i32
    %33 = arith.addi %c0_i32_15, %c1_i32 : i32
    %c8_i32 = arith.constant 8 : i32
    %34 = arith.muli %33, %c8_i32 : i32
    %35 = tpu.assume_multiple %34, 8 : i32
    %36 = arith.index_cast %35 : i32 to index
    %c0_16 = arith.constant 0 : index
    %37 = vector.load %arg11[%36, %c0_16] : memref<64x128xf32, #tpu.memory_space<vmem>>, vector<8x128xf32>
    %38 = tpu.concatenate %37, %32 in 1 : vector<8x128xf32>, vector<8x128xf32> -> vector<8x256xf32>
    %cst_17 = arith.constant dense<0.000000e+00> : vector<8x512xf32>
    %39 = tpu.matmul %38, %4, %cst_17 {dimension_numbers = #tpu.dot_dimension_numbers<[1], [0], [0], [1], [0, 0, 1, 1], [], []>} : vector<8x256xf32>, vector<256x512xf32>, vector<8x512xf32> -> vector<8x512xf32>
    %40 = vector.broadcast %8 : vector<1x512xf32> to vector<8x512xf32>
    %41 = arith.addf %39, %40 : vector<8x512xf32>
    %42 = vector.extract_strided_slice %41 {offsets = [0, 0], sizes = [8, 384], strides = [1, 1]} : vector<8x512xf32> to vector<8x384xf32>
    %43 = arith.negf %42 : vector<8x384xf32>
    %44 = math.exp %43 : vector<8x384xf32>
    %cst_18 = arith.constant 1.000000e+00 : f32
    %45 = vector.broadcast %cst_18 : f32 to vector<8x384xf32>
    %46 = arith.addf %45, %44 : vector<8x384xf32>
    %47 = arith.divf %45, %46 : vector<8x384xf32>
    %48 = vector.extract_strided_slice %47 {offsets = [0, 0], sizes = [8, 128], strides = [1, 1]} : vector<8x384xf32> to vector<8x128xf32>
    %49 = vector.extract_strided_slice %47 {offsets = [0, 128], sizes = [8, 128], strides = [1, 1]} : vector<8x384xf32> to vector<8x128xf32>
    %50 = vector.extract_strided_slice %47 {offsets = [0, 256], sizes = [8, 128], strides = [1, 1]} : vector<8x384xf32> to vector<8x128xf32>
    %51 = vector.extract_strided_slice %41 {offsets = [0, 384], sizes = [8, 128], strides = [1, 1]} : vector<8x512xf32> to vector<8x128xf32>
    %52 = math.tanh %51 : vector<8x128xf32>
    %53 = arith.mulf %49, %30 : vector<8x128xf32>
    %54 = arith.mulf %48, %52 : vector<8x128xf32>
    %55 = arith.addf %53, %54 : vector<8x128xf32>
    %56 = math.tanh %55 : vector<8x128xf32>
    %57 = arith.mulf %50, %56 : vector<8x128xf32>
    %58 = tpu.concatenate %32, %11 in 1 : vector<8x128xf32>, vector<8x128xf32> -> vector<8x256xf32>
    %cst_19 = arith.constant dense<0.000000e+00> : vector<8x512xf32>
    %59 = tpu.matmul %58, %6, %cst_19 {dimension_numbers = #tpu.dot_dimension_numbers<[1], [0], [0], [1], [0, 0, 1, 1], [], []>} : vector<8x256xf32>, vector<256x512xf32>, vector<8x512xf32> -> vector<8x512xf32>
    %60 = vector.broadcast %10 : vector<1x512xf32> to vector<8x512xf32>
    %61 = arith.addf %59, %60 : vector<8x512xf32>
    %62 = vector.extract_strided_slice %61 {offsets = [0, 0], sizes = [8, 384], strides = [1, 1]} : vector<8x512xf32> to vector<8x384xf32>
    %63 = arith.negf %62 : vector<8x384xf32>
    %64 = math.exp %63 : vector<8x384xf32>
    %cst_20 = arith.constant 1.000000e+00 : f32
    %65 = vector.broadcast %cst_20 : f32 to vector<8x384xf32>
    %66 = arith.addf %65, %64 : vector<8x384xf32>
    %67 = arith.divf %65, %66 : vector<8x384xf32>
    %68 = vector.extract_strided_slice %67 {offsets = [0, 0], sizes = [8, 128], strides = [1, 1]} : vector<8x384xf32> to vector<8x128xf32>
    %69 = vector.extract_strided_slice %67 {offsets = [0, 128], sizes = [8, 128], strides = [1, 1]} : vector<8x384xf32> to vector<8x128xf32>
    %70 = vector.extract_strided_slice %67 {offsets = [0, 256], sizes = [8, 128], strides = [1, 1]} : vector<8x384xf32> to vector<8x128xf32>
    %71 = vector.extract_strided_slice %61 {offsets = [0, 384], sizes = [8, 128], strides = [1, 1]} : vector<8x512xf32> to vector<8x128xf32>
    %72 = math.tanh %71 : vector<8x128xf32>
    %73 = arith.mulf %69, %11 : vector<8x128xf32>
    %74 = arith.mulf %68, %72 : vector<8x128xf32>
    %75 = arith.addf %73, %74 : vector<8x128xf32>
    %76 = math.tanh %75 : vector<8x128xf32>
    %77 = arith.mulf %70, %76 : vector<8x128xf32>
    %c8_i32_21 = arith.constant 8 : i32
    %78 = arith.muli %c0_i32_15, %c8_i32_21 : i32
    %79 = tpu.assume_multiple %78, 8 : i32
    %80 = arith.index_cast %79 : i32 to index
    %c0_22 = arith.constant 0 : index
    %81 = vector.load %arg11[%80, %c0_22] : memref<64x128xf32, #tpu.memory_space<vmem>>, vector<8x128xf32>
    tpu.vector_store %arg11[%80, %c0_22], %77 {strides = array<i32>} : memref<64x128xf32, #tpu.memory_space<vmem>>, vector<8x128xf32>,
    %c1_i32_23 = arith.constant 1 : i32
    %c1_i32_24 = arith.constant 1 : i32
    %82 = arith.addi %c1_i32_23, %c1_i32_24 : i32
    %c8_i32_25 = arith.constant 8 : i32
    %83 = arith.muli %82, %c8_i32_25 : i32
    %84 = tpu.assume_multiple %83, 8 : i32
    %85 = arith.index_cast %84 : i32 to index
    %c0_26 = arith.constant 0 : index
    %86 = vector.load %arg11[%85, %c0_26] : memref<64x128xf32, #tpu.memory_space<vmem>>, vector<8x128xf32>
    %87 = tpu.concatenate %86, %57 in 1 : vector<8x128xf32>, vector<8x128xf32> -> vector<8x256xf32>
    %cst_27 = arith.constant dense<0.000000e+00> : vector<8x512xf32>
    %88 = tpu.matmul %87, %4, %cst_27 {dimension_numbers = #tpu.dot_dimension_numbers<[1], [0], [0], [1], [0, 0, 1, 1], [], []>} : vector<8x256xf32>, vector<256x512xf32>, vector<8x512xf32> -> vector<8x512xf32>
    %89 = vector.broadcast %8 : vector<1x512xf32> to vector<8x512xf32>
    %90 = arith.addf %88, %89 : vector<8x512xf32>
    %91 = vector.extract_strided_slice %90 {offsets = [0, 0], sizes = [8, 384], strides = [1, 1]} : vector<8x512xf32> to vector<8x384xf32>
    %92 = arith.negf %91 : vector<8x384xf32>
    %93 = math.exp %92 : vector<8x384xf32>
    %cst_28 = arith.constant 1.000000e+00 : f32
    %94 = vector.broadcast %cst_28 : f32 to vector<8x384xf32>
    %95 = arith.addf %94, %93 : vector<8x384xf32>
    %96 = arith.divf %94, %95 : vector<8x384xf32>
    %97 = vector.extract_strided_slice %96 {offsets = [0, 0], sizes = [8, 128], strides = [1, 1]} : vector<8x384xf32> to vector<8x128xf32>
    %98 = vector.extract_strided_slice %96 {offsets = [0, 128], sizes = [8, 128], strides = [1, 1]} : vector<8x384xf32> to vector<8x128xf32>
    %99 = vector.extract_strided_slice %96 {offsets = [0, 256], sizes = [8, 128], strides = [1, 1]} : vector<8x384xf32> to vector<8x128xf32>
    %100 = vector.extract_strided_slice %90 {offsets = [0, 384], sizes = [8, 128], strides = [1, 1]} : vector<8x512xf32> to vector<8x128xf32>
    %101 = math.tanh %100 : vector<8x128xf32>
    %102 = arith.mulf %98, %55 : vector<8x128xf32>
    %103 = arith.mulf %97, %101 : vector<8x128xf32>
    %104 = arith.addf %102, %103 : vector<8x128xf32>
    %105 = math.tanh %104 : vector<8x128xf32>
    %106 = arith.mulf %99, %105 : vector<8x128xf32>
    %107 = tpu.concatenate %57, %77 in 1 : vector<8x128xf32>, vector<8x128xf32> -> vector<8x256xf32>
    %cst_29 = arith.constant dense<0.000000e+00> : vector<8x512xf32>
    %108 = tpu.matmul %107, %6, %cst_29 {dimension_numbers = #tpu.dot_dimension_numbers<[1], [0], [0], [1], [0, 0, 1, 1], [], []>} : vector<8x256xf32>, vector<256x512xf32>, vector<8x512xf32> -> vector<8x512xf32>
    %109 = vector.broadcast %10 : vector<1x512xf32> to vector<8x512xf32>
    %110 = arith.addf %108, %109 : vector<8x512xf32>
    %111 = vector.extract_strided_slice %110 {offsets = [0, 0], sizes = [8, 384], strides = [1, 1]} : vector<8x512xf32> to vector<8x384xf32>
    %112 = arith.negf %111 : vector<8x384xf32>
    %113 = math.exp %112 : vector<8x384xf32>
    %cst_30 = arith.constant 1.000000e+00 : f32
    %114 = vector.broadcast %cst_30 : f32 to vector<8x384xf32>
    %115 = arith.addf %114, %113 : vector<8x384xf32>
    %116 = arith.divf %114, %115 : vector<8x384xf32>
    %117 = vector.extract_strided_slice %116 {offsets = [0, 0], sizes = [8, 128], strides = [1, 1]} : vector<8x384xf32> to vector<8x128xf32>
    %118 = vector.extract_strided_slice %116 {offsets = [0, 128], sizes = [8, 128], strides = [1, 1]} : vector<8x384xf32> to vector<8x128xf32>
    %119 = vector.extract_strided_slice %116 {offsets = [0, 256], sizes = [8, 128], strides = [1, 1]} : vector<8x384xf32> to vector<8x128xf32>
    %120 = vector.extract_strided_slice %110 {offsets = [0, 384], sizes = [8, 128], strides = [1, 1]} : vector<8x512xf32> to vector<8x128xf32>
    %121 = math.tanh %120 : vector<8x128xf32>
    %122 = arith.mulf %118, %75 : vector<8x128xf32>
    %123 = arith.mulf %117, %121 : vector<8x128xf32>
    %124 = arith.addf %122, %123 : vector<8x128xf32>
    %125 = math.tanh %124 : vector<8x128xf32>
    %126 = arith.mulf %119, %125 : vector<8x128xf32>
    %c8_i32_31 = arith.constant 8 : i32
    %127 = arith.muli %c1_i32_23, %c8_i32_31 : i32
    %128 = tpu.assume_multiple %127, 8 : i32
    %129 = arith.index_cast %128 : i32 to index
    %c0_32 = arith.constant 0 : index
    %130 = vector.load %arg11[%129, %c0_32] : memref<64x128xf32, #tpu.memory_space<vmem>>, vector<8x128xf32>
    tpu.vector_store %arg11[%129, %c0_32], %126 {strides = array<i32>} : memref<64x128xf32, #tpu.memory_space<vmem>>, vector<8x128xf32>,
    %c2_i32 = arith.constant 2 : i32
    %c1_i32_33 = arith.constant 1 : i32
    %131 = arith.addi %c2_i32, %c1_i32_33 : i32
    %c8_i32_34 = arith.constant 8 : i32
    %132 = arith.muli %131, %c8_i32_34 : i32
    %133 = tpu.assume_multiple %132, 8 : i32
    %134 = arith.index_cast %133 : i32 to index
    %c0_35 = arith.constant 0 : index
    %135 = vector.load %arg11[%134, %c0_35] : memref<64x128xf32, #tpu.memory_space<vmem>>, vector<8x128xf32>
    %136 = tpu.concatenate %135, %106 in 1 : vector<8x128xf32>, vector<8x128xf32> -> vector<8x256xf32>
    %cst_36 = arith.constant dense<0.000000e+00> : vector<8x512xf32>
    %137 = tpu.matmul %136, %4, %cst_36 {dimension_numbers = #tpu.dot_dimension_numbers<[1], [0], [0], [1], [0, 0, 1, 1], [], []>} : vector<8x256xf32>, vector<256x512xf32>, vector<8x512xf32> -> vector<8x512xf32>
    %138 = vector.broadcast %8 : vector<1x512xf32> to vector<8x512xf32>
    %139 = arith.addf %137, %138 : vector<8x512xf32>
    %140 = vector.extract_strided_slice %139 {offsets = [0, 0], sizes = [8, 384], strides = [1, 1]} : vector<8x512xf32> to vector<8x384xf32>
    %141 = arith.negf %140 : vector<8x384xf32>
    %142 = math.exp %141 : vector<8x384xf32>
    %cst_37 = arith.constant 1.000000e+00 : f32
    %143 = vector.broadcast %cst_37 : f32 to vector<8x384xf32>
    %144 = arith.addf %143, %142 : vector<8x384xf32>
    %145 = arith.divf %143, %144 : vector<8x384xf32>
    %146 = vector.extract_strided_slice %145 {offsets = [0, 0], sizes = [8, 128], strides = [1, 1]} : vector<8x384xf32> to vector<8x128xf32>
    %147 = vector.extract_strided_slice %145 {offsets = [0, 128], sizes = [8, 128], strides = [1, 1]} : vector<8x384xf32> to vector<8x128xf32>
    %148 = vector.extract_strided_slice %145 {offsets = [0, 256], sizes = [8, 128], strides = [1, 1]} : vector<8x384xf32> to vector<8x128xf32>
    %149 = vector.extract_strided_slice %139 {offsets = [0, 384], sizes = [8, 128], strides = [1, 1]} : vector<8x512xf32> to vector<8x128xf32>
    %150 = math.tanh %149 : vector<8x128xf32>
    %151 = arith.mulf %147, %104 : vector<8x128xf32>
    %152 = arith.mulf %146, %150 : vector<8x128xf32>
    %153 = arith.addf %151, %152 : vector<8x128xf32>
    %154 = math.tanh %153 : vector<8x128xf32>
    %155 = arith.mulf %148, %154 : vector<8x128xf32>
    %156 = tpu.concatenate %106, %126 in 1 : vector<8x128xf32>, vector<8x128xf32> -> vector<8x256xf32>
    %cst_38 = arith.constant dense<0.000000e+00> : vector<8x512xf32>
    %157 = tpu.matmul %156, %6, %cst_38 {dimension_numbers = #tpu.dot_dimension_numbers<[1], [0], [0], [1], [0, 0, 1, 1], [], []>} : vector<8x256xf32>, vector<256x512xf32>, vector<8x512xf32> -> vector<8x512xf32>
    %158 = vector.broadcast %10 : vector<1x512xf32> to vector<8x512xf32>
    %159 = arith.addf %157, %158 : vector<8x512xf32>
    %160 = vector.extract_strided_slice %159 {offsets = [0, 0], sizes = [8, 384], strides = [1, 1]} : vector<8x512xf32> to vector<8x384xf32>
    %161 = arith.negf %160 : vector<8x384xf32>
    %162 = math.exp %161 : vector<8x384xf32>
    %cst_39 = arith.constant 1.000000e+00 : f32
    %163 = vector.broadcast %cst_39 : f32 to vector<8x384xf32>
    %164 = arith.addf %163, %162 : vector<8x384xf32>
    %165 = arith.divf %163, %164 : vector<8x384xf32>
    %166 = vector.extract_strided_slice %165 {offsets = [0, 0], sizes = [8, 128], strides = [1, 1]} : vector<8x384xf32> to vector<8x128xf32>
    %167 = vector.extract_strided_slice %165 {offsets = [0, 128], sizes = [8, 128], strides = [1, 1]} : vector<8x384xf32> to vector<8x128xf32>
    %168 = vector.extract_strided_slice %165 {offsets = [0, 256], sizes = [8, 128], strides = [1, 1]} : vector<8x384xf32> to vector<8x128xf32>
    %169 = vector.extract_strided_slice %159 {offsets = [0, 384], sizes = [8, 128], strides = [1, 1]} : vector<8x512xf32> to vector<8x128xf32>
    %170 = math.tanh %169 : vector<8x128xf32>
    %171 = arith.mulf %167, %124 : vector<8x128xf32>
    %172 = arith.mulf %166, %170 : vector<8x128xf32>
    %173 = arith.addf %171, %172 : vector<8x128xf32>
    %174 = math.tanh %173 : vector<8x128xf32>
    %175 = arith.mulf %168, %174 : vector<8x128xf32>
    %c8_i32_40 = arith.constant 8 : i32
    %176 = arith.muli %c2_i32, %c8_i32_40 : i32
    %177 = tpu.assume_multiple %176, 8 : i32
    %178 = arith.index_cast %177 : i32 to index
    %c0_41 = arith.constant 0 : index
    %179 = vector.load %arg11[%178, %c0_41] : memref<64x128xf32, #tpu.memory_space<vmem>>, vector<8x128xf32>
    tpu.vector_store %arg11[%178, %c0_41], %175 {strides = array<i32>} : memref<64x128xf32, #tpu.memory_space<vmem>>, vector<8x128xf32>,
    %c3_i32 = arith.constant 3 : i32
    %c1_i32_42 = arith.constant 1 : i32
    %180 = arith.addi %c3_i32, %c1_i32_42 : i32
    %c8_i32_43 = arith.constant 8 : i32
    %181 = arith.muli %180, %c8_i32_43 : i32
    %182 = tpu.assume_multiple %181, 8 : i32
    %183 = arith.index_cast %182 : i32 to index
    %c0_44 = arith.constant 0 : index
    %184 = vector.load %arg11[%183, %c0_44] : memref<64x128xf32, #tpu.memory_space<vmem>>, vector<8x128xf32>
    %185 = tpu.concatenate %184, %155 in 1 : vector<8x128xf32>, vector<8x128xf32> -> vector<8x256xf32>
    %cst_45 = arith.constant dense<0.000000e+00> : vector<8x512xf32>
    %186 = tpu.matmul %185, %4, %cst_45 {dimension_numbers = #tpu.dot_dimension_numbers<[1], [0], [0], [1], [0, 0, 1, 1], [], []>} : vector<8x256xf32>, vector<256x512xf32>, vector<8x512xf32> -> vector<8x512xf32>
    %187 = vector.broadcast %8 : vector<1x512xf32> to vector<8x512xf32>
    %188 = arith.addf %186, %187 : vector<8x512xf32>
    %189 = vector.extract_strided_slice %188 {offsets = [0, 0], sizes = [8, 384], strides = [1, 1]} : vector<8x512xf32> to vector<8x384xf32>
    %190 = arith.negf %189 : vector<8x384xf32>
    %191 = math.exp %190 : vector<8x384xf32>
    %cst_46 = arith.constant 1.000000e+00 : f32
    %192 = vector.broadcast %cst_46 : f32 to vector<8x384xf32>
    %193 = arith.addf %192, %191 : vector<8x384xf32>
    %194 = arith.divf %192, %193 : vector<8x384xf32>
    %195 = vector.extract_strided_slice %194 {offsets = [0, 0], sizes = [8, 128], strides = [1, 1]} : vector<8x384xf32> to vector<8x128xf32>
    %196 = vector.extract_strided_slice %194 {offsets = [0, 128], sizes = [8, 128], strides = [1, 1]} : vector<8x384xf32> to vector<8x128xf32>
    %197 = vector.extract_strided_slice %194 {offsets = [0, 256], sizes = [8, 128], strides = [1, 1]} : vector<8x384xf32> to vector<8x128xf32>
    %198 = vector.extract_strided_slice %188 {offsets = [0, 384], sizes = [8, 128], strides = [1, 1]} : vector<8x512xf32> to vector<8x128xf32>
    %199 = math.tanh %198 : vector<8x128xf32>
    %200 = arith.mulf %196, %153 : vector<8x128xf32>
    %201 = arith.mulf %195, %199 : vector<8x128xf32>
    %202 = arith.addf %200, %201 : vector<8x128xf32>
    %203 = math.tanh %202 : vector<8x128xf32>
    %204 = arith.mulf %197, %203 : vector<8x128xf32>
    %205 = tpu.concatenate %155, %175 in 1 : vector<8x128xf32>, vector<8x128xf32> -> vector<8x256xf32>
    %cst_47 = arith.constant dense<0.000000e+00> : vector<8x512xf32>
    %206 = tpu.matmul %205, %6, %cst_47 {dimension_numbers = #tpu.dot_dimension_numbers<[1], [0], [0], [1], [0, 0, 1, 1], [], []>} : vector<8x256xf32>, vector<256x512xf32>, vector<8x512xf32> -> vector<8x512xf32>
    %207 = vector.broadcast %10 : vector<1x512xf32> to vector<8x512xf32>
    %208 = arith.addf %206, %207 : vector<8x512xf32>
    %209 = vector.extract_strided_slice %208 {offsets = [0, 0], sizes = [8, 384], strides = [1, 1]} : vector<8x512xf32> to vector<8x384xf32>
    %210 = arith.negf %209 : vector<8x384xf32>
    %211 = math.exp %210 : vector<8x384xf32>
    %cst_48 = arith.constant 1.000000e+00 : f32
    %212 = vector.broadcast %cst_48 : f32 to vector<8x384xf32>
    %213 = arith.addf %212, %211 : vector<8x384xf32>
    %214 = arith.divf %212, %213 : vector<8x384xf32>
    %215 = vector.extract_strided_slice %214 {offsets = [0, 0], sizes = [8, 128], strides = [1, 1]} : vector<8x384xf32> to vector<8x128xf32>
    %216 = vector.extract_strided_slice %214 {offsets = [0, 128], sizes = [8, 128], strides = [1, 1]} : vector<8x384xf32> to vector<8x128xf32>
    %217 = vector.extract_strided_slice %214 {offsets = [0, 256], sizes = [8, 128], strides = [1, 1]} : vector<8x384xf32> to vector<8x128xf32>
    %218 = vector.extract_strided_slice %208 {offsets = [0, 384], sizes = [8, 128], strides = [1, 1]} : vector<8x512xf32> to vector<8x128xf32>
    %219 = math.tanh %218 : vector<8x128xf32>
    %220 = arith.mulf %216, %173 : vector<8x128xf32>
    %221 = arith.mulf %215, %219 : vector<8x128xf32>
    %222 = arith.addf %220, %221 : vector<8x128xf32>
    %223 = math.tanh %222 : vector<8x128xf32>
    %224 = arith.mulf %217, %223 : vector<8x128xf32>
    %c8_i32_49 = arith.constant 8 : i32
    %225 = arith.muli %c3_i32, %c8_i32_49 : i32
    %226 = tpu.assume_multiple %225, 8 : i32
    %227 = arith.index_cast %226 : i32 to index
    %c0_50 = arith.constant 0 : index
    %228 = vector.load %arg11[%227, %c0_50] : memref<64x128xf32, #tpu.memory_space<vmem>>, vector<8x128xf32>
    tpu.vector_store %arg11[%227, %c0_50], %224 {strides = array<i32>} : memref<64x128xf32, #tpu.memory_space<vmem>>, vector<8x128xf32>,
    %c4_i32 = arith.constant 4 : i32
    %c1_i32_51 = arith.constant 1 : i32
    %229 = arith.addi %c4_i32, %c1_i32_51 : i32
    %c8_i32_52 = arith.constant 8 : i32
    %230 = arith.muli %229, %c8_i32_52 : i32
    %231 = tpu.assume_multiple %230, 8 : i32
    %232 = arith.index_cast %231 : i32 to index
    %c0_53 = arith.constant 0 : index
    %233 = vector.load %arg11[%232, %c0_53] : memref<64x128xf32, #tpu.memory_space<vmem>>, vector<8x128xf32>
    %234 = tpu.concatenate %233, %204 in 1 : vector<8x128xf32>, vector<8x128xf32> -> vector<8x256xf32>
    %cst_54 = arith.constant dense<0.000000e+00> : vector<8x512xf32>
    %235 = tpu.matmul %234, %4, %cst_54 {dimension_numbers = #tpu.dot_dimension_numbers<[1], [0], [0], [1], [0, 0, 1, 1], [], []>} : vector<8x256xf32>, vector<256x512xf32>, vector<8x512xf32> -> vector<8x512xf32>
    %236 = vector.broadcast %8 : vector<1x512xf32> to vector<8x512xf32>
    %237 = arith.addf %235, %236 : vector<8x512xf32>
    %238 = vector.extract_strided_slice %237 {offsets = [0, 0], sizes = [8, 384], strides = [1, 1]} : vector<8x512xf32> to vector<8x384xf32>
    %239 = arith.negf %238 : vector<8x384xf32>
    %240 = math.exp %239 : vector<8x384xf32>
    %cst_55 = arith.constant 1.000000e+00 : f32
    %241 = vector.broadcast %cst_55 : f32 to vector<8x384xf32>
    %242 = arith.addf %241, %240 : vector<8x384xf32>
    %243 = arith.divf %241, %242 : vector<8x384xf32>
    %244 = vector.extract_strided_slice %243 {offsets = [0, 0], sizes = [8, 128], strides = [1, 1]} : vector<8x384xf32> to vector<8x128xf32>
    %245 = vector.extract_strided_slice %243 {offsets = [0, 128], sizes = [8, 128], strides = [1, 1]} : vector<8x384xf32> to vector<8x128xf32>
    %246 = vector.extract_strided_slice %243 {offsets = [0, 256], sizes = [8, 128], strides = [1, 1]} : vector<8x384xf32> to vector<8x128xf32>
    %247 = vector.extract_strided_slice %237 {offsets = [0, 384], sizes = [8, 128], strides = [1, 1]} : vector<8x512xf32> to vector<8x128xf32>
    %248 = math.tanh %247 : vector<8x128xf32>
    %249 = arith.mulf %245, %202 : vector<8x128xf32>
    %250 = arith.mulf %244, %248 : vector<8x128xf32>
    %251 = arith.addf %249, %250 : vector<8x128xf32>
    %252 = math.tanh %251 : vector<8x128xf32>
    %253 = arith.mulf %246, %252 : vector<8x128xf32>
    %254 = tpu.concatenate %204, %224 in 1 : vector<8x128xf32>, vector<8x128xf32> -> vector<8x256xf32>
    %cst_56 = arith.constant dense<0.000000e+00> : vector<8x512xf32>
    %255 = tpu.matmul %254, %6, %cst_56 {dimension_numbers = #tpu.dot_dimension_numbers<[1], [0], [0], [1], [0, 0, 1, 1], [], []>} : vector<8x256xf32>, vector<256x512xf32>, vector<8x512xf32> -> vector<8x512xf32>
    %256 = vector.broadcast %10 : vector<1x512xf32> to vector<8x512xf32>
    %257 = arith.addf %255, %256 : vector<8x512xf32>
    %258 = vector.extract_strided_slice %257 {offsets = [0, 0], sizes = [8, 384], strides = [1, 1]} : vector<8x512xf32> to vector<8x384xf32>
    %259 = arith.negf %258 : vector<8x384xf32>
    %260 = math.exp %259 : vector<8x384xf32>
    %cst_57 = arith.constant 1.000000e+00 : f32
    %261 = vector.broadcast %cst_57 : f32 to vector<8x384xf32>
    %262 = arith.addf %261, %260 : vector<8x384xf32>
    %263 = arith.divf %261, %262 : vector<8x384xf32>
    %264 = vector.extract_strided_slice %263 {offsets = [0, 0], sizes = [8, 128], strides = [1, 1]} : vector<8x384xf32> to vector<8x128xf32>
    %265 = vector.extract_strided_slice %263 {offsets = [0, 128], sizes = [8, 128], strides = [1, 1]} : vector<8x384xf32> to vector<8x128xf32>
    %266 = vector.extract_strided_slice %263 {offsets = [0, 256], sizes = [8, 128], strides = [1, 1]} : vector<8x384xf32> to vector<8x128xf32>
    %267 = vector.extract_strided_slice %257 {offsets = [0, 384], sizes = [8, 128], strides = [1, 1]} : vector<8x512xf32> to vector<8x128xf32>
    %268 = math.tanh %267 : vector<8x128xf32>
    %269 = arith.mulf %265, %222 : vector<8x128xf32>
    %270 = arith.mulf %264, %268 : vector<8x128xf32>
    %271 = arith.addf %269, %270 : vector<8x128xf32>
    %272 = math.tanh %271 : vector<8x128xf32>
    %273 = arith.mulf %266, %272 : vector<8x128xf32>
    %c8_i32_58 = arith.constant 8 : i32
    %274 = arith.muli %c4_i32, %c8_i32_58 : i32
    %275 = tpu.assume_multiple %274, 8 : i32
    %276 = arith.index_cast %275 : i32 to index
    %c0_59 = arith.constant 0 : index
    %277 = vector.load %arg11[%276, %c0_59] : memref<64x128xf32, #tpu.memory_space<vmem>>, vector<8x128xf32>
    tpu.vector_store %arg11[%276, %c0_59], %273 {strides = array<i32>} : memref<64x128xf32, #tpu.memory_space<vmem>>, vector<8x128xf32>,
    %c5_i32 = arith.constant 5 : i32
    %c1_i32_60 = arith.constant 1 : i32
    %278 = arith.addi %c5_i32, %c1_i32_60 : i32
    %c8_i32_61 = arith.constant 8 : i32
    %279 = arith.muli %278, %c8_i32_61 : i32
    %280 = tpu.assume_multiple %279, 8 : i32
    %281 = arith.index_cast %280 : i32 to index
    %c0_62 = arith.constant 0 : index
    %282 = vector.load %arg11[%281, %c0_62] : memref<64x128xf32, #tpu.memory_space<vmem>>, vector<8x128xf32>
    %283 = tpu.concatenate %282, %253 in 1 : vector<8x128xf32>, vector<8x128xf32> -> vector<8x256xf32>
    %cst_63 = arith.constant dense<0.000000e+00> : vector<8x512xf32>
    %284 = tpu.matmul %283, %4, %cst_63 {dimension_numbers = #tpu.dot_dimension_numbers<[1], [0], [0], [1], [0, 0, 1, 1], [], []>} : vector<8x256xf32>, vector<256x512xf32>, vector<8x512xf32> -> vector<8x512xf32>
    %285 = vector.broadcast %8 : vector<1x512xf32> to vector<8x512xf32>
    %286 = arith.addf %284, %285 : vector<8x512xf32>
    %287 = vector.extract_strided_slice %286 {offsets = [0, 0], sizes = [8, 384], strides = [1, 1]} : vector<8x512xf32> to vector<8x384xf32>
    %288 = arith.negf %287 : vector<8x384xf32>
    %289 = math.exp %288 : vector<8x384xf32>
    %cst_64 = arith.constant 1.000000e+00 : f32
    %290 = vector.broadcast %cst_64 : f32 to vector<8x384xf32>
    %291 = arith.addf %290, %289 : vector<8x384xf32>
    %292 = arith.divf %290, %291 : vector<8x384xf32>
    %293 = vector.extract_strided_slice %292 {offsets = [0, 0], sizes = [8, 128], strides = [1, 1]} : vector<8x384xf32> to vector<8x128xf32>
    %294 = vector.extract_strided_slice %292 {offsets = [0, 128], sizes = [8, 128], strides = [1, 1]} : vector<8x384xf32> to vector<8x128xf32>
    %295 = vector.extract_strided_slice %292 {offsets = [0, 256], sizes = [8, 128], strides = [1, 1]} : vector<8x384xf32> to vector<8x128xf32>
    %296 = vector.extract_strided_slice %286 {offsets = [0, 384], sizes = [8, 128], strides = [1, 1]} : vector<8x512xf32> to vector<8x128xf32>
    %297 = math.tanh %296 : vector<8x128xf32>
    %298 = arith.mulf %294, %251 : vector<8x128xf32>
    %299 = arith.mulf %293, %297 : vector<8x128xf32>
    %300 = arith.addf %298, %299 : vector<8x128xf32>
    %301 = math.tanh %300 : vector<8x128xf32>
    %302 = arith.mulf %295, %301 : vector<8x128xf32>
    %303 = tpu.concatenate %253, %273 in 1 : vector<8x128xf32>, vector<8x128xf32> -> vector<8x256xf32>
    %cst_65 = arith.constant dense<0.000000e+00> : vector<8x512xf32>
    %304 = tpu.matmul %303, %6, %cst_65 {dimension_numbers = #tpu.dot_dimension_numbers<[1], [0], [0], [1], [0, 0, 1, 1], [], []>} : vector<8x256xf32>, vector<256x512xf32>, vector<8x512xf32> -> vector<8x512xf32>
    %305 = vector.broadcast %10 : vector<1x512xf32> to vector<8x512xf32>
    %306 = arith.addf %304, %305 : vector<8x512xf32>
    %307 = vector.extract_strided_slice %306 {offsets = [0, 0], sizes = [8, 384], strides = [1, 1]} : vector<8x512xf32> to vector<8x384xf32>
    %308 = arith.negf %307 : vector<8x384xf32>
    %309 = math.exp %308 : vector<8x384xf32>
    %cst_66 = arith.constant 1.000000e+00 : f32
    %310 = vector.broadcast %cst_66 : f32 to vector<8x384xf32>
    %311 = arith.addf %310, %309 : vector<8x384xf32>
    %312 = arith.divf %310, %311 : vector<8x384xf32>
    %313 = vector.extract_strided_slice %312 {offsets = [0, 0], sizes = [8, 128], strides = [1, 1]} : vector<8x384xf32> to vector<8x128xf32>
    %314 = vector.extract_strided_slice %312 {offsets = [0, 128], sizes = [8, 128], strides = [1, 1]} : vector<8x384xf32> to vector<8x128xf32>
    %315 = vector.extract_strided_slice %312 {offsets = [0, 256], sizes = [8, 128], strides = [1, 1]} : vector<8x384xf32> to vector<8x128xf32>
    %316 = vector.extract_strided_slice %306 {offsets = [0, 384], sizes = [8, 128], strides = [1, 1]} : vector<8x512xf32> to vector<8x128xf32>
    %317 = math.tanh %316 : vector<8x128xf32>
    %318 = arith.mulf %314, %271 : vector<8x128xf32>
    %319 = arith.mulf %313, %317 : vector<8x128xf32>
    %320 = arith.addf %318, %319 : vector<8x128xf32>
    %321 = math.tanh %320 : vector<8x128xf32>
    %322 = arith.mulf %315, %321 : vector<8x128xf32>
    %c8_i32_67 = arith.constant 8 : i32
    %323 = arith.muli %c5_i32, %c8_i32_67 : i32
    %324 = tpu.assume_multiple %323, 8 : i32
    %325 = arith.index_cast %324 : i32 to index
    %c0_68 = arith.constant 0 : index
    %326 = vector.load %arg11[%325, %c0_68] : memref<64x128xf32, #tpu.memory_space<vmem>>, vector<8x128xf32>
    tpu.vector_store %arg11[%325, %c0_68], %322 {strides = array<i32>} : memref<64x128xf32, #tpu.memory_space<vmem>>, vector<8x128xf32>,
    %c6_i32 = arith.constant 6 : i32
    %c1_i32_69 = arith.constant 1 : i32
    %327 = arith.addi %c6_i32, %c1_i32_69 : i32
    %c8_i32_70 = arith.constant 8 : i32
    %328 = arith.muli %327, %c8_i32_70 : i32
    %329 = tpu.assume_multiple %328, 8 : i32
    %330 = arith.index_cast %329 : i32 to index
    %c0_71 = arith.constant 0 : index
    %331 = vector.load %arg11[%330, %c0_71] : memref<64x128xf32, #tpu.memory_space<vmem>>, vector<8x128xf32>
    %332 = tpu.concatenate %331, %302 in 1 : vector<8x128xf32>, vector<8x128xf32> -> vector<8x256xf32>
    %cst_72 = arith.constant dense<0.000000e+00> : vector<8x512xf32>
    %333 = tpu.matmul %332, %4, %cst_72 {dimension_numbers = #tpu.dot_dimension_numbers<[1], [0], [0], [1], [0, 0, 1, 1], [], []>} : vector<8x256xf32>, vector<256x512xf32>, vector<8x512xf32> -> vector<8x512xf32>
    %334 = vector.broadcast %8 : vector<1x512xf32> to vector<8x512xf32>
    %335 = arith.addf %333, %334 : vector<8x512xf32>
    %336 = vector.extract_strided_slice %335 {offsets = [0, 0], sizes = [8, 384], strides = [1, 1]} : vector<8x512xf32> to vector<8x384xf32>
    %337 = arith.negf %336 : vector<8x384xf32>
    %338 = math.exp %337 : vector<8x384xf32>
    %cst_73 = arith.constant 1.000000e+00 : f32
    %339 = vector.broadcast %cst_73 : f32 to vector<8x384xf32>
    %340 = arith.addf %339, %338 : vector<8x384xf32>
    %341 = arith.divf %339, %340 : vector<8x384xf32>
    %342 = vector.extract_strided_slice %341 {offsets = [0, 0], sizes = [8, 128], strides = [1, 1]} : vector<8x384xf32> to vector<8x128xf32>
    %343 = vector.extract_strided_slice %341 {offsets = [0, 128], sizes = [8, 128], strides = [1, 1]} : vector<8x384xf32> to vector<8x128xf32>
    %344 = vector.extract_strided_slice %341 {offsets = [0, 256], sizes = [8, 128], strides = [1, 1]} : vector<8x384xf32> to vector<8x128xf32>
    %345 = vector.extract_strided_slice %335 {offsets = [0, 384], sizes = [8, 128], strides = [1, 1]} : vector<8x512xf32> to vector<8x128xf32>
    %346 = math.tanh %345 : vector<8x128xf32>
    %347 = arith.mulf %343, %300 : vector<8x128xf32>
    %348 = arith.mulf %342, %346 : vector<8x128xf32>
    %349 = arith.addf %347, %348 : vector<8x128xf32>
    %350 = math.tanh %349 : vector<8x128xf32>
    %351 = arith.mulf %344, %350 : vector<8x128xf32>
    %352 = tpu.concatenate %302, %322 in 1 : vector<8x128xf32>, vector<8x128xf32> -> vector<8x256xf32>
    %cst_74 = arith.constant dense<0.000000e+00> : vector<8x512xf32>
    %353 = tpu.matmul %352, %6, %cst_74 {dimension_numbers = #tpu.dot_dimension_numbers<[1], [0], [0], [1], [0, 0, 1, 1], [], []>} : vector<8x256xf32>, vector<256x512xf32>, vector<8x512xf32> -> vector<8x512xf32>
    %354 = vector.broadcast %10 : vector<1x512xf32> to vector<8x512xf32>
    %355 = arith.addf %353, %354 : vector<8x512xf32>
    %356 = vector.extract_strided_slice %355 {offsets = [0, 0], sizes = [8, 384], strides = [1, 1]} : vector<8x512xf32> to vector<8x384xf32>
    %357 = arith.negf %356 : vector<8x384xf32>
    %358 = math.exp %357 : vector<8x384xf32>
    %cst_75 = arith.constant 1.000000e+00 : f32
    %359 = vector.broadcast %cst_75 : f32 to vector<8x384xf32>
    %360 = arith.addf %359, %358 : vector<8x384xf32>
    %361 = arith.divf %359, %360 : vector<8x384xf32>
    %362 = vector.extract_strided_slice %361 {offsets = [0, 0], sizes = [8, 128], strides = [1, 1]} : vector<8x384xf32> to vector<8x128xf32>
    %363 = vector.extract_strided_slice %361 {offsets = [0, 128], sizes = [8, 128], strides = [1, 1]} : vector<8x384xf32> to vector<8x128xf32>
    %364 = vector.extract_strided_slice %361 {offsets = [0, 256], sizes = [8, 128], strides = [1, 1]} : vector<8x384xf32> to vector<8x128xf32>
    %365 = vector.extract_strided_slice %355 {offsets = [0, 384], sizes = [8, 128], strides = [1, 1]} : vector<8x512xf32> to vector<8x128xf32>
    %366 = math.tanh %365 : vector<8x128xf32>
    %367 = arith.mulf %363, %320 : vector<8x128xf32>
    %368 = arith.mulf %362, %366 : vector<8x128xf32>
    %369 = arith.addf %367, %368 : vector<8x128xf32>
    %370 = math.tanh %369 : vector<8x128xf32>
    %371 = arith.mulf %364, %370 : vector<8x128xf32>
    %c8_i32_76 = arith.constant 8 : i32
    %372 = arith.muli %c6_i32, %c8_i32_76 : i32
    %373 = tpu.assume_multiple %372, 8 : i32
    %374 = arith.index_cast %373 : i32 to index
    %c0_77 = arith.constant 0 : index
    %375 = vector.load %arg11[%374, %c0_77] : memref<64x128xf32, #tpu.memory_space<vmem>>, vector<8x128xf32>
    tpu.vector_store %arg11[%374, %c0_77], %371 {strides = array<i32>} : memref<64x128xf32, #tpu.memory_space<vmem>>, vector<8x128xf32>,
    %c7_i32 = arith.constant 7 : i32
    %376 = tpu.concatenate %351, %371 in 1 : vector<8x128xf32>, vector<8x128xf32> -> vector<8x256xf32>
    %cst_78 = arith.constant dense<0.000000e+00> : vector<8x512xf32>
    %377 = tpu.matmul %376, %6, %cst_78 {dimension_numbers = #tpu.dot_dimension_numbers<[1], [0], [0], [1], [0, 0, 1, 1], [], []>} : vector<8x256xf32>, vector<256x512xf32>, vector<8x512xf32> -> vector<8x512xf32>
    %378 = vector.broadcast %10 : vector<1x512xf32> to vector<8x512xf32>
    %379 = arith.addf %377, %378 : vector<8x512xf32>
    %380 = vector.extract_strided_slice %379 {offsets = [0, 0], sizes = [8, 384], strides = [1, 1]} : vector<8x512xf32> to vector<8x384xf32>
    %381 = arith.negf %380 : vector<8x384xf32>
    %382 = math.exp %381 : vector<8x384xf32>
    %cst_79 = arith.constant 1.000000e+00 : f32
    %383 = vector.broadcast %cst_79 : f32 to vector<8x384xf32>
    %384 = arith.addf %383, %382 : vector<8x384xf32>
    %385 = arith.divf %383, %384 : vector<8x384xf32>
    %386 = vector.extract_strided_slice %385 {offsets = [0, 0], sizes = [8, 128], strides = [1, 1]} : vector<8x384xf32> to vector<8x128xf32>
    %387 = vector.extract_strided_slice %385 {offsets = [0, 128], sizes = [8, 128], strides = [1, 1]} : vector<8x384xf32> to vector<8x128xf32>
    %388 = vector.extract_strided_slice %385 {offsets = [0, 256], sizes = [8, 128], strides = [1, 1]} : vector<8x384xf32> to vector<8x128xf32>
    %389 = vector.extract_strided_slice %379 {offsets = [0, 384], sizes = [8, 128], strides = [1, 1]} : vector<8x512xf32> to vector<8x128xf32>
    %390 = math.tanh %389 : vector<8x128xf32>
    %391 = arith.mulf %387, %369 : vector<8x128xf32>
    %392 = arith.mulf %386, %390 : vector<8x128xf32>
    %393 = arith.addf %391, %392 : vector<8x128xf32>
    %394 = math.tanh %393 : vector<8x128xf32>
    %395 = arith.mulf %388, %394 : vector<8x128xf32>
    %c56_i32 = arith.constant 56 : i32
    %396 = tpu.assume_multiple %c56_i32, 8 : i32
    %397 = arith.index_cast %396 : i32 to index
    %c0_80 = arith.constant 0 : index
    %398 = vector.load %arg11[%397, %c0_80] : memref<64x128xf32, #tpu.memory_space<vmem>>, vector<8x128xf32>
    tpu.vector_store %arg11[%397, %c0_80], %395 {strides = array<i32>} : memref<64x128xf32, #tpu.memory_space<vmem>>, vector<8x128xf32>,
    %c4_i32_81 = arith.constant 4 : i32
    %399 = arith.cmpi eq, %arg0, %c4_i32_81 : i32
    %400 = arith.extui %399 : i1 to i32
    %c0_i32_82 = arith.constant 0 : i32
    %401 = arith.cmpi ne, %400, %c0_i32_82 : i32
    scf.if %401 {
      %cst_83 = arith.constant 0.000000e+00 : f32
      %402 = vector.broadcast %cst_83 : f32 to vector<8x128xf32>
      %403 = arith.maximumf %395, %402 : vector<8x128xf32>
      %c0_84 = arith.constant 0 : index
      %c0_85 = arith.constant 0 : index
      %404 = vector.load %arg4[%c0_84, %c0_85] : memref<128x64xf32, #tpu.memory_space<vmem>>, vector<128x64xf32>
      %cst_86 = arith.constant dense<0.000000e+00> : vector<8x64xf32>
      %405 = tpu.matmul %403, %404, %cst_86 {dimension_numbers = #tpu.dot_dimension_numbers<[1], [0], [0], [1], [0, 0, 1, 1], [], []>} : vector<8x128xf32>, vector<128x64xf32>, vector<8x64xf32> -> vector<8x64xf32>
      %c0_87 = arith.constant 0 : index
      %c0_88 = arith.constant 0 : index
      %406 = vector.load %arg5[%c0_87, %c0_88] : memref<1x64xf32, #tpu.memory_space<vmem>>, vector<1x64xf32>
      %407 = vector.broadcast %406 : vector<1x64xf32> to vector<8x64xf32>
      %408 = arith.addf %405, %407 : vector<8x64xf32>
      %cst_89 = arith.constant 0.000000e+00 : f32
      %409 = vector.broadcast %cst_89 : f32 to vector<8x64xf32>
      %410 = arith.maximumf %408, %409 : vector<8x64xf32>
      %c0_90 = arith.constant 0 : index
      %c0_91 = arith.constant 0 : index
      %411 = vector.load %arg6[%c0_90, %c0_91] : memref<64x32xf32, #tpu.memory_space<vmem>>, vector<64x32xf32>
      %cst_92 = arith.constant dense<0.000000e+00> : vector<8x32xf32>
      %412 = tpu.matmul %410, %411, %cst_92 {dimension_numbers = #tpu.dot_dimension_numbers<[1], [0], [0], [1], [0, 0, 1, 1], [], []>} : vector<8x64xf32>, vector<64x32xf32>, vector<8x32xf32> -> vector<8x32xf32>
      %c0_93 = arith.constant 0 : index
      %c0_94 = arith.constant 0 : index
      %413 = vector.load %arg7[%c0_93, %c0_94] : memref<1x32xf32, #tpu.memory_space<vmem>>, vector<1x32xf32>
      %414 = vector.broadcast %413 : vector<1x32xf32> to vector<8x32xf32>
      %415 = arith.addf %412, %414 : vector<8x32xf32>
      %cst_95 = arith.constant 0.000000e+00 : f32
      %416 = vector.broadcast %cst_95 : f32 to vector<8x32xf32>
      %417 = arith.maximumf %415, %416 : vector<8x32xf32>
      %c0_96 = arith.constant 0 : index
      %c0_97 = arith.constant 0 : index
      %418 = vector.load %arg8[%c0_96, %c0_97] : memref<32x1xf32, #tpu.memory_space<vmem>>, vector<32x1xf32>
      %cst_98 = arith.constant dense<0.000000e+00> : vector<8x1xf32>
      %419 = tpu.matmul %417, %418, %cst_98 {dimension_numbers = #tpu.dot_dimension_numbers<[1], [0], [0], [1], [0, 0, 1, 1], [], []>} : vector<8x32xf32>, vector<32x1xf32>, vector<8x1xf32> -> vector<8x1xf32>
      %c0_99 = arith.constant 0 : index
      %c0_100 = arith.constant 0 : index
      %420 = vector.load %arg9[%c0_99, %c0_100] : memref<1x1xf32, #tpu.memory_space<vmem>>, vector<1x1xf32>
      %421 = vector.broadcast %420 : vector<1x1xf32> to vector<8x1xf32>
      %422 = arith.addf %419, %421 : vector<8x1xf32>
      %c0_101 = arith.constant 0 : index
      %c0_102 = arith.constant 0 : index
      %423 = vector.load %arg10[%c0_101, %c0_102] : memref<8x1xf32, #tpu.memory_space<vmem>>, vector<8x1xf32>
      tpu.vector_store %arg10[%c0_101, %c0_102], %422 {strides = array<i32>} : memref<8x1xf32, #tpu.memory_space<vmem>>, vector<8x1xf32>,
    } else {
    }
    return
  }
  func.func @transform_0(%arg0: i32) -> (i32, i32) {
    %c0_i32 = arith.constant 0 : i32
    %c0_i32_0 = arith.constant 0 : i32
    %c0_i32_1 = arith.constant 0 : i32
    return %c0_i32, %c0_i32_0 : i32, i32
  }
  func.func @transform_1(%arg0: i32) -> (i32, i32, i32) {
    %c0_i32 = arith.constant 0 : i32
    %c0_i32_0 = arith.constant 0 : i32
    %c0_i32_1 = arith.constant 0 : i32
    return %arg0, %c0_i32, %c0_i32_0 : i32, i32, i32
  }
  func.func @transform_2(%arg0: i32) -> (i32, i32, i32) {
    %c0_i32 = arith.constant 0 : i32
    %c0_i32_0 = arith.constant 0 : i32
    %c0_i32_1 = arith.constant 0 : i32
    return %arg0, %c0_i32, %c0_i32_0 : i32, i32, i32
  }
  func.func @transform_3(%arg0: i32) -> (i32, i32) {
    %c0_i32 = arith.constant 0 : i32
    %c0_i32_0 = arith.constant 0 : i32
    %c0_i32_1 = arith.constant 0 : i32
    return %c0_i32, %c0_i32_0 : i32, i32
  }
  func.func @transform_4(%arg0: i32) -> (i32, i32) {
    %c0_i32 = arith.constant 0 : i32
    %c0_i32_0 = arith.constant 0 : i32
    %c0_i32_1 = arith.constant 0 : i32
    return %c0_i32, %c0_i32_0 : i32, i32
  }
  func.func @transform_5(%arg0: i32) -> (i32, i32) {
    %c0_i32 = arith.constant 0 : i32
    %c0_i32_0 = arith.constant 0 : i32
    %c0_i32_1 = arith.constant 0 : i32
    return %c0_i32, %c0_i32_0 : i32, i32
  }
  func.func @transform_6(%arg0: i32) -> (i32, i32) {
    %c0_i32 = arith.constant 0 : i32
    %c0_i32_0 = arith.constant 0 : i32
    %c0_i32_1 = arith.constant 0 : i32
    return %c0_i32, %c0_i32_0 : i32, i32
  }
  func.func @transform_7(%arg0: i32) -> (i32, i32) {
    %c0_i32 = arith.constant 0 : i32
    %c0_i32_0 = arith.constant 0 : i32
    %c0_i32_1 = arith.constant 0 : i32
    return %c0_i32, %c0_i32_0 : i32, i32
  }
  func.func @transform_8(%arg0: i32) -> (i32, i32) {
    %c0_i32 = arith.constant 0 : i32
    %c0_i32_0 = arith.constant 0 : i32
    %c0_i32_1 = arith.constant 0 : i32
    return %c0_i32, %c0_i32_0 : i32, i32
  }
  func.func @transform_9(%arg0: i32) -> (i32, i32) {
    %c0_i32 = arith.constant 0 : i32
    %c0_i32_0 = arith.constant 0 : i32
    %c0_i32_1 = arith.constant 0 : i32
    return %c0_i32, %c0_i32_0 : i32, i32
  }
}

</mosaic_0001>

<bundles_post_ra>
// kernel: net_forward.1
= control target key start
LH: loop header
LB: loop body
LE: loop exit
PB: predicated region body
PF: predicated region fallthrough
CT: control target
= control target key end

     0   :  { %s8825_s0 = inlined_call_operand.vmem [shape: f32[64,128], index: 0, kind: input, shape index: {}]   ;;  %s8826_s1 = inlined_call_operand.hbm [shape: f32[10,256,512], index: 1, kind: input, shape index: {}]   ;;  %s8827_s2 = inlined_call_operand.hbm [shape: f32[10,1,512], index: 2, kind: input, shape index: {}]   ;;  %s8828_s3 = inlined_call_operand.vmem [shape: f32[128,64], index: 3, kind: input, shape index: {}]   ;;  %s8829_s4 = inlined_call_operand.hbm [shape: f32[1,64], index: 4, kind: input, shape index: {}]   ;;  %s8830_s5 = inlined_call_operand.vmem [shape: f32[64,32], index: 5, kind: input, shape index: {}]   ;;  %s8831_s6 = inlined_call_operand.hbm [shape: f32[1,32], index: 6, kind: input, shape index: {}]   ;;  %s8832_s7 = inlined_call_operand.vmem [shape: f32[32,1], index: 7, kind: input, shape index: {}]   ;;  %s8833_s8 = inlined_call_operand.<no memory space> [shape: f32[1,1], index: 8, kind: input, shape index: {}]   ;;  %s8834_s9 = inlined_call_operand.vmem [shape: f32[8,1], index: 9, kind: output, shape index: {}]  }
   0x1   :  { %9131 = sst [smem:[#allocation150_spill]] %s8826_s1  ;;  %v14_v0 = vstv %s8833_s8 }
   0x2   :  { %9132 = sst [smem:[#allocation151_spill]] %s8829_s4  ;;  %15 = vst [vmem:[#allocation3] sm:$0x1] %v14_v0 }
   0x3   :  { %9133 = sst [smem:[#allocation152_spill]] %s8831_s6 }
   0x4   :  { %16 = vsyncpa [#allocation5], 0 }
   0x5   :  { %18 = vsyncpa [#allocation5 + $0x1], 0 }
   0x6   :  { %19 = vsyncpa [#allocation7], 0 }
   0x7   :  { %21 = vsyncpa [#allocation7 + $0x1], 0 }
   0x8   :  { %22 = vsyncpa [#allocation10], 0  ;;  %s6719_s11 = smov 0   ;;  %s6721_s12 = smov 0  }
   0x9   :  { %s6723_s13 = smov 0   ;;  %s6725_s14 = smov 0  }
   0xa LB: > { %s6738_s8 = sadd.s32 4294967295, %s6652_s14   ;;  %s6741_s15 = sadd.s32 1, %s6652_s14   ;;  %s6652_s14 = sphi %s6725_s14, %s9821_s14   ;;  %s6648_s13 = sphi %s6723_s13, %s9820_s13   ;;  %s6644_s12 = sphi %s6721_s12, %s9819_s12   ;;  %s6640_s11 = sphi %s6719_s11, %s9818_s11  }
   0xb   : > { %s53_s16 = ssub.s32 %s6652_s14, %s6741_s15  ;;  %s56_s17 = sadd.s32 1, %s6648_s13 }
   0xc   : > { %p54_p0 = scmp.eq.s32.totalorder %s53_s16, 0  ;;  %p63_p1 = scmp.ne.s32.totalorder %s6648_s13, %s6644_s12 }
   0xd   : > { %p64_p2 = scmp.eq.s32.totalorder %s6652_s14, 0  ;;  %p69_p3 = scmp.ne.s32.totalorder %s6644_s12, %s6640_s11 }
   0xe   : > { %s6751_s18 = scalar_select %p54_p0, %s6648_s13, %s56_s17  }
   0xf   : > { %p6753_p4 = por %p64_p2, %p63_p1  ;;  %p8835_p5 = scmp.eq.s32.totalorder %s6738_s8, 0 }
  0x10   : > { %p3768_p6 = scmp.ge.s32.totalorder %s6652_s14, 1  ;;  %p253_p7 = scmp.lt.s32.totalorder %s6652_s14, 6 }
  0x11   : > { %p6762_p8 = por %p8835_p5, %p69_p3  ;;  %s6654_s22 = smov [#allocation8]  }
  0x12   : > { %p6767_p10 = pnand %p3768_p6, %p253_p7  ;;  %s272_s23 = sshll.u32 %s6654_s22, 4  ;;  %s273_s23 = int_to_ptr.vmem [resolvable:$true] %s272_s23 }
  0x13   : > { %s9135_s20 = scalar_select %p6762_p8, 1, 0 }
  0x14   : > { %s9136_s21 = scalar_select %p6767_p10, 1, 0 }
  0x15   : > { %p6173_p11 = pneg %p6767_p10  ;;  %p6189_p12 = scmp.lt.s32.totalorder %s6652_s14, 5 }
  0x16   : > { %s6655_s25 = smov [#allocation9]   ;;  %s6789_s28 = sand.u32 1, %s6648_s13  }
  0x17   : > { %p6776_p13 = pnand %p6173_p11, %p8835_p5  ;;  %s286_s26 = sshll.u32 %s6655_s25, 4  ;;  %s6786_s26 = int_to_ptr.vmem [resolvable:$true] %s286_s26 }
  0x18   : > { %p6782_p0 = pnand %p6189_p12, %p6753_p4  ;;  %s9139_s4 = sld [smem:[#allocation151_spill]] }
  0x19   : > { %p6492_p2 = pneg %p6776_p13 }
  0x1a   : > { %s9138_s27 = scalar_select %p6782_p0, 1, 0 }
  0x1e   : > { %s6490_s10 = scalar_lea.hbm %s9139_s4, 16 }
  0x1f   : > { %p6491_p1 = scmp.ne.s32.totalorder %s9139_s4, %s6490_s10  ;;  %p6497_p6 = scmp.lt.u32.totalorder %s6490_s10, %s9139_s4 }
  0x21   : > { %p6493_p3 = pnand %p6492_p2, %p6491_p1 }
  0x23   : > { %p6494_p4 = pneg %p6493_p3 }
  0x25   : > { %p6499_p7 = pnand %p6497_p6, %p6494_p4 }
  0x27   : > { %6502 = shalt.err (!%p6499_p7)
}
  0x28   : > { %s6503_s22 = scalar_lea.vmem %s273_s23, 16  ;;  %s6510_s25 = scalar_lea.vmem %s273_s23, 32 }
  0x29   : > { %p6504_p11 = scmp.ne.s32.totalorder %s273_s23, %s6503_s22  ;;  %p6511_p5 = scmp.lt.s32.totalorder %s273_s23, %s273_s23 }
  0x2a   : > { %p6512_p8 = scmp.lt.s32.totalorder %s6510_s25, %s6503_s22 }
  0x2b   : > { %p6506_p12 = pnand %p6504_p11, %p6492_p2 }
  0x2c   : > { %p6513_p10 = por %p6512_p8, %p6511_p5 }
  0x2d   : > { %p6507_p9 = pneg %p6506_p12 }
  0x2f   : > { %p6514_p0 = pnand %p6513_p10, %p6507_p9 }
  0x31   : > { %6517 = shalt.err (!%p6514_p0)
}
  0x32   : > { %6176 = dma.hbm_to_vmem [thread:$0]  (!%p6776_p13), %s9139_s4, 16, %s273_s23, [#allocation7]  }
  0x33   : > { %s9140_s6 = sld [smem:[#allocation152_spill]] }
  0x39   : > { %s6518_s16 = scalar_lea.hbm %s9140_s6, 16 }
  0x3a   : > { %p6519_p1 = scmp.ne.s32.totalorder %s9140_s6, %s6518_s16  ;;  %p6525_p9 = scmp.lt.u32.totalorder %s6518_s16, %s9140_s6 }
  0x3c   : > { %p6521_p5 = pnand %p6519_p1, %p6492_p2 }
  0x3e   : > { %p6522_p8 = pneg %p6521_p5 }
  0x40   : > { %p6527_p10 = pnand %p6525_p9, %p6522_p8 }
  0x42   : > { %6530 = shalt.err (!%p6527_p10)
}
  0x43   : > { %s6531_s23 = scalar_lea.vmem %s6786_s26, 16  ;;  %s6538_s29 = scalar_lea.vmem %s6786_s26, 32 }
  0x44   : > { %p6532_p0 = scmp.ne.s32.totalorder %s6786_s26, %s6531_s23  ;;  %p6539_p6 = scmp.lt.s32.totalorder %s6786_s26, %s6786_s26 }
  0x45   : > { %p6540_p7 = scmp.lt.s32.totalorder %s6538_s29, %s6531_s23 }
  0x46   : > { %p6534_p3 = pnand %p6532_p0, %p6492_p2 }
  0x47   : > { %p6541_p11 = por %p6540_p7, %p6539_p6 }
  0x48   : > { %p6535_p4 = pneg %p6534_p3 }
  0x4a   : > { %p6542_p12 = pnand %p6541_p11, %p6535_p4 }
  0x4c   : > { %6545 = shalt.err (!%p6542_p12)
}
  0x4d   : > { %6179 = dma.hbm_to_vmem [thread:$0]  (!%p6776_p13), %s9140_s6, 16, %s6786_s26, [#allocation10]  }
  0x4e   : > { %s3772_s11 = sshll.u32 %s6789_s28, 11  ;;  %s3972_s16 = sshll.u32 %s6652_s14, 15 }
  0x4f   : > { %s9141_s1 = sld [smem:[#allocation150_spill]]  ;;  %s307_s24 = scalar_lea.vmem [#allocation4], %s3772_s11 }
  0x50   : > { %s315_s25 = sshll.u32 %s307_s24, 4  ;;  %s304_s23 = scalar_lea.sflag [#allocation5], %s6789_s28  ;;  %s6846_s25 = int_to_ptr.vmem [resolvable:$true] %s315_s25 }
  0x51   : > { %p9142_p1 = scmp.ne.s32.totalorder %s9138_s27, 0 }
  0x53   : > { %p6548_p13 = pneg %p9142_p1 }
  0x55   : > { %s6844_s22 = scalar_lea.hbm %s9141_s1, %s3972_s16  ;;  %s6551_s10 = scalar_lea.hbm %s9141_s1, 163840 }
  0x56   : > { %s6546_s29 = scalar_lea.hbm %s6844_s22, 32768  ;;  %p6552_p9 = scmp.lt.u32.totalorder %s6844_s22, %s9141_s1 }
  0x57   : > { %p6547_p2 = scmp.ne.s32.totalorder %s6844_s22, %s6546_s29  ;;  %p6553_p10 = scmp.lt.u32.totalorder %s6551_s10, %s6546_s29 }
  0x58   : > { %p6555_p3 = scmp.lt.u32.totalorder %s6546_s29, %s6844_s22 }
  0x59   : > { %p6549_p5 = pnand %p6548_p13, %p6547_p2  ;;  %p6554_p0 = por %p6553_p10, %p6552_p9 }
  0x5b   : > { %p6550_p8 = pneg %p6549_p5  ;;  %p6556_p4 = por %p6555_p3, %p6554_p0 }
  0x5d   : > { %p6557_p6 = pnand %p6556_p4, %p6550_p8 }
  0x5f   : > { %6560 = shalt.err (!%p6557_p6)
}
  0x60   : > { %s6561_s11 = scalar_lea.vmem %s6846_s25, 32768  ;;  %s6656_s19 = smov [#allocation4]  }
  0x61   : > { %p6562_p7 = scmp.ne.s32.totalorder %s6846_s25, %s6561_s11  ;;  %s6566_s24 = sshll.u32 %s6656_s19, 4  ;;  %s6567_s24 = int_to_ptr.vmem [resolvable:$false] %s6566_s24 }
  0x62   : > { %s6568_s26 = scalar_lea.vmem %s6567_s24, 65536  ;;  %p6569_p2 = scmp.lt.s32.totalorder %s6846_s25, %s6567_s24 }
  0x63   : > { %p6564_p11 = pnand %p6562_p7, %p6548_p13  ;;  %p6570_p5 = scmp.lt.s32.totalorder %s6568_s26, %s6561_s11 }
  0x65   : > { %p6565_p12 = pneg %p6564_p11  ;;  %p6571_p9 = por %p6570_p5, %p6569_p2 }
  0x67   : > { %p6572_p10 = pnand %p6571_p9, %p6565_p12 }
  0x69   : > { %6575 = shalt.err (!%p6572_p10)
}
  0x6a   : > { %s6657_s29 = smov 512   ;;  %s6658_s30 = smov 32  }
  0x6b   : > { %6183 = dma.hbm_to_vmem [thread:$0]  (!%p9142_p1), %s6844_s22, 32768, %s6846_s25, %s304_s23, %s6657_s29, %s6657_s29, %s6658_s30  }
  0x6c   : > { %s325_s10 = sand.u32 1, %s6652_s14   ;;  %s3776_s16 = sshll.u32 %s6789_s28, 3 }
  0x6d   : > { %s3974_s17 = sshll.u32 %s6652_s14, 7  ;;  %s329_s11 = scalar_lea.vmem [#allocation6], %s3776_s16 }
  0x6e   : > { %s337_s19 = sshll.u32 %s329_s11, 4  ;;  %s6882_s1 = scalar_lea.hbm %s8827_s2, %s3974_s17  ;;  %s6884_s19 = int_to_ptr.vmem [resolvable:$true] %s337_s19 }
  0x6f   : > { %s6886_s4 = scalar_lea.sflag [#allocation7], %s325_s10  ;;  %s6576_s6 = scalar_lea.hbm %s6882_s1, 128 }
  0x70   : > { %p6577_p8 = scmp.ne.s32.totalorder %s6882_s1, %s6576_s6  ;;  %s6581_s22 = scalar_lea.hbm %s8827_s2, 640 }
  0x71   : > { %p6582_p4 = scmp.lt.u32.totalorder %s6882_s1, %s8827_s2  ;;  %p6583_p6 = scmp.lt.u32.totalorder %s6581_s22, %s6576_s6 }
  0x72   : > { %p6579_p0 = pnand %p6577_p8, %p6548_p13  ;;  %p6585_p11 = scmp.lt.u32.totalorder %s6576_s6, %s6882_s1 }
  0x73   : > { %p6584_p7 = por %p6583_p6, %p6582_p4 }
  0x74   : > { %p6580_p3 = pneg %p6579_p0 }
  0x75   : > { %p6586_p12 = por %p6585_p11, %p6584_p7 }
  0x77   : > { %p6587_p2 = pnand %p6586_p12, %p6580_p3 }
  0x79   : > { %6590 = shalt.err (!%p6587_p2)
}
  0x7a   : > { %s6591_s29 = scalar_lea.vmem %s6884_s19, 128  ;;  %s6659_s30 = smov [#allocation6]  }
  0x7b   : > { %p6592_p5 = scmp.ne.s32.totalorder %s6884_s19, %s6591_s29  ;;  %s6596_s10 = sshll.u32 %s6659_s30, 4  ;;  %s6597_s10 = int_to_ptr.vmem [resolvable:$false] %s6596_s10 }
  0x7c   : > { %s6598_s16 = scalar_lea.vmem %s6597_s10, 256  ;;  %p6599_p8 = scmp.lt.s32.totalorder %s6884_s19, %s6597_s10 }
  0x7d   : > { %p6594_p9 = pnand %p6592_p5, %p6548_p13  ;;  %p6600_p0 = scmp.lt.s32.totalorder %s6598_s16, %s6591_s29 }
  0x7f   : > { %p6595_p10 = pneg %p6594_p9  ;;  %p6601_p4 = por %p6600_p0, %p6599_p8 }
  0x81   : > { %p6602_p6 = pnand %p6601_p4, %p6595_p10 }
  0x83   : > { %6605 = shalt.err (!%p6602_p6)
}
  0x84   : > { %s6660_s6 = smov 64   ;;  %s6661_s17 = smov 4  }
  0x85   : > { %6186 = dma.hbm_to_vmem [thread:$0]  (!%p9142_p1), %s6882_s1, 128, %s6884_s19, %s6886_s4, %s6660_s6, %s6660_s6, %s6661_s17  }
  0x86   : > { %p9143_p13 = scmp.ne.s32.totalorder %s9136_s21, 0 }
  0x88   : > { %349 = sbr.rel (%p9143_p13) target bundleno = 3276 (0xccc), region = 56 }
  0x8f   : > { %s351_s11 = sand.u32 1, %s6644_s12   ;;  %p9144_p3 = scmp.ne.s32.totalorder %s9135_s20, 0 }
  0x90   : > { %s3781_s24 = sshll.u32 %s351_s11, 11  ;;  %s352_s26 = scalar_lea.sflag [#allocation5], %s351_s11 }
  0x91   : > { %s6915_s14 = scalar_lea.vmem [#allocation4], %s3781_s24 }
  0x92   : > { %6623 = dma.done.wait (%p9144_p3), %s352_s26, 32768  }
  0x93   : > { %6625 = vsyncadd (%p9144_p3), %s352_s26, 4294934528  ;;  %s360_s28 = sand.u32 1, %s6738_s8   ;;  %s3782_s27 = sshll.u32 %s351_s11, 3 }
  0x94   : > { %s361_s1 = scalar_lea.sflag [#allocation7], %s360_s28  ;;  %s6922_s4 = scalar_lea.vmem [#allocation6], %s3782_s27 }
  0x95   : > { %6627 = dma.done.wait (%p9144_p3), %s361_s1, 128  }
  0x96   : > { %6629 = vsyncadd (%p9144_p3), %s361_s1, 4294967168  ;;  %p9145_p1 = scmp.eq.s32.totalorder %s6738_s8, 0 }
  0x98   : > { %6631 = dma.done.wait (%p9145_p1), [#allocation7], 16   ;;  %p9146_p7 = pmov %p9145_p1 }
  0x99   : > { %p9147_p11 = pmov %p9145_p1 }
  0x9a   : > { %6633 = vsyncadd (%p9146_p7), [#allocation7], 4294967280 }
  0x9b   : > { %6635 = dma.done.wait (%p9147_p11), [#allocation10], 16   ;;  %p9148_p12 = pmov %p9145_p1 }
  0x9c   : > { %p9149_p2 = scmp.ne.s32.totalorder %s6738_s8, 0 }
  0x9d   : > { %6637 = vsyncadd (%p9148_p12), [#allocation10], 4294967280  ;;  %v413_v1 = vld [vmem:[%s8825_s0] sm:$0xff] (!%p9149_p2)  ;;  %v414_v2 = vld [vmem:[%s8825_s0 + $0x8] sm:$0xff] (!%p9149_p2) }
  0x9e   : > { %412 = sbr.rel (%p9149_p2) target bundleno = 165 (0xa5), region = 76  ;;  %v415_v3 = vld [vmem:[%s8825_s0 + $0x10] sm:$0xff] (!%p9149_p2)  ;;  %421 = vst [vmem:[#allocation2] sm:$0xff] (!%p9149_p2), %v413_v1  ;;  %422 = vst [vmem:[#allocation2 + $0x8] sm:$0xff] (!%p9149_p2), %v414_v2  ;;  %v416_v4 = vld [vmem:[%s8825_s0 + $0x18] sm:$0xff] (!%p9149_p2) }
  0x9f   : > { %423 = vst [vmem:[#allocation2 + $0x10] sm:$0xff] (!%p9149_p2), %v415_v3  ;;  %v417_v5 = vld [vmem:[%s8825_s0 + $0x20] sm:$0xff] (!%p9149_p2)  ;;  %v418_v6 = vld [vmem:[%s8825_s0 + $0x28] sm:$0xff] (!%p9149_p2)  ;;  %424 = vst [vmem:[#allocation2 + $0x18] sm:$0xff] (!%p9149_p2), %v416_v4 }
  0xa0   : > { %425 = vst [vmem:[#allocation2 + $0x20] sm:$0xff] (!%p9149_p2), %v417_v5  ;;  %426 = vst [vmem:[#allocation2 + $0x28] sm:$0xff] (!%p9149_p2), %v418_v6  ;;  %v419_v7 = vld [vmem:[%s8825_s0 + $0x30] sm:$0xff] (!%p9149_p2)  ;;  %v420_v8 = vld [vmem:[%s8825_s0 + $0x38] sm:$0xff] (!%p9149_p2) }
  0xa1   : > { %427 = vst [vmem:[#allocation2 + $0x30] sm:$0xff] (!%p9149_p2), %v419_v7  ;;  %428 = vst [vmem:[#allocation2 + $0x38] sm:$0xff] (!%p9149_p2), %v420_v8 }
  0xa5 PF: > { %v430_v9 = vld [vmem:[%s6915_s14 + $0x8] sm:$0xff]  ;;  %v429_v11 = vld [vmem:[%s6915_s14] sm:$0xff]  ;;  %v8839_v16 = vmov 0.0   ;;  %v432_v28 = vld [vmem:[%s6915_s14 + $0x18] sm:$0xff]  ;;  %p3963_p5 = scmp.ne.s32.totalorder %s6738_s8, 4 }
  0xa6   : > { %v434_v10 = vld [vmem:[%s6915_s14 + $0x28] sm:$0xff]  ;;  %v433_v13 = vld [vmem:[%s6915_s14 + $0x20] sm:$0xff]  ;;  %775 = vmatprep.mubr.f32.mxu0 %v8839_v16  ;;  %846 = vmatprep.mubr.f32.mxu1 %v8839_v16  ;;  %v436_v29 = vld [vmem:[%s6915_s14 + $0x38] sm:$0xff]  ;;  %vm6664_vm0 = vmmov (!%p3963_p5), 0   ;;  %vm3524_vm1 = vcmask (!%p3963_p5), 523264   ;;  %vm3610_vm2 = vcmask (!%p3963_p5), 261120  }
  0xa7   : > { %v6965_v12 = vpack.c.bf16 %v434_v10, %v430_v9  ;;  %v438_v14 = vld [vmem:[%s6915_s14 + $0x48] sm:$0xff]  ;;  %v6972_v17 = vpack.c.bf16 %v433_v13, %v429_v11  ;;  %v437_v19 = vld [vmem:[%s6915_s14 + $0x40] sm:$0xff]  ;;  %v6993_v31 = vpack.c.bf16 %v436_v29, %v432_v28  ;;  %v431_v32 = vld [vmem:[%s6915_s14 + $0x10] sm:$0xff]  ;;  %vm3684_vm3 = vcmask (!%p3963_p5), 7168  }
  0xa8   : > { %v442_v15 = vld [vmem:[%s6915_s14 + $0x68] sm:$0xff]  ;;  %v441_v20 = vld [vmem:[%s6915_s14 + $0x60] sm:$0xff]  ;;  %v435_v33 = vld [vmem:[%s6915_s14 + $0x30] sm:$0xff] }
  0xa9   : > { %9150 = vst [vmem:[#allocation15_spill] sm:$0xff] %v6972_v17  ;;  %v6974_v18 = vpack.c.bf16 %v442_v15, %v438_v14  ;;  %v446_v21 = vld [vmem:[%s6915_s14 + $0x88] sm:$0xff]  ;;  %4072 = vmatprep.subr.bf16.mxu0 %v6965_v12  ;;  %v6982_v23 = vpack.c.bf16 %v441_v20, %v437_v19  ;;  %v445_v24 = vld [vmem:[%s6915_s14 + $0x80] sm:$0xff]  ;;  %9154 = vst [vmem:[#allocation19_spill] sm:$0xff] %v6993_v31  ;;  %v6997_v34 = vpack.c.bf16 %v435_v33, %v431_v32 }
  0xaa   : > { %v450_v22 = vld [vmem:[%s6915_s14 + $0xa8] sm:$0xff]  ;;  %4074 = vmatpush1.bf16.msra.mxu0 %v6972_v17  ;;  %v449_v25 = vld [vmem:[%s6915_s14 + $0xa0] sm:$0xff]  ;;  %4136 = vmatprep.subr.bf16.mxu1 %v6993_v31  ;;  %v440_v36 = vld [vmem:[%s6915_s14 + $0x58] sm:$0xff] }
  0xab   : > { %9151 = vst [vmem:[#allocation16_spill] sm:$0xff] %v6974_v18  ;;  %9152 = vst [vmem:[#allocation17_spill] sm:$0xff] %v6982_v23  ;;  %4076 = vmatprep.subr.bf16.mxu0 %v6974_v18  ;;  %v6987_v26 = vpack.c.bf16 %v450_v22, %v446_v21  ;;  %v454_v27 = vld [vmem:[%s6915_s14 + $0xc8] sm:$0xff]  ;;  %v7000_v35 = vpack.c.bf16 %v449_v25, %v445_v24  ;;  %v444_v37 = vld [vmem:[%s6915_s14 + $0x78] sm:$0xff]  ;;  %4138 = vmatpush1.bf16.msra.mxu1 %v6997_v34 }
  0xac   : > { %v458_v30 = vld [vmem:[%s6915_s14 + $0xe8] sm:$0xff]  ;;  %9155 = vst [vmem:[#allocation20_spill] sm:$0xff] %v6997_v34  ;;  %v439_v38 = vld [vmem:[%s6915_s14 + $0x50] sm:$0xff]  ;;  %v453_v40 = vld [vmem:[%s6915_s14 + $0xc0] sm:$0xff]  ;;  %v7012_v42 = vpack.c.bf16 %v444_v37, %v440_v36 }
  0xad   : > { %9153 = vst [vmem:[#allocation18_spill] sm:$0xff] %v6987_v26  ;;  %9156 = vst [vmem:[#allocation21_spill] sm:$0xff] %v7000_v35  ;;  %v7007_v39 = vpack.c.bf16 %v458_v30, %v454_v27  ;;  %v457_v41 = vld [vmem:[%s6915_s14 + $0xe0] sm:$0xff]  ;;  %v443_v43 = vld [vmem:[%s6915_s14 + $0x70] sm:$0xff] }
  0xae   : > { %4078 = vmatpush1.bf16.msra.mxu0 %v6982_v23  ;;  %9158 = vst [vmem:[#allocation23_spill] sm:$0xff] %v7012_v42  ;;  %v462_v44 = vld [vmem:[%s6915_s14 + $0x108] sm:$0xff]  ;;  %v7017_v46 = vpack.c.bf16 %v443_v43, %v439_v38  ;;  %v448_v47 = vld [vmem:[%s6915_s14 + $0x98] sm:$0xff]  ;;  %4140 = vmatprep.subr.bf16.mxu1 %v7012_v42  ;;  %v447_v49 = vld [vmem:[%s6915_s14 + $0x90] sm:$0xff]  ;;  %v7025_v51 = vpack.c.bf16 %v457_v41, %v453_v40 }
  0xaf   : > { %4080 = vmatprep.subr.bf16.mxu0 %v6987_v26  ;;  %9157 = vst [vmem:[#allocation22_spill] sm:$0xff] %v7007_v39  ;;  %v466_v45 = vld [vmem:[%s6915_s14 + $0x128] sm:$0xff]  ;;  %v452_v48 = vld [vmem:[%s6915_s14 + $0xb8] sm:$0xff]  ;;  %v451_v50 = vld [vmem:[%s6915_s14 + $0xb0] sm:$0xff] }
  0xb0   : > { %9159 = vst [vmem:[#allocation24_spill] sm:$0xff] %v7017_v46  ;;  %9160 = vst [vmem:[#allocation25_spill] sm:$0xff] %v7025_v51  ;;  %v461_v52 = vld [vmem:[%s6915_s14 + $0x100] sm:$0xff]  ;;  %v7029_v54 = vpack.c.bf16 %v452_v48, %v448_v47  ;;  %v7032_v55 = vpack.c.bf16 %v466_v45, %v462_v44  ;;  %4142 = vmatpush1.bf16.msra.mxu1 %v7017_v46  ;;  %v470_v56 = vld [vmem:[%s6915_s14 + $0x148] sm:$0xff]  ;;  %v7036_v57 = vpack.c.bf16 %v451_v50, %v447_v49 }
  0xb1   : > { %v465_v53 = vld [vmem:[%s6915_s14 + $0x120] sm:$0xff]  ;;  %v456_v58 = vld [vmem:[%s6915_s14 + $0xd8] sm:$0xff]  ;;  %v474_v60 = vld [vmem:[%s6915_s14 + $0x168] sm:$0xff] }
  0xb2   : > { %4082 = vmatpush1.bf16.msra.mxu0 %v7000_v35  ;;  %9161 = vst [vmem:[#allocation26_spill] sm:$0xff] %v7029_v54  ;;  %9162 = vst [vmem:[#allocation27_spill] sm:$0xff] %v7032_v55  ;;  %v460_v59 = vld [vmem:[%s6915_s14 + $0xf8] sm:$0xff]  ;;  %4144 = vmatprep.subr.bf16.mxu1 %v7029_v54  ;;  %v455_v62 = vld [vmem:[%s6915_s14 + $0xd0] sm:$0xff]  ;;  %v7047_v0 = vpack.c.bf16 %v465_v53, %v461_v52  ;;  %v7052_v3 = vpack.c.bf16 %v474_v60, %v470_v56 }
  0xb3   : > { %4084 = vmatprep.subr.bf16.mxu0 %v7007_v39  ;;  %9163 = vst [vmem:[#allocation28_spill] sm:$0xff] %v7036_v57  ;;  %v7042_v61 = vpack.c.bf16 %v460_v59, %v456_v58  ;;  %v459_v63 = vld [vmem:[%s6915_s14 + $0xf0] sm:$0xff]  ;;  %v464_v1 = vld [vmem:[%s6915_s14 + $0x118] sm:$0xff]  ;;  %v469_v4 = vld [vmem:[%s6915_s14 + $0x140] sm:$0xff] }
  0xb4   : > { %9165 = vst [vmem:[#allocation30_spill] sm:$0xff] %v7047_v0  ;;  %v468_v2 = vld [vmem:[%s6915_s14 + $0x138] sm:$0xff]  ;;  %9166 = vst [vmem:[#allocation31_spill] sm:$0xff] %v7052_v3  ;;  %v473_v5 = vld [vmem:[%s6915_s14 + $0x160] sm:$0xff]  ;;  %4146 = vmatpush1.bf16.msra.mxu1 %v7036_v57  ;;  %v7058_v7 = vpack.c.bf16 %v459_v63, %v455_v62 }
  0xb5   : > { %9164 = vst [vmem:[#allocation29_spill] sm:$0xff] %v7042_v61  ;;  %v478_v6 = vld [vmem:[%s6915_s14 + $0x188] sm:$0xff]  ;;  %4148 = vmatprep.subr.bf16.mxu1 %v7042_v61  ;;  %v7062_v9 = vpack.c.bf16 %v468_v2, %v464_v1  ;;  %v463_v10 = vld [vmem:[%s6915_s14 + $0x110] sm:$0xff]  ;;  %v472_v13 = vld [vmem:[%s6915_s14 + $0x158] sm:$0xff]  ;;  %v7069_v15 = vpack.c.bf16 %v473_v5, %v469_v4 }
  0xb6   : > { %4086 = vmatpush1.bf16.msra.mxu0 %v7025_v51  ;;  %9167 = vst [vmem:[#allocation32_spill] sm:$0xff] %v7058_v7  ;;  %v482_v8 = vld [vmem:[%s6915_s14 + $0x1a8] sm:$0xff]  ;;  %v467_v11 = vld [vmem:[%s6915_s14 + $0x130] sm:$0xff]  ;;  %v476_v14 = vld [vmem:[%s6915_s14 + $0x178] sm:$0xff] }
  0xb7   : > { %4088 = vmatprep.subr.bf16.mxu0 %v7032_v55  ;;  %9168 = vst [vmem:[#allocation33_spill] sm:$0xff] %v7062_v9  ;;  %9169 = vst [vmem:[#allocation34_spill] sm:$0xff] %v7069_v15  ;;  %v7072_v19 = vpack.c.bf16 %v482_v8, %v478_v6  ;;  %v477_v20 = vld [vmem:[%s6915_s14 + $0x180] sm:$0xff]  ;;  %v486_v22 = vld [vmem:[%s6915_s14 + $0x1c8] sm:$0xff]  ;;  %v7078_v24 = vpack.c.bf16 %v467_v11, %v463_v10  ;;  %v7082_v27 = vpack.c.bf16 %v476_v14, %v472_v13 }
  0xb8   : > { %v481_v21 = vld [vmem:[%s6915_s14 + $0x1a0] sm:$0xff]  ;;  %4150 = vmatpush1.bf16.msra.mxu1 %v7058_v7  ;;  %v490_v25 = vld [vmem:[%s6915_s14 + $0x1e8] sm:$0xff]  ;;  %v471_v28 = vld [vmem:[%s6915_s14 + $0x150] sm:$0xff] }
  0xb9   : > { %9170 = vst [vmem:[#allocation35_spill] sm:$0xff] %v7072_v19  ;;  %9171 = vst [vmem:[#allocation36_spill] sm:$0xff] %v7078_v24  ;;  %4152 = vmatprep.subr.bf16.mxu1 %v7062_v9  ;;  %v475_v29 = vld [vmem:[%s6915_s14 + $0x170] sm:$0xff]  ;;  %v480_v30 = vld [vmem:[%s6915_s14 + $0x198] sm:$0xff]  ;;  %v7089_v33 = vpack.c.bf16 %v481_v21, %v477_v20  ;;  %v7092_v36 = vpack.c.bf16 %v490_v25, %v486_v22 }
  0xba   : > { %4090 = vmatpush1.bf16.msra.mxu0 %v7047_v0  ;;  %9172 = vst [vmem:[#allocation37_spill] sm:$0xff] %v7082_v27  ;;  %v484_v32 = vld [vmem:[%s6915_s14 + $0x1b8] sm:$0xff]  ;;  %v485_v37 = vld [vmem:[%s6915_s14 + $0x1c0] sm:$0xff]  ;;  %v494_v40 = vld [vmem:[%s6915_s14 + $0x208] sm:$0xff]  ;;  %v7098_v41 = vpack.c.bf16 %v475_v29, %v471_v28 }
  0xbb   : > { %4092 = vmatprep.subr.bf16.mxu0 %v7052_v3  ;;  %9173 = vst [vmem:[#allocation38_spill] sm:$0xff] %v7089_v33  ;;  %9174 = vst [vmem:[#allocation39_spill] sm:$0xff] %v7092_v36  ;;  %v489_v38 = vld [vmem:[%s6915_s14 + $0x1e0] sm:$0xff]  ;;  %v498_v43 = vld [vmem:[%s6915_s14 + $0x228] sm:$0xff]  ;;  %v7102_v44 = vpack.c.bf16 %v484_v32, %v480_v30 }
  0xbc   : > { %4154 = vmatpush1.bf16.msra.mxu1 %v7078_v24  ;;  %9175 = vst [vmem:[#allocation40_spill] sm:$0xff] %v7098_v41  ;;  %v479_v45 = vld [vmem:[%s6915_s14 + $0x190] sm:$0xff]  ;;  %v488_v48 = vld [vmem:[%s6915_s14 + $0x1d8] sm:$0xff]  ;;  %v7109_v50 = vpack.c.bf16 %v489_v38, %v485_v37  ;;  %v7112_v52 = vpack.c.bf16 %v498_v43, %v494_v40  ;;  %v493_v53 = vld [vmem:[%s6915_s14 + $0x200] sm:$0xff] }
  0xbd   : > { %4156 = vmatprep.subr.bf16.mxu1 %v7082_v27  ;;  %9176 = vst [vmem:[#allocation41_spill] sm:$0xff] %v7102_v44  ;;  %v483_v47 = vld [vmem:[%s6915_s14 + $0x1b0] sm:$0xff]  ;;  %v492_v49 = vld [vmem:[%s6915_s14 + $0x1f8] sm:$0xff]  ;;  %v497_v56 = vld [vmem:[%s6915_s14 + $0x220] sm:$0xff] }
  0xbe   : > { %4094 = vmatpush1.bf16.msra.mxu0 %v7069_v15  ;;  %9177 = vst [vmem:[#allocation42_spill] sm:$0xff] %v7109_v50  ;;  %9178 = vst [vmem:[#allocation43_spill] sm:$0xff] %v7112_v52  ;;  %v502_v58 = vld [vmem:[%s6915_s14 + $0x248] sm:$0xff]  ;;  %v7118_v59 = vpack.c.bf16 %v483_v47, %v479_v45  ;;  %v7122_v62 = vpack.c.bf16 %v492_v49, %v488_v48  ;;  %v487_v63 = vld [vmem:[%s6915_s14 + $0x1d0] sm:$0xff]  ;;  %v7129_v5 = vpack.c.bf16 %v497_v56, %v493_v53 }
  0xbf   : > { %4096 = vmatprep.subr.bf16.mxu0 %v7072_v19  ;;  %v506_v60 = vld [vmem:[%s6915_s14 + $0x268] sm:$0xff]  ;;  %v491_v1 = vld [vmem:[%s6915_s14 + $0x1f0] sm:$0xff]  ;;  %v496_v2 = vld [vmem:[%s6915_s14 + $0x218] sm:$0xff] }
  0xc0   : > { %4158 = vmatpush1.bf16.msra.mxu1 %v7098_v41  ;;  %9179 = vst [vmem:[#allocation44_spill] sm:$0xff] %v7118_v59  ;;  %9180 = vst [vmem:[#allocation45_spill] sm:$0xff] %v7122_v62  ;;  %v500_v4 = vld [vmem:[%s6915_s14 + $0x238] sm:$0xff]  ;;  %v7132_v6 = vpack.c.bf16 %v506_v60, %v502_v58  ;;  %v501_v8 = vld [vmem:[%s6915_s14 + $0x240] sm:$0xff]  ;;  %v7138_v13 = vpack.c.bf16 %v491_v1, %v487_v63 }
  0xc1   : > { %4160 = vmatprep.subr.bf16.mxu1 %v7102_v44  ;;  %9181 = vst [vmem:[#allocation46_spill] sm:$0xff] %v7129_v5  ;;  %v505_v10 = vld [vmem:[%s6915_s14 + $0x260] sm:$0xff]  ;;  %v510_v11 = vld [vmem:[%s6915_s14 + $0x288] sm:$0xff]  ;;  %v7142_v20 = vpack.c.bf16 %v500_v4, %v496_v2  ;;  %v495_v21 = vld [vmem:[%s6915_s14 + $0x210] sm:$0xff] }
  0xc2   : > { %4098 = vmatpush1.bf16.msra.mxu0 %v7089_v33  ;;  %9182 = vst [vmem:[#allocation47_spill] sm:$0xff] %v7132_v6  ;;  %9183 = vst [vmem:[#allocation48_spill] sm:$0xff] %v7138_v13  ;;  %v514_v14 = vld [vmem:[%s6915_s14 + $0x2a8] sm:$0xff]  ;;  %v499_v22 = vld [vmem:[%s6915_s14 + $0x230] sm:$0xff]  ;;  %v7149_v29 = vpack.c.bf16 %v505_v10, %v501_v8 }
  0xc3   : > { %4100 = vmatprep.subr.bf16.mxu0 %v7092_v36  ;;  %9184 = vst [vmem:[#allocation49_spill] sm:$0xff] %v7142_v20  ;;  %v504_v25 = vld [vmem:[%s6915_s14 + $0x258] sm:$0xff]  ;;  %v7152_v30 = vpack.c.bf16 %v514_v14, %v510_v11  ;;  %v509_v32 = vld [vmem:[%s6915_s14 + $0x280] sm:$0xff]  ;;  %v518_v38 = vld [vmem:[%s6915_s14 + $0x2c8] sm:$0xff]  ;;  %v7158_v40 = vpack.c.bf16 %v499_v22, %v495_v21 }
  0xc4   : > { %4162 = vmatpush1.bf16.msra.mxu1 %v7118_v59  ;;  %v508_v28 = vld [vmem:[%s6915_s14 + $0x278] sm:$0xff]  ;;  %9185 = vst [vmem:[#allocation50_spill] sm:$0xff] %v7149_v29  ;;  %v513_v37 = vld [vmem:[%s6915_s14 + $0x2a0] sm:$0xff]  ;;  %v522_v43 = vld [vmem:[%s6915_s14 + $0x2e8] sm:$0xff] }
  0xc5   : > { %4164 = vmatprep.subr.bf16.mxu1 %v7122_v62  ;;  %9186 = vst [vmem:[#allocation51_spill] sm:$0xff] %v7152_v30  ;;  %9187 = vst [vmem:[#allocation52_spill] sm:$0xff] %v7158_v40  ;;  %v7162_v45 = vpack.c.bf16 %v508_v28, %v504_v25  ;;  %v503_v47 = vld [vmem:[%s6915_s14 + $0x250] sm:$0xff]  ;;  %v512_v49 = vld [vmem:[%s6915_s14 + $0x298] sm:$0xff]  ;;  %v7169_v56 = vpack.c.bf16 %v513_v37, %v509_v32  ;;  %v7172_v58 = vpack.c.bf16 %v522_v43, %v518_v38 }
  0xc6   : > { %4102 = vmatpush1.bf16.msra.mxu0 %v7109_v50  ;;  %v507_v48 = vld [vmem:[%s6915_s14 + $0x270] sm:$0xff]  ;;  %v516_v53 = vld [vmem:[%s6915_s14 + $0x2b8] sm:$0xff]  ;;  %v517_v60 = vld [vmem:[%s6915_s14 + $0x2c0] sm:$0xff] }
  0xc7   : > { %4104 = vmatprep.subr.bf16.mxu0 %v7112_v52  ;;  %9188 = vst [vmem:[#allocation53_spill] sm:$0xff] %v7162_v45  ;;  %9189 = vst [vmem:[#allocation54_spill] sm:$0xff] %v7169_v56  ;;  %v521_v63 = vld [vmem:[%s6915_s14 + $0x2e0] sm:$0xff]  ;;  %v526_v1 = vld [vmem:[%s6915_s14 + $0x308] sm:$0xff]  ;;  %v7178_v2 = vpack.c.bf16 %v507_v48, %v503_v47  ;;  %v7182_v8 = vpack.c.bf16 %v516_v53, %v512_v49 }
  0xc8   : > { %4166 = vmatpush1.bf16.msra.mxu1 %v7138_v13  ;;  %9190 = vst [vmem:[#allocation55_spill] sm:$0xff] %v7172_v58  ;;  %v530_v4 = vld [vmem:[%s6915_s14 + $0x328] sm:$0xff]  ;;  %v511_v10 = vld [vmem:[%s6915_s14 + $0x290] sm:$0xff]  ;;  %v520_v14 = vld [vmem:[%s6915_s14 + $0x2d8] sm:$0xff]  ;;  %v7189_v22 = vpack.c.bf16 %v521_v63, %v517_v60 }
  0xc9   : > { %4168 = vmatprep.subr.bf16.mxu1 %v7142_v20  ;;  %9191 = vst [vmem:[#allocation56_spill] sm:$0xff] %v7178_v2  ;;  %9192 = vst [vmem:[#allocation57_spill] sm:$0xff] %v7182_v8  ;;  %v515_v11 = vld [vmem:[%s6915_s14 + $0x2b0] sm:$0xff]  ;;  %v524_v21 = vld [vmem:[%s6915_s14 + $0x2f8] sm:$0xff]  ;;  %v7192_v25 = vpack.c.bf16 %v530_v4, %v526_v1 }
  0xca   : > { %4106 = vmatpush1.bf16.msra.mxu0 %v7129_v5  ;;  %9193 = vst [vmem:[#allocation58_spill] sm:$0xff] %v7189_v22  ;;  %v525_v28 = vld [vmem:[%s6915_s14 + $0x300] sm:$0xff]  ;;  %v534_v37 = vld [vmem:[%s6915_s14 + $0x348] sm:$0xff]  ;;  %v7198_v38 = vpack.c.bf16 %v515_v11, %v511_v10  ;;  %v7202_v47 = vpack.c.bf16 %v524_v21, %v520_v14  ;;  %v519_v48 = vld [vmem:[%s6915_s14 + $0x2d0] sm:$0xff] }
  0xcb   : > { %4108 = vmatprep.subr.bf16.mxu0 %v7132_v6  ;;  %9194 = vst [vmem:[#allocation59_spill] sm:$0xff] %v7192_v25  ;;  %v529_v32 = vld [vmem:[%s6915_s14 + $0x320] sm:$0xff]  ;;  %v538_v43 = vld [vmem:[%s6915_s14 + $0x368] sm:$0xff]  ;;  %v523_v49 = vld [vmem:[%s6915_s14 + $0x2f0] sm:$0xff] }
  0xcc   : > { %4170 = vmatpush1.bf16.msra.mxu1 %v7158_v40  ;;  %9195 = vst [vmem:[#allocation60_spill] sm:$0xff] %v7198_v38  ;;  %9196 = vst [vmem:[#allocation61_spill] sm:$0xff] %v7202_v47  ;;  %v528_v53 = vld [vmem:[%s6915_s14 + $0x318] sm:$0xff]  ;;  %v7209_v63 = vpack.c.bf16 %v529_v32, %v525_v28  ;;  %v7212_v1 = vpack.c.bf16 %v538_v43, %v534_v37  ;;  %v533_v4 = vld [vmem:[%s6915_s14 + $0x340] sm:$0xff]  ;;  %v7218_v14 = vpack.c.bf16 %v523_v49, %v519_v48 }
  0xcd   : > { %4172 = vmatprep.subr.bf16.mxu1 %v7162_v45  ;;  %v532_v60 = vld [vmem:[%s6915_s14 + $0x338] sm:$0xff]  ;;  %v537_v10 = vld [vmem:[%s6915_s14 + $0x360] sm:$0xff]  ;;  %v542_v11 = vld [vmem:[%s6915_s14 + $0x388] sm:$0xff] }
  0xce   : > { %4110 = vmatpush1.bf16.msra.mxu0 %v7149_v29  ;;  %9197 = vst [vmem:[#allocation62_spill] sm:$0xff] %v7209_v63  ;;  %9198 = vst [vmem:[#allocation63_spill] sm:$0xff] %v7212_v1  ;;  %v546_v21 = vld [vmem:[%s6915_s14 + $0x3a8] sm:$0xff]  ;;  %v7222_v28 = vpack.c.bf16 %v532_v60, %v528_v53  ;;  %v527_v32 = vld [vmem:[%s6915_s14 + $0x310] sm:$0xff] }
  0xcf   : > { %4112 = vmatprep.subr.bf16.mxu0 %v7152_v30  ;;  %9199 = vst [vmem:[#allocation64_spill] sm:$0xff] %v7218_v14  ;;  %v531_v37 = vld [vmem:[%s6915_s14 + $0x330] sm:$0xff]  ;;  %v536_v43 = vld [vmem:[%s6915_s14 + $0x358] sm:$0xff]  ;;  %v7232_v48 = vpack.c.bf16 %v546_v21, %v542_v11  ;;  %v541_v49 = vld [vmem:[%s6915_s14 + $0x380] sm:$0xff] }
  0xd0   : > { %4174 = vmatpush1.bf16.msra.mxu1 %v7178_v2  ;;  %9200 = vst [vmem:[#allocation65_spill] sm:$0xff] %v7222_v28  ;;  %v540_v16 = vld [vmem:[%s6915_s14 + $0x378] sm:$0xff]  ;;  %v545_v53 = vld [vmem:[%s6915_s14 + $0x3a0] sm:$0xff]  ;;  %v550_v60 = vld [vmem:[%s6915_s14 + $0x3c8] sm:$0xff] }
  0xd1   : > { %4176 = vmatprep.subr.bf16.mxu1 %v7182_v8  ;;  %9202 = vst [vmem:[#allocation67_spill] sm:$0xff] %v7232_v48  ;;  %v544_v11 = vld [vmem:[%s6915_s14 + $0x398] sm:$0xff] }
  0xd2   : > { %4114 = vmatpush1.bf16.msra.mxu0 %v7169_v56  ;;  %v548_v21 = vld [vmem:[%s6915_s14 + $0x3b8] sm:$0xff] }
  0xd3   : > { %4116 = vmatprep.subr.bf16.mxu0 %v7172_v58 }
  0xd4   : > { %4178 = vmatpush1.bf16.msra.mxu1 %v7198_v38  ;;  %v554_v38 = vld [vmem:[%s6915_s14 + $0x3e8] sm:$0xff] }
  0xd5   : > { %4180 = vmatprep.subr.bf16.mxu1 %v7202_v47  ;;  %v7238_v47 = vpack.c.bf16 %v531_v37, %v527_v32  ;;  %v7252_v32 = vpack.c.bf16 %v554_v38, %v550_v60  ;;  %v549_v37 = vld [vmem:[%s6915_s14 + $0x3c0] sm:$0xff] }
  0xd6   : > { %4118 = vmatpush1.bf16.msra.mxu0 %v7189_v22 }
  0xd7   : > { %4120 = vmatprep.subr.bf16.mxu0 %v7192_v25  ;;  %v7229_v25 = vpack.c.bf16 %v537_v10, %v533_v4  ;;  %9203 = vst [vmem:[#allocation68_spill] sm:$0xff] %v7238_v47  ;;  %v535_v4 = vld [vmem:[%s6915_s14 + $0x350] sm:$0xff]  ;;  %9206 = vst [vmem:[#allocation71_spill] sm:$0xff] %v7252_v32 }
  0xd8   : > { %4182 = vmatpush1.bf16.msra.mxu1 %v7218_v14  ;;  %v539_v10 = vld [vmem:[%s6915_s14 + $0x370] sm:$0xff] }
  0xd9   : > { %9201 = vst [vmem:[#allocation66_spill] sm:$0xff] %v7229_v25  ;;  %4184 = vmatprep.subr.bf16.mxu1 %v7222_v28  ;;  %v553_v28 = vld [vmem:[%s6915_s14 + $0x3e0] sm:$0xff]  ;;  %v543_v14 = vld [vmem:[%s6915_s14 + $0x390] sm:$0xff] }
  0xda   : > { %4122 = vmatpush1.bf16.msra.mxu0 %v7209_v63  ;;  %v7242_v63 = vpack.c.bf16 %v540_v16, %v536_v43  ;;  %v7257_v16 = vpack.c.bf16 %v539_v10, %v535_v4  ;;  %v7260_v43 = vpack.c.bf16 %v548_v21, %v544_v11  ;;  %v7267_v38 = vpack.c.bf16 %v553_v28, %v549_v37  ;;  %v551_v10 = vld [vmem:[%s6915_s14 + $0x3d0] sm:$0xff]  ;;  %v689_v21 = vld [vmem:[#allocation2] sm:$0xff] }
  0xdb   : > { %4124 = vmatprep.subr.bf16.mxu0 %v7212_v1  ;;  %v7249_v1 = vpack.c.bf16 %v545_v53, %v541_v49  ;;  %v552_v49 = vld [vmem:[%s6915_s14 + $0x3d8] sm:$0xff]  ;;  %v555_v11 = vld [vmem:[%s6915_s14 + $0x3f0] sm:$0xff]  ;;  %v9215_v28 = vld [vmem:[#allocation61_spill] sm:$0xff] }
  0xdc   : > { %9204 = vst [vmem:[#allocation69_spill] sm:$0xff] %v7242_v63  ;;  %4186 = vmatpush1.bf16.msra.mxu1 %v7238_v47  ;;  %9207 = vst [vmem:[#allocation72_spill] sm:$0xff] %v7257_v16  ;;  %v556_v53 = vld [vmem:[%s6915_s14 + $0x3f8] sm:$0xff]  ;;  %v9216_v37 = vld [vmem:[#allocation62_spill] sm:$0xff] }
  0xdd   : > { %9205 = vst [vmem:[#allocation70_spill] sm:$0xff] %v7249_v1  ;;  %4188 = vmatprep.subr.bf16.mxu1 %v7242_v63  ;;  %9208 = vst [vmem:[#allocation73_spill] sm:$0xff] %v7260_v43  ;;  %v7274_v4 = vpack.c.bf16 %v556_v53, %v552_v49  ;;  %v9217_v49 = vld [vmem:[#allocation64_spill] sm:$0xff]  ;;  %v9218_v53 = vld [vmem:[#allocation63_spill] sm:$0xff] }
  0xde   : > { %4126 = vmatpush1.bf16.msra.mxu0 %v7229_v25  ;;  %v547_v25 = vld [vmem:[%s6915_s14 + $0x3b0] sm:$0xff]  ;;  %9209 = vst [vmem:[#allocation74_spill] sm:$0xff] %v7267_v38 }
  0xdf   : > { %4128 = vmatprep.subr.bf16.mxu0 %v7232_v48  ;;  %v7271_v60 = vpack.c.bf16 %v547_v25, %v543_v14  ;;  %9211 = vst [vmem:[#allocation76_spill] sm:$0xff] %v7274_v4  ;;  %v9213_v25 = vld [vmem:[#allocation60_spill] sm:$0xff]  ;;  %v9214_v14 = vld [vmem:[#allocation59_spill] sm:$0xff] }
  0xe0   : > { %4190 = vmatpush1.bf16.msra.mxu1 %v7257_v16 }
  0xe1   : > { %9210 = vst [vmem:[#allocation75_spill] sm:$0xff] %v7271_v60  ;;  %4192 = vmatprep.subr.bf16.mxu1 %v7260_v43 }
  0xe2   : > { %4130 = vmatpush1.bf16.msra.mxu0 %v7249_v1  ;;  %v7280_v1 = vpack.c.bf16 %v555_v11, %v551_v10  ;;  %v9219_v10 = vld [vmem:[#allocation65_spill] sm:$0xff]  ;;  %v9220_v11 = vld [vmem:[#allocation66_spill] sm:$0xff] }
  0xe3   : > { %4132 = vmatprep.subr.bf16.mxu0 %v7252_v32 }
  0xe4   : > { %4194 = vmatpush1.bf16.msra.mxu1 %v7271_v60  ;;  %9212 = vst [vmem:[#allocation77_spill] sm:$0xff] %v7280_v1 }
  0xe5   : > { %4196 = vmatprep.subr.bf16.mxu1 %v7274_v4 }
  0xe6   : > { %4134 = vmatpush1.bf16.msra.mxu0 %v7267_v38 }
  0xe7   : > { %4200 = vmatprep.subr.bf16.mxu0 %v6965_v12 }
  0xe8   : > { %4198 = vmatpush1.bf16.msra.mxu1 %v7280_v1 }
  0xe9   : > { %776 = vmatmul.mubr.f32.vlgmr.msra.gmra.mrb[0].mxu0 %v689_v21  ;;  %4264 = vmatprep.subr.bf16.mxu1 %v6993_v31 }
  0xea   : > { %4202 = vmatpush1.bf16.msra.mxu0 %v6972_v17 }
  0xeb   : > { %4204 = vmatprep.subr.bf16.mxu0 %v6974_v18  ;;  %847 = vmatmul.mubr.f32.vlgmr.msra.gmra.mrb[0].mxu1 %v689_v21  ;;  %v9221_v21 = vld [vmem:[#allocation70_spill] sm:$0xff] }
  0xec   : > { %4266 = vmatpush1.bf16.msra.mxu1 %v6997_v34 }
  0xed   : > { %4268 = vmatprep.subr.bf16.mxu1 %v7012_v42 }
  0xee   : > { %4206 = vmatpush1.bf16.msra.mxu0 %v6982_v23 }
  0xef   : > { %4208 = vmatprep.subr.bf16.mxu0 %v6987_v26 }
  0xf0   : > { %4270 = vmatpush1.bf16.msra.mxu1 %v7017_v46 }
  0xf1   : > { %4272 = vmatprep.subr.bf16.mxu1 %v7029_v54 }
  0xf2   : > { %4210 = vmatpush1.bf16.msra.mxu0 %v7000_v35 }
  0xf3   : > { %4212 = vmatprep.subr.bf16.mxu0 %v7007_v39 }
  0xf4   : > { %4274 = vmatpush1.bf16.msra.mxu1 %v7036_v57 }
  0xf5   : > { %4276 = vmatprep.subr.bf16.mxu1 %v7042_v61 }
  0xf6   : > { %4214 = vmatpush1.bf16.msra.mxu0 %v7025_v51 }
  0xf7   : > { %4216 = vmatprep.subr.bf16.mxu0 %v7032_v55 }
  0xf8   : > { %4278 = vmatpush1.bf16.msra.mxu1 %v7058_v7 }
  0xf9   : > { %4280 = vmatprep.subr.bf16.mxu1 %v7062_v9 }
  0xfa   : > { %4218 = vmatpush1.bf16.msra.mxu0 %v7047_v0 }
  0xfb   : > { %4220 = vmatprep.subr.bf16.mxu0 %v7052_v3 }
  0xfc   : > { %4282 = vmatpush1.bf16.msra.mxu1 %v7078_v24 }
  0xfd   : > { %4284 = vmatprep.subr.bf16.mxu1 %v7082_v27 }
  0xfe   : > { %4222 = vmatpush1.bf16.msra.mxu0 %v7069_v15 }
  0xff   : > { %4224 = vmatprep.subr.bf16.mxu0 %v7072_v19 }
 0x100   : > { %4286 = vmatpush1.bf16.msra.mxu1 %v7098_v41 }
 0x101   : > { %4288 = vmatprep.subr.bf16.mxu1 %v7102_v44 }
 0x102   : > { %4226 = vmatpush1.bf16.msra.mxu0 %v7089_v33 }
 0x103   : > { %4228 = vmatprep.subr.bf16.mxu0 %v7092_v36 }
 0x104   : > { %4290 = vmatpush1.bf16.msra.mxu1 %v7118_v59 }
 0x105   : > { %4292 = vmatprep.subr.bf16.mxu1 %v7122_v62 }
 0x106   : > { %4230 = vmatpush1.bf16.msra.mxu0 %v7109_v50 }
 0x107   : > { %4232 = vmatprep.subr.bf16.mxu0 %v7112_v52 }
 0x108   : > { %4294 = vmatpush1.bf16.msra.mxu1 %v7138_v13 }
 0x109   : > { %4296 = vmatprep.subr.bf16.mxu1 %v7142_v20 }
 0x10a   : > { %4234 = vmatpush1.bf16.msra.mxu0 %v7129_v5 }
 0x10b   : > { %4236 = vmatprep.subr.bf16.mxu0 %v7132_v6 }
 0x10c   : > { %4298 = vmatpush1.bf16.msra.mxu1 %v7158_v40 }
 0x10d   : > { %4300 = vmatprep.subr.bf16.mxu1 %v7162_v45 }
 0x10e   : > { %4238 = vmatpush1.bf16.msra.mxu0 %v7149_v29 }
 0x10f   : > { %4240 = vmatprep.subr.bf16.mxu0 %v7152_v30 }
 0x110   : > { %4302 = vmatpush1.bf16.msra.mxu1 %v7178_v2 }
 0x111   : > { %4304 = vmatprep.subr.bf16.mxu1 %v7182_v8 }
 0x112   : > { %4242 = vmatpush1.bf16.msra.mxu0 %v7169_v56 }
 0x113   : > { %4244 = vmatprep.subr.bf16.mxu0 %v7172_v58  ;;  %v3800_v58 = vld [vmem:[%s6915_s14 + $0x470] sm:$0xff] }
 0x114   : > { %4306 = vmatpush1.bf16.msra.mxu1 %v9213_v25  ;;  %v3803_v25 = vld [vmem:[%s6915_s14 + $0x488] sm:$0xff] }
 0x115   : > { %4308 = vmatprep.subr.bf16.mxu1 %v9215_v28  ;;  %v3796_v28 = vld [vmem:[%s6915_s14 + $0x450] sm:$0xff] }
 0x116   : > { %4246 = vmatpush1.bf16.msra.mxu0 %v7189_v22 }
 0x117   : > { %4248 = vmatprep.subr.bf16.mxu0 %v9214_v14 }
 0x118   : > { %4310 = vmatpush1.bf16.msra.mxu1 %v9217_v49 }
 0x119   : > { %4312 = vmatprep.subr.bf16.mxu1 %v9219_v10 }
 0x11a   : > { %4250 = vmatpush1.bf16.msra.mxu0 %v9216_v37 }
 0x11b   : > { %4252 = vmatprep.subr.bf16.mxu0 %v9218_v53 }
 0x11c   : > { %4314 = vmatpush1.bf16.msra.mxu1 %v7238_v47 }
 0x11d   : > { %4316 = vmatprep.subr.bf16.mxu1 %v7242_v63  ;;  %v3789_v63 = vld [vmem:[%s6915_s14 + $0x418] sm:$0xff] }
 0x11e   : > { %4254 = vmatpush1.bf16.msra.mxu0 %v9220_v11  ;;  %v3791_v11 = vld [vmem:[%s6915_s14 + $0x428] sm:$0xff] }
 0x11f   : > { %4256 = vmatprep.subr.bf16.mxu0 %v7232_v48  ;;  %v3787_v48 = vld [vmem:[%s6915_s14 + $0x408] sm:$0xff] }
 0x120   : > { %4318 = vmatpush1.bf16.msra.mxu1 %v7257_v16  ;;  %v7351_v53 = vpack.c.bf16 %v3791_v11, %v3787_v48 }
 0x121   : > { %4320 = vmatprep.subr.bf16.mxu1 %v7260_v43 }
 0x122   : > { %4258 = vmatpush1.bf16.msra.mxu0 %v9221_v21  ;;  %9222 = vst [vmem:[#allocation78_spill] sm:$0xff] %v7351_v53  ;;  %v3793_v21 = vld [vmem:[%s6915_s14 + $0x438] sm:$0xff] }
 0x123   : > { %4260 = vmatprep.subr.bf16.mxu0 %v7252_v32  ;;  %v7354_v16 = vpack.c.bf16 %v3793_v21, %v3789_v63  ;;  %v691_v32 = vlaneseq }
 0x124   : > { %4322 = vmatpush1.bf16.msra.mxu1 %v7271_v60 }
 0x125   : > { %4324 = vmatprep.subr.bf16.mxu1 %v7274_v4  ;;  %9223 = vst [vmem:[#allocation79_spill] sm:$0xff] %v7354_v16  ;;  %v686_v4 = vld [vmem:[%s6922_s4] sm:$0xf] }
 0x126   : > { %4262 = vmatpush1.bf16.msra.mxu0 %v7267_v38  ;;  %v7358_v38 = vshrl.u32 %v691_v32, 7 }
 0x127   : > { %4328 = vmatprep.subr.bf16.mxu0 %v7351_v53 }
 0x128   : > { %4326 = vmatpush1.bf16.msra.mxu1 %v7280_v1  ;;  %9224 = vst [vmem:[#allocation80_spill] sm:$0xff] %v7358_v38  ;;  %v8883_v60 = vsub.s32 0, %v7358_v38  ;;  %v8884_v1 = vsub.s32 1, %v7358_v38  ;;  %v8887_v48 = vsub.s32 2, %v7358_v38 }
 0x129   : > { %4392 = vmatprep.subr.bf16.mxu1 %v7354_v16 }
 0x12a   : > { %v7365_v43 = vrot.slane %v686_v4, %v8883_v60  ;;  %v7369_v63 = vrot.slane %v686_v4, %v8884_v1  ;;  %v7376_v47 = vrot.slane %v686_v4, %v8887_v48  ;;  %v8888_v60 = vsub.s32 3, %v7358_v38  ;;  %v3792_v38 = vld [vmem:[%s6915_s14 + $0x430] sm:$0xff] }
 0x12c   : > { %9225 = vst [vmem:[#allocation81_spill] sm:$0xff] %v7365_v43  ;;  %9226 = vst [vmem:[#allocation82_spill] sm:$0xff] %v7369_v63 }
 0x12d   : > { %9227 = vst [vmem:[#allocation83_spill] sm:$0xff] %v7376_v47 }
 0x1bc   : > { %v777_v11 = vpop.f32.mrb[0].mxu0 }
 0x1bd   : > { %v778_v21 = vadd.f32 %v777_v11, %v7365_v43  ;;  %v779_v32 = vpop.f32.mrb[1].mxu0  ;;  %v7382_v11 = vrot.slane %v686_v4, %v8888_v60 }
 0x1be   : > { %v780_v16 = vadd.f32 %v779_v32, %v7369_v63  ;;  %v848_v10 = vpop.f32.mrb[0].mxu1  ;;  %v3798_v63 = vld [vmem:[%s6915_s14 + $0x460] sm:$0xff] }
 0x1bf   : > { %v3915_v53 = vmul.f32 -1.442695, %v778_v21  ;;  %v850_v1 = vpop.f32.mrb[1].mxu1  ;;  %v849_v14 = vadd.f32 %v848_v10, %v7376_v47  ;;  %9228 = vst [vmem:[#allocation84_spill] sm:$0xff] %v7382_v11  ;;  %v3797_v47 = vld [vmem:[%s6915_s14 + $0x458] sm:$0xff] }
 0x1c0   : > { %v3916_v37 = vmul.f32 -1.442695, %v780_v16  ;;  %v851_v21 = vadd.f32 %v850_v1, %v7382_v11  ;;  %v3795_v11 = vld [vmem:[%s6915_s14 + $0x448] sm:$0xff] }
 0x1c1   : > { %6234 = vpow2.f32 %v3915_v53  ;;  %v3917_v43 = vmul.f32 -1.442695, %v849_v14 }
 0x1c2   : > { %6236 = vpow2.f32 %v3916_v37 }
 0x1c3   : > { %6238 = vpow2.f32 %v3917_v43 }
 0x1c4   : > { %6240 = vtanh.f32 %v851_v21  ;;  %v3790_v21 = vld [vmem:[%s6915_s14 + $0x420] sm:$0xff] }
 0x1cb   : > { %v6235_v32 = vpop.eup %6234 }
 0x1cc   : > { %v6237_v48 = vpop.eup %6236  ;;  %v862_v16 = vadd.f32 1.0, %v6235_v32 }
 0x1cd   : > { %v863_v53 = vadd.f32 1.0, %v6237_v48  ;;  %v6239_v37 = vpop.eup %6238  ;;  %v3786_v48 = vld [vmem:[%s6915_s14 + $0x400] sm:$0xff] }
 0x1ce   : > { %6242 = vrcp.f32 %v862_v16  ;;  %v6241_v4 = vpop.eup %6240  ;;  %v864_v1 = vadd.f32 1.0, %v6239_v37  ;;  %v3799_v37 = vld [vmem:[%s6915_s14 + $0x468] sm:$0xff] }
 0x1cf   : > { %6244 = vrcp.f32 %v863_v53  ;;  %v3788_v53 = vld [vmem:[%s6915_s14 + $0x410] sm:$0xff]  ;;  %v7404_v49 = vpack.c.bf16 %v3799_v37, %v3795_v11  ;;  %v7420_v11 = vpack.c.bf16 %v3800_v58, %v3796_v28  ;;  %v3813_v58 = vld [vmem:[%s6915_s14 + $0x4d8] sm:$0xff] }
 0x1d0   : > { %6246 = vrcp.f32 %v864_v1  ;;  %v878_v1 = vld [vmem:[#allocation2 + $0x8] sm:$0xff]  ;;  %v3817_v28 = vld [vmem:[%s6915_s14 + $0x4f8] sm:$0xff] }
 0x1d1   : > { %9232 = vst [vmem:[#allocation88_spill] sm:$0xff] %v7404_v49  ;;  %9235 = vst [vmem:[#allocation91_spill] sm:$0xff] %v7420_v11 }
 0x1d8   : > { %v6243_v14 = vpop.eup %6242 }
 0x1d9   : > { %v6245_v10 = vpop.eup %6244  ;;  %v873_v43 = vmul.f32 %v6243_v14, %v6241_v4  ;;  %v3801_v4 = vld [vmem:[%s6915_s14 + $0x478] sm:$0xff] }
 0x1da   : > { %v872_v60 = vmul.f32 0.0, %v6245_v10  ;;  %v6247_v16 = vpop.eup %6246  ;;  %v7398_v10 = vpack.c.bf16 %v3790_v21, %v3786_v48  ;;  %v7406_v22 = vpack.c.bf16 %v3801_v4, %v3797_v47  ;;  %v3807_v48 = vld [vmem:[%s6915_s14 + $0x4a8] sm:$0xff]  ;;  %v3809_v21 = vld [vmem:[%s6915_s14 + $0x4b8] sm:$0xff] }
 0x1db   : > { %v7426_v37 = vpack.c.bf16 %v3807_v48, %v3803_v25 }
 0x1dc   : > { %v7385_v32 = vadd.f32 %v873_v43, %v872_v60  ;;  %9230 = vst [vmem:[#allocation86_spill] sm:$0xff] %v7398_v10  ;;  %v7400_v43 = vpack.c.bf16 %v3792_v38, %v3788_v53  ;;  %9233 = vst [vmem:[#allocation89_spill] sm:$0xff] %v7406_v22  ;;  %v3805_v38 = vld [vmem:[%s6915_s14 + $0x498] sm:$0xff]  ;;  %v3806_v53 = vld [vmem:[%s6915_s14 + $0x4a0] sm:$0xff] }
 0x1dd   : > { %9236 = vst [vmem:[#allocation92_spill] sm:$0xff] %v7426_v37  ;;  %v7428_v4 = vpack.c.bf16 %v3809_v21, %v3805_v38  ;;  %v3810_v38 = vld [vmem:[%s6915_s14 + $0x4c0] sm:$0xff] }
 0x1de   : > { %9229 = vst [vmem:[#allocation85_spill] sm:$0xff] %v7385_v32  ;;  %6248 = vtanh.f32 %v7385_v32  ;;  %9231 = vst [vmem:[#allocation87_spill] sm:$0xff] %v7400_v43  ;;  %v3794_v32 = vld [vmem:[%s6915_s14 + $0x440] sm:$0xff] }
 0x1df   : > { %v7418_v47 = vpack.c.bf16 %v3798_v63, %v3794_v32  ;;  %9237 = vst [vmem:[#allocation93_spill] sm:$0xff] %v7428_v4  ;;  %v3815_v63 = vld [vmem:[%s6915_s14 + $0x4e8] sm:$0xff]  ;;  %v9238_v32 = vmov 0.0   ;;  %v3814_v21 = vld [vmem:[%s6915_s14 + $0x4e0] sm:$0xff] }
 0x1e1   : > { %9234 = vst [vmem:[#allocation90_spill] sm:$0xff] %v7418_v47 }
 0x1e8   : > { %v6249_v60 = vpop.eup %6248 }
 0x1e9   : > { %v7396_v14 = vmul.f32 %v6249_v60, %v6247_v16  ;;  %v3802_v16 = vld [vmem:[%s6915_s14 + $0x480] sm:$0xff]  ;;  %v3804_v60 = vld [vmem:[%s6915_s14 + $0x490] sm:$0xff] }
 0x1ea   : > { %v7440_v25 = vpack.c.bf16 %v3806_v53, %v3802_v16  ;;  %v3819_v16 = vld [vmem:[%s6915_s14 + $0x508] sm:$0xff] }
 0x1eb   : > { %943 = vmatprep.mubr.f32.mxu0 %v7396_v14  ;;  %1014 = vmatprep.mubr.f32.mxu1 %v7396_v14  ;;  %v3823_v53 = vld [vmem:[%s6915_s14 + $0x528] sm:$0xff] }
 0x1ec   : > { %944 = vmatmul.mubr.f32.vlgmr.msra.gmra.mrb[2].mxu0 %v878_v1  ;;  %1015 = vmatmul.mubr.f32.vlgmr.msra.gmra.mrb[2].mxu1 %v878_v1  ;;  %v3808_v1 = vld [vmem:[%s6915_s14 + $0x4b0] sm:$0xff]  ;;  %9239 = vst [vmem:[#allocation94_spill] sm:$0xff] %v7440_v25 }
 0x1ed   : > { %4330 = vmatpush1.bf16.msra.mxu0 %v7398_v10  ;;  %4394 = vmatpush1.bf16.msra.mxu1 %v7400_v43  ;;  %v3811_v10 = vld [vmem:[%s6915_s14 + $0x4c8] sm:$0xff]  ;;  %v7442_v48 = vpack.c.bf16 %v3808_v1, %v3804_v60  ;;  %v3821_v60 = vld [vmem:[%s6915_s14 + $0x518] sm:$0xff]  ;;  %v3912_v43 = vld [vmem:[%s6915_s14 + $0x7f0] sm:$0xff] }
 0x1ee   : > { %4332 = vmatprep.subr.bf16.mxu0 %v7404_v49  ;;  %4396 = vmatprep.subr.bf16.mxu1 %v7406_v22  ;;  %v7448_v22 = vpack.c.bf16 %v3815_v63, %v3811_v10  ;;  %v3812_v49 = vld [vmem:[%s6915_s14 + $0x4d0] sm:$0xff]  ;;  %v3825_v1 = vld [vmem:[%s6915_s14 + $0x538] sm:$0xff]  ;;  %v7460_v10 = vpack.c.bf16 %v3814_v21, %v3810_v38  ;;  %v3827_v38 = vld [vmem:[%s6915_s14 + $0x548] sm:$0xff] }
 0x1ef   : > { %1130 = vmatprep.mubr.f32.mxu0 %v9238_v32  ;;  %1201 = vmatprep.mubr.f32.mxu1 %v9238_v32  ;;  %9240 = vst [vmem:[#allocation95_spill] sm:$0xff] %v7442_v48  ;;  %v7450_v32 = vpack.c.bf16 %v3817_v28, %v3813_v58  ;;  %v3818_v58 = vld [vmem:[%s6915_s14 + $0x500] sm:$0xff]  ;;  %v3833_v21 = vld [vmem:[%s6915_s14 + $0x578] sm:$0xff] }
 0x1f0   : > { %9241 = vst [vmem:[#allocation96_spill] sm:$0xff] %v7448_v22  ;;  %9243 = vst [vmem:[#allocation98_spill] sm:$0xff] %v7460_v10  ;;  %v3822_v28 = vld [vmem:[%s6915_s14 + $0x520] sm:$0xff] }
 0x1f1   : > { %4334 = vmatpush1.bf16.msra.mxu0 %v7418_v47  ;;  %4398 = vmatpush1.bf16.msra.mxu1 %v7420_v11  ;;  %9242 = vst [vmem:[#allocation97_spill] sm:$0xff] %v7450_v32  ;;  %v3816_v47 = vld [vmem:[%s6915_s14 + $0x4f0] sm:$0xff] }
 0x1f2   : > { %4336 = vmatprep.subr.bf16.mxu0 %v7426_v37  ;;  %4400 = vmatprep.subr.bf16.mxu1 %v7428_v4  ;;  %v7462_v63 = vpack.c.bf16 %v3816_v47, %v3812_v49  ;;  %v7468_v4 = vpack.c.bf16 %v3823_v53, %v3819_v16  ;;  %v7470_v37 = vpack.c.bf16 %v3825_v1, %v3821_v60  ;;  %v3820_v11 = vld [vmem:[%s6915_s14 + $0x510] sm:$0xff]  ;;  %v3831_v49 = vld [vmem:[%s6915_s14 + $0x568] sm:$0xff]  ;;  %v3829_v47 = vld [vmem:[%s6915_s14 + $0x558] sm:$0xff] }
 0x1f3   : > { %v7480_v16 = vpack.c.bf16 %v3822_v28, %v3818_v58  ;;  %v3826_v60 = vld [vmem:[%s6915_s14 + $0x540] sm:$0xff]  ;;  %v3835_v58 = vld [vmem:[%s6915_s14 + $0x588] sm:$0xff]  ;;  %v3841_v28 = vld [vmem:[%s6915_s14 + $0x5b8] sm:$0xff] }
 0x1f4   : > { %9244 = vst [vmem:[#allocation99_spill] sm:$0xff] %v7462_v63  ;;  %9245 = vst [vmem:[#allocation100_spill] sm:$0xff] %v7468_v4  ;;  %v3830_v1 = vld [vmem:[%s6915_s14 + $0x560] sm:$0xff] }
 0x1f5   : > { %4338 = vmatpush1.bf16.msra.mxu0 %v7440_v25  ;;  %4402 = vmatpush1.bf16.msra.mxu1 %v7442_v48  ;;  %9246 = vst [vmem:[#allocation101_spill] sm:$0xff] %v7470_v37  ;;  %v3824_v25 = vld [vmem:[%s6915_s14 + $0x530] sm:$0xff]  ;;  %9247 = vst [vmem:[#allocation102_spill] sm:$0xff] %v7480_v16 }
 0x1f6   : > { %4340 = vmatprep.subr.bf16.mxu0 %v7448_v22  ;;  %4404 = vmatprep.subr.bf16.mxu1 %v7450_v32  ;;  %v7482_v53 = vpack.c.bf16 %v3824_v25, %v3820_v11  ;;  %v7488_v32 = vpack.c.bf16 %v3831_v49, %v3827_v38  ;;  %v7490_v22 = vpack.c.bf16 %v3833_v21, %v3829_v47  ;;  %v3828_v48 = vld [vmem:[%s6915_s14 + $0x550] sm:$0xff]  ;;  %v3839_v11 = vld [vmem:[%s6915_s14 + $0x5a8] sm:$0xff]  ;;  %v3837_v25 = vld [vmem:[%s6915_s14 + $0x598] sm:$0xff] }
 0x1f7   : > { %v7500_v38 = vpack.c.bf16 %v3830_v1, %v3826_v60  ;;  %v3834_v47 = vld [vmem:[%s6915_s14 + $0x580] sm:$0xff]  ;;  %v3843_v60 = vld [vmem:[%s6915_s14 + $0x5c8] sm:$0xff]  ;;  %v3849_v1 = vld [vmem:[%s6915_s14 + $0x5f8] sm:$0xff] }
 0x1f8   : > { %9248 = vst [vmem:[#allocation103_spill] sm:$0xff] %v7482_v53  ;;  %9249 = vst [vmem:[#allocation104_spill] sm:$0xff] %v7488_v32  ;;  %v3838_v21 = vld [vmem:[%s6915_s14 + $0x5a0] sm:$0xff] }
 0x1f9   : > { %4342 = vmatpush1.bf16.msra.mxu0 %v7460_v10  ;;  %4406 = vmatpush1.bf16.msra.mxu1 %v7462_v63  ;;  %9250 = vst [vmem:[#allocation105_spill] sm:$0xff] %v7490_v22  ;;  %v3832_v10 = vld [vmem:[%s6915_s14 + $0x570] sm:$0xff]  ;;  %9251 = vst [vmem:[#allocation106_spill] sm:$0xff] %v7500_v38 }
 0x1fa   : > { %4344 = vmatprep.subr.bf16.mxu0 %v7468_v4  ;;  %4408 = vmatprep.subr.bf16.mxu1 %v7470_v37  ;;  %v7502_v49 = vpack.c.bf16 %v3832_v10, %v3828_v48  ;;  %v7508_v37 = vpack.c.bf16 %v3839_v11, %v3835_v58  ;;  %v7510_v4 = vpack.c.bf16 %v3841_v28, %v3837_v25  ;;  %v3836_v63 = vld [vmem:[%s6915_s14 + $0x590] sm:$0xff]  ;;  %v3847_v48 = vld [vmem:[%s6915_s14 + $0x5e8] sm:$0xff]  ;;  %v3845_v10 = vld [vmem:[%s6915_s14 + $0x5d8] sm:$0xff] }
 0x1fb   : > { %v7520_v58 = vpack.c.bf16 %v3838_v21, %v3834_v47  ;;  %v3842_v25 = vld [vmem:[%s6915_s14 + $0x5c0] sm:$0xff]  ;;  %v3851_v47 = vld [vmem:[%s6915_s14 + $0x608] sm:$0xff]  ;;  %v3857_v21 = vld [vmem:[%s6915_s14 + $0x638] sm:$0xff] }
 0x1fc   : > { %9252 = vst [vmem:[#allocation107_spill] sm:$0xff] %v7502_v49  ;;  %9253 = vst [vmem:[#allocation108_spill] sm:$0xff] %v7508_v37  ;;  %v3846_v28 = vld [vmem:[%s6915_s14 + $0x5e0] sm:$0xff] }
 0x1fd   : > { %4346 = vmatpush1.bf16.msra.mxu0 %v7480_v16  ;;  %4410 = vmatpush1.bf16.msra.mxu1 %v7482_v53  ;;  %9254 = vst [vmem:[#allocation109_spill] sm:$0xff] %v7510_v4  ;;  %v3840_v16 = vld [vmem:[%s6915_s14 + $0x5b0] sm:$0xff]  ;;  %9255 = vst [vmem:[#allocation110_spill] sm:$0xff] %v7520_v58 }
 0x1fe   : > { %4348 = vmatprep.subr.bf16.mxu0 %v7488_v32  ;;  %4412 = vmatprep.subr.bf16.mxu1 %v7490_v22  ;;  %v7522_v11 = vpack.c.bf16 %v3840_v16, %v3836_v63  ;;  %v7528_v22 = vpack.c.bf16 %v3847_v48, %v3843_v60  ;;  %v7530_v32 = vpack.c.bf16 %v3849_v1, %v3845_v10  ;;  %v3844_v53 = vld [vmem:[%s6915_s14 + $0x5d0] sm:$0xff]  ;;  %v3855_v63 = vld [vmem:[%s6915_s14 + $0x628] sm:$0xff]  ;;  %v3853_v16 = vld [vmem:[%s6915_s14 + $0x618] sm:$0xff] }
 0x1ff   : > { %v7540_v60 = vpack.c.bf16 %v3846_v28, %v3842_v25  ;;  %v3850_v10 = vld [vmem:[%s6915_s14 + $0x600] sm:$0xff]  ;;  %v3859_v25 = vld [vmem:[%s6915_s14 + $0x648] sm:$0xff]  ;;  %v3865_v28 = vld [vmem:[%s6915_s14 + $0x678] sm:$0xff] }
 0x200   : > { %9256 = vst [vmem:[#allocation111_spill] sm:$0xff] %v7522_v11  ;;  %9257 = vst [vmem:[#allocation112_spill] sm:$0xff] %v7528_v22  ;;  %v3854_v1 = vld [vmem:[%s6915_s14 + $0x620] sm:$0xff] }
 0x201   : > { %4350 = vmatpush1.bf16.msra.mxu0 %v7500_v38  ;;  %4414 = vmatpush1.bf16.msra.mxu1 %v7502_v49  ;;  %9258 = vst [vmem:[#allocation113_spill] sm:$0xff] %v7530_v32  ;;  %v3848_v38 = vld [vmem:[%s6915_s14 + $0x5f0] sm:$0xff]  ;;  %9259 = vst [vmem:[#allocation114_spill] sm:$0xff] %v7540_v60 }
 0x202   : > { %4352 = vmatprep.subr.bf16.mxu0 %v7508_v37  ;;  %4416 = vmatprep.subr.bf16.mxu1 %v7510_v4  ;;  %v7542_v48 = vpack.c.bf16 %v3848_v38, %v3844_v53  ;;  %v7548_v4 = vpack.c.bf16 %v3855_v63, %v3851_v47  ;;  %v7550_v37 = vpack.c.bf16 %v3857_v21, %v3853_v16  ;;  %v3852_v49 = vld [vmem:[%s6915_s14 + $0x610] sm:$0xff]  ;;  %v3863_v53 = vld [vmem:[%s6915_s14 + $0x668] sm:$0xff]  ;;  %v3861_v38 = vld [vmem:[%s6915_s14 + $0x658] sm:$0xff] }
 0x203   : > { %v7560_v47 = vpack.c.bf16 %v3854_v1, %v3850_v10  ;;  %v3858_v16 = vld [vmem:[%s6915_s14 + $0x640] sm:$0xff]  ;;  %v3867_v10 = vld [vmem:[%s6915_s14 + $0x688] sm:$0xff]  ;;  %v3873_v1 = vld [vmem:[%s6915_s14 + $0x6b8] sm:$0xff] }
 0x204   : > { %9260 = vst [vmem:[#allocation115_spill] sm:$0xff] %v7542_v48  ;;  %9261 = vst [vmem:[#allocation116_spill] sm:$0xff] %v7548_v4  ;;  %v3862_v21 = vld [vmem:[%s6915_s14 + $0x660] sm:$0xff] }
 0x205   : > { %4354 = vmatpush1.bf16.msra.mxu0 %v7520_v58  ;;  %4418 = vmatpush1.bf16.msra.mxu1 %v7522_v11  ;;  %9262 = vst [vmem:[#allocation117_spill] sm:$0xff] %v7550_v37  ;;  %v3856_v58 = vld [vmem:[%s6915_s14 + $0x630] sm:$0xff]  ;;  %9263 = vst [vmem:[#allocation118_spill] sm:$0xff] %v7560_v47 }
 0x206   : > { %4356 = vmatprep.subr.bf16.mxu0 %v7528_v22  ;;  %4420 = vmatprep.subr.bf16.mxu1 %v7530_v32  ;;  %v7562_v63 = vpack.c.bf16 %v3856_v58, %v3852_v49  ;;  %v7568_v32 = vpack.c.bf16 %v3863_v53, %v3859_v25  ;;  %v7570_v22 = vpack.c.bf16 %v3865_v28, %v3861_v38  ;;  %v3860_v11 = vld [vmem:[%s6915_s14 + $0x650] sm:$0xff]  ;;  %v3871_v49 = vld [vmem:[%s6915_s14 + $0x6a8] sm:$0xff]  ;;  %v3869_v58 = vld [vmem:[%s6915_s14 + $0x698] sm:$0xff] }
 0x207   : > { %v7580_v25 = vpack.c.bf16 %v3862_v21, %v3858_v16  ;;  %v3866_v38 = vld [vmem:[%s6915_s14 + $0x680] sm:$0xff]  ;;  %v3875_v16 = vld [vmem:[%s6915_s14 + $0x6c8] sm:$0xff]  ;;  %v3881_v21 = vld [vmem:[%s6915_s14 + $0x6f8] sm:$0xff] }
 0x208   : > { %9264 = vst [vmem:[#allocation119_spill] sm:$0xff] %v7562_v63  ;;  %9265 = vst [vmem:[#allocation120_spill] sm:$0xff] %v7568_v32  ;;  %v3870_v28 = vld [vmem:[%s6915_s14 + $0x6a0] sm:$0xff] }
 0x209   : > { %4358 = vmatpush1.bf16.msra.mxu0 %v7540_v60  ;;  %4422 = vmatpush1.bf16.msra.mxu1 %v7542_v48  ;;  %9266 = vst [vmem:[#allocation121_spill] sm:$0xff] %v7570_v22  ;;  %v3864_v60 = vld [vmem:[%s6915_s14 + $0x670] sm:$0xff]  ;;  %9267 = vst [vmem:[#allocation122_spill] sm:$0xff] %v7580_v25 }
 0x20a   : > { %4360 = vmatprep.subr.bf16.mxu0 %v7548_v4  ;;  %4424 = vmatprep.subr.bf16.mxu1 %v7550_v37  ;;  %v7582_v53 = vpack.c.bf16 %v3864_v60, %v3860_v11  ;;  %v7588_v37 = vpack.c.bf16 %v3871_v49, %v3867_v10  ;;  %v7590_v4 = vpack.c.bf16 %v3873_v1, %v3869_v58  ;;  %v3868_v48 = vld [vmem:[%s6915_s14 + $0x690] sm:$0xff]  ;;  %v3879_v11 = vld [vmem:[%s6915_s14 + $0x6e8] sm:$0xff]  ;;  %v3877_v60 = vld [vmem:[%s6915_s14 + $0x6d8] sm:$0xff] }
 0x20b   : > { %v7600_v10 = vpack.c.bf16 %v3870_v28, %v3866_v38  ;;  %v3874_v58 = vld [vmem:[%s6915_s14 + $0x6c0] sm:$0xff]  ;;  %v3883_v38 = vld [vmem:[%s6915_s14 + $0x708] sm:$0xff]  ;;  %v3889_v28 = vld [vmem:[%s6915_s14 + $0x738] sm:$0xff] }
 0x20c   : > { %9268 = vst [vmem:[#allocation123_spill] sm:$0xff] %v7582_v53  ;;  %9269 = vst [vmem:[#allocation124_spill] sm:$0xff] %v7588_v37  ;;  %v3878_v1 = vld [vmem:[%s6915_s14 + $0x6e0] sm:$0xff] }
 0x20d   : > { %4362 = vmatpush1.bf16.msra.mxu0 %v7560_v47  ;;  %4426 = vmatpush1.bf16.msra.mxu1 %v7562_v63  ;;  %9270 = vst [vmem:[#allocation125_spill] sm:$0xff] %v7590_v4  ;;  %v3872_v47 = vld [vmem:[%s6915_s14 + $0x6b0] sm:$0xff]  ;;  %9271 = vst [vmem:[#allocation126_spill] sm:$0xff] %v7600_v10 }
 0x20e   : > { %4364 = vmatprep.subr.bf16.mxu0 %v7568_v32  ;;  %4428 = vmatprep.subr.bf16.mxu1 %v7570_v22  ;;  %v7602_v49 = vpack.c.bf16 %v3872_v47, %v3868_v48  ;;  %v7608_v22 = vpack.c.bf16 %v3879_v11, %v3875_v16  ;;  %v7610_v32 = vpack.c.bf16 %v3881_v21, %v3877_v60  ;;  %v3876_v63 = vld [vmem:[%s6915_s14 + $0x6d0] sm:$0xff]  ;;  %v3887_v48 = vld [vmem:[%s6915_s14 + $0x728] sm:$0xff]  ;;  %v3885_v47 = vld [vmem:[%s6915_s14 + $0x718] sm:$0xff] }
 0x20f   : > { %v7620_v16 = vpack.c.bf16 %v3878_v1, %v3874_v58  ;;  %v3882_v60 = vld [vmem:[%s6915_s14 + $0x700] sm:$0xff]  ;;  %v3891_v58 = vld [vmem:[%s6915_s14 + $0x748] sm:$0xff]  ;;  %v3897_v1 = vld [vmem:[%s6915_s14 + $0x778] sm:$0xff] }
 0x210   : > { %9272 = vst [vmem:[#allocation127_spill] sm:$0xff] %v7602_v49  ;;  %9273 = vst [vmem:[#allocation128_spill] sm:$0xff] %v7608_v22  ;;  %v3886_v21 = vld [vmem:[%s6915_s14 + $0x720] sm:$0xff] }
 0x211   : > { %4366 = vmatpush1.bf16.msra.mxu0 %v7580_v25  ;;  %4430 = vmatpush1.bf16.msra.mxu1 %v7582_v53  ;;  %9274 = vst [vmem:[#allocation129_spill] sm:$0xff] %v7610_v32  ;;  %v3880_v25 = vld [vmem:[%s6915_s14 + $0x6f0] sm:$0xff]  ;;  %9275 = vst [vmem:[#allocation130_spill] sm:$0xff] %v7620_v16 }
 0x212   : > { %4368 = vmatprep.subr.bf16.mxu0 %v7588_v37  ;;  %4432 = vmatprep.subr.bf16.mxu1 %v7590_v4  ;;  %v7622_v11 = vpack.c.bf16 %v3880_v25, %v3876_v63  ;;  %v7628_v4 = vpack.c.bf16 %v3887_v48, %v3883_v38  ;;  %v7630_v37 = vpack.c.bf16 %v3889_v28, %v3885_v47  ;;  %v3884_v53 = vld [vmem:[%s6915_s14 + $0x710] sm:$0xff]  ;;  %v3895_v63 = vld [vmem:[%s6915_s14 + $0x768] sm:$0xff]  ;;  %v3893_v25 = vld [vmem:[%s6915_s14 + $0x758] sm:$0xff] }
 0x213   : > { %v7640_v38 = vpack.c.bf16 %v3886_v21, %v3882_v60  ;;  %v3890_v47 = vld [vmem:[%s6915_s14 + $0x740] sm:$0xff]  ;;  %v3899_v60 = vld [vmem:[%s6915_s14 + $0x788] sm:$0xff]  ;;  %v3905_v21 = vld [vmem:[%s6915_s14 + $0x7b8] sm:$0xff] }
 0x214   : > { %9276 = vst [vmem:[#allocation131_spill] sm:$0xff] %v7622_v11  ;;  %9277 = vst [vmem:[#allocation132_spill] sm:$0xff] %v7628_v4  ;;  %v3894_v28 = vld [vmem:[%s6915_s14 + $0x760] sm:$0xff] }
 0x215   : > { %4370 = vmatpush1.bf16.msra.mxu0 %v7600_v10  ;;  %4434 = vmatpush1.bf16.msra.mxu1 %v7602_v49  ;;  %9278 = vst [vmem:[#allocation133_spill] sm:$0xff] %v7630_v37  ;;  %v3888_v10 = vld [vmem:[%s6915_s14 + $0x730] sm:$0xff]  ;;  %9279 = vst [vmem:[#allocation134_spill] sm:$0xff] %v7640_v38 }
 0x216   : > { %4372 = vmatprep.subr.bf16.mxu0 %v7608_v22  ;;  %4436 = vmatprep.subr.bf16.mxu1 %v7610_v32  ;;  %v7642_v48 = vpack.c.bf16 %v3888_v10, %v3884_v53  ;;  %v7648_v32 = vpack.c.bf16 %v3895_v63, %v3891_v58  ;;  %v7650_v22 = vpack.c.bf16 %v3897_v1, %v3893_v25  ;;  %v3892_v49 = vld [vmem:[%s6915_s14 + $0x750] sm:$0xff]  ;;  %v3903_v53 = vld [vmem:[%s6915_s14 + $0x7a8] sm:$0xff]  ;;  %v3901_v10 = vld [vmem:[%s6915_s14 + $0x798] sm:$0xff] }
 0x217   : > { %v7660_v58 = vpack.c.bf16 %v3894_v28, %v3890_v47  ;;  %v3898_v25 = vld [vmem:[%s6915_s14 + $0x780] sm:$0xff]  ;;  %v3907_v47 = vld [vmem:[%s6915_s14 + $0x7c8] sm:$0xff] }
 0x218   : > { %9280 = vst [vmem:[#allocation135_spill] sm:$0xff] %v7642_v48  ;;  %9281 = vst [vmem:[#allocation136_spill] sm:$0xff] %v7648_v32  ;;  %v3902_v1 = vld [vmem:[%s6915_s14 + $0x7a0] sm:$0xff]  ;;  %v3911_v28 = vld [vmem:[%s6915_s14 + $0x7e8] sm:$0xff] }
 0x219   : > { %4374 = vmatpush1.bf16.msra.mxu0 %v7620_v16  ;;  %4438 = vmatpush1.bf16.msra.mxu1 %v7622_v11  ;;  %9282 = vst [vmem:[#allocation137_spill] sm:$0xff] %v7650_v22  ;;  %v3896_v16 = vld [vmem:[%s6915_s14 + $0x770] sm:$0xff] }
 0x21a   : > { %4376 = vmatprep.subr.bf16.mxu0 %v7628_v4  ;;  %4440 = vmatprep.subr.bf16.mxu1 %v7630_v37  ;;  %v7662_v63 = vpack.c.bf16 %v3896_v16, %v3892_v49  ;;  %v7668_v37 = vpack.c.bf16 %v3903_v53, %v3899_v60  ;;  %v7670_v4 = vpack.c.bf16 %v3905_v21, %v3901_v10  ;;  %v3900_v11 = vld [vmem:[%s6915_s14 + $0x790] sm:$0xff]  ;;  %v3909_v49 = vld [vmem:[%s6915_s14 + $0x7d8] sm:$0xff]  ;;  %v3906_v60 = vld [vmem:[%s6915_s14 + $0x7c0] sm:$0xff] }
 0x21b   : > { %v3913_v16 = vld [vmem:[%s6915_s14 + $0x7f8] sm:$0xff]  ;;  %v7687_v53 = vpack.c.bf16 %v3911_v28, %v3907_v47  ;;  %v3910_v21 = vld [vmem:[%s6915_s14 + $0x7e0] sm:$0xff] }
 0x21c   : > { %9283 = vst [vmem:[#allocation138_spill] sm:$0xff] %v7662_v63  ;;  %9284 = vst [vmem:[#allocation139_spill] sm:$0xff] %v7668_v37  ;;  %v7689_v10 = vpack.c.bf16 %v3913_v16, %v3909_v49  ;;  %v9297_v47 = vld [vmem:[#allocation59_spill] sm:$0xff]  ;;  %v9298_v28 = vld [vmem:[#allocation65_spill] sm:$0xff] }
 0x21d   : > { %4378 = vmatpush1.bf16.msra.mxu0 %v7640_v38  ;;  %4442 = vmatpush1.bf16.msra.mxu1 %v7642_v48  ;;  %9285 = vst [vmem:[#allocation140_spill] sm:$0xff] %v7670_v4  ;;  %v3904_v38 = vld [vmem:[%s6915_s14 + $0x7b0] sm:$0xff]  ;;  %9288 = vst [vmem:[#allocation143_spill] sm:$0xff] %v7687_v53  ;;  %v9300_v16 = vld [vmem:[#allocation68_spill] sm:$0xff] }
 0x21e   : > { %4380 = vmatprep.subr.bf16.mxu0 %v7648_v32  ;;  %4444 = vmatprep.subr.bf16.mxu1 %v7650_v22  ;;  %v7680_v32 = vpack.c.bf16 %v3902_v1, %v3898_v25  ;;  %v7682_v22 = vpack.c.bf16 %v3904_v38, %v3900_v11  ;;  %9289 = vst [vmem:[#allocation144_spill] sm:$0xff] %v7689_v10  ;;  %v3908_v48 = vld [vmem:[%s6915_s14 + $0x7d0] sm:$0xff]  ;;  %v9294_v38 = vld [vmem:[#allocation61_spill] sm:$0xff]  ;;  %v9296_v1 = vld [vmem:[#allocation64_spill] sm:$0xff] }
 0x21f   : > { %v7696_v25 = vpack.c.bf16 %v3910_v21, %v3906_v60  ;;  %v7698_v11 = vpack.c.bf16 %v3912_v43, %v3908_v48  ;;  %v9293_v43 = vld [vmem:[#allocation55_spill] sm:$0xff]  ;;  %v9295_v48 = vld [vmem:[#allocation58_spill] sm:$0xff]  ;;  %v9302_v21 = vld [vmem:[#allocation69_spill] sm:$0xff] }
 0x220   : > { %9286 = vst [vmem:[#allocation141_spill] sm:$0xff] %v7680_v32  ;;  %9287 = vst [vmem:[#allocation142_spill] sm:$0xff] %v7682_v22  ;;  %v9299_v49 = vld [vmem:[#allocation62_spill] sm:$0xff]  ;;  %v9301_v60 = vld [vmem:[#allocation63_spill] sm:$0xff] }
 0x221   : > { %4382 = vmatpush1.bf16.msra.mxu0 %v7660_v58  ;;  %4446 = vmatpush1.bf16.msra.mxu1 %v7662_v63  ;;  %9290 = vst [vmem:[#allocation145_spill] sm:$0xff] %v7696_v25  ;;  %9291 = vst [vmem:[#allocation146_spill] sm:$0xff] %v7698_v11 }
 0x222   : > { %4384 = vmatprep.subr.bf16.mxu0 %v7668_v37  ;;  %4448 = vmatprep.subr.bf16.mxu1 %v7670_v4 }
 0x225   : > { %4386 = vmatpush1.bf16.msra.mxu0 %v7680_v32  ;;  %4450 = vmatpush1.bf16.msra.mxu1 %v7682_v22 }
 0x226   : > { %4388 = vmatprep.subr.bf16.mxu0 %v7687_v53  ;;  %4452 = vmatprep.subr.bf16.mxu1 %v7689_v10 }
 0x229   : > { %4390 = vmatpush1.bf16.msra.mxu0 %v7696_v25  ;;  %4454 = vmatpush1.bf16.msra.mxu1 %v7698_v11 }
 0x22a   : > { %4456 = vmatprep.subr.bf16.mxu0 %v6965_v12  ;;  %4520 = vmatprep.subr.bf16.mxu1 %v6993_v31 }
 0x22c   : > { %1131 = vmatmul.mubr.f32.vlgmr.msra.gmra.mrb[4].mxu0 %v7396_v14  ;;  %1202 = vmatmul.mubr.f32.vlgmr.msra.gmra.mrb[4].mxu1 %v7396_v14  ;;  %v9292_v14 = vld [vmem:[#allocation60_spill] sm:$0xff] }
 0x22d   : > { %4458 = vmatpush1.bf16.msra.mxu0 %v6972_v17  ;;  %4522 = vmatpush1.bf16.msra.mxu1 %v6997_v34 }
 0x22e   : > { %4460 = vmatprep.subr.bf16.mxu0 %v6974_v18  ;;  %4524 = vmatprep.subr.bf16.mxu1 %v7012_v42 }
 0x231   : > { %4462 = vmatpush1.bf16.msra.mxu0 %v6982_v23  ;;  %4526 = vmatpush1.bf16.msra.mxu1 %v7017_v46 }
 0x232   : > { %4464 = vmatprep.subr.bf16.mxu0 %v6987_v26  ;;  %4528 = vmatprep.subr.bf16.mxu1 %v7029_v54 }
 0x235   : > { %4466 = vmatpush1.bf16.msra.mxu0 %v7000_v35  ;;  %4530 = vmatpush1.bf16.msra.mxu1 %v7036_v57 }
 0x236   : > { %4468 = vmatprep.subr.bf16.mxu0 %v7007_v39  ;;  %4532 = vmatprep.subr.bf16.mxu1 %v7042_v61 }
 0x239   : > { %4470 = vmatpush1.bf16.msra.mxu0 %v7025_v51  ;;  %4534 = vmatpush1.bf16.msra.mxu1 %v7058_v7 }
 0x23a   : > { %4472 = vmatprep.subr.bf16.mxu0 %v7032_v55  ;;  %4536 = vmatprep.subr.bf16.mxu1 %v7062_v9 }
 0x23d   : > { %4474 = vmatpush1.bf16.msra.mxu0 %v7047_v0  ;;  %4538 = vmatpush1.bf16.msra.mxu1 %v7078_v24 }
 0x23e   : > { %4476 = vmatprep.subr.bf16.mxu0 %v7052_v3  ;;  %4540 = vmatprep.subr.bf16.mxu1 %v7082_v27 }
 0x241   : > { %4478 = vmatpush1.bf16.msra.mxu0 %v7069_v15  ;;  %4542 = vmatpush1.bf16.msra.mxu1 %v7098_v41 }
 0x242   : > { %4480 = vmatprep.subr.bf16.mxu0 %v7072_v19  ;;  %4544 = vmatprep.subr.bf16.mxu1 %v7102_v44 }
 0x245   : > { %4482 = vmatpush1.bf16.msra.mxu0 %v7089_v33  ;;  %4546 = vmatpush1.bf16.msra.mxu1 %v7118_v59 }
 0x246   : > { %4484 = vmatprep.subr.bf16.mxu0 %v7092_v36  ;;  %4548 = vmatprep.subr.bf16.mxu1 %v7122_v62 }
 0x249   : > { %4486 = vmatpush1.bf16.msra.mxu0 %v7109_v50  ;;  %4550 = vmatpush1.bf16.msra.mxu1 %v7138_v13 }
 0x24a   : > { %4488 = vmatprep.subr.bf16.mxu0 %v7112_v52  ;;  %4552 = vmatprep.subr.bf16.mxu1 %v7142_v20 }
 0x24d   : > { %4490 = vmatpush1.bf16.msra.mxu0 %v7129_v5  ;;  %4554 = vmatpush1.bf16.msra.mxu1 %v7158_v40 }
 0x24e   : > { %4492 = vmatprep.subr.bf16.mxu0 %v7132_v6  ;;  %4556 = vmatprep.subr.bf16.mxu1 %v7162_v45 }
 0x251   : > { %4494 = vmatpush1.bf16.msra.mxu0 %v7149_v29  ;;  %4558 = vmatpush1.bf16.msra.mxu1 %v7178_v2 }
 0x252   : > { %4496 = vmatprep.subr.bf16.mxu0 %v7152_v30  ;;  %4560 = vmatprep.subr.bf16.mxu1 %v7182_v8  ;;  %v9316_v30 = vld [vmem:[#allocation82_spill] sm:$0xff] }
 0x255   : > { %4498 = vmatpush1.bf16.msra.mxu0 %v7169_v56  ;;  %4562 = vmatpush1.bf16.msra.mxu1 %v9292_v14  ;;  %v9303_v14 = vld [vmem:[#allocation66_spill] sm:$0xff]  ;;  %v9315_v56 = vld [vmem:[#allocation81_spill] sm:$0xff] }
 0x256   : > { %4500 = vmatprep.subr.bf16.mxu0 %v9293_v43  ;;  %4564 = vmatprep.subr.bf16.mxu1 %v9294_v38  ;;  %v9304_v43 = vld [vmem:[#allocation72_spill] sm:$0xff]  ;;  %v9305_v38 = vld [vmem:[#allocation67_spill] sm:$0xff] }
 0x259   : > { %4502 = vmatpush1.bf16.msra.mxu0 %v9295_v48  ;;  %4566 = vmatpush1.bf16.msra.mxu1 %v9296_v1  ;;  %v9306_v48 = vld [vmem:[#allocation73_spill] sm:$0xff]  ;;  %v9307_v1 = vld [vmem:[#allocation70_spill] sm:$0xff] }
 0x25a   : > { %4504 = vmatprep.subr.bf16.mxu0 %v9297_v47  ;;  %4568 = vmatprep.subr.bf16.mxu1 %v9298_v28  ;;  %v9308_v47 = vld [vmem:[#allocation75_spill] sm:$0xff] }
 0x25b   : > { %v9309_v28 = vld [vmem:[#allocation71_spill] sm:$0xff] }
 0x25d   : > { %4506 = vmatpush1.bf16.msra.mxu0 %v9299_v49  ;;  %4570 = vmatpush1.bf16.msra.mxu1 %v9300_v16  ;;  %v9310_v49 = vld [vmem:[#allocation76_spill] sm:$0xff]  ;;  %v9311_v16 = vld [vmem:[#allocation74_spill] sm:$0xff] }
 0x25e   : > { %4508 = vmatprep.subr.bf16.mxu0 %v9301_v60  ;;  %4572 = vmatprep.subr.bf16.mxu1 %v9302_v21  ;;  %v9312_v60 = vld [vmem:[#allocation77_spill] sm:$0xff]  ;;  %v9313_v21 = vld [vmem:[#allocation78_spill] sm:$0xff] }
 0x261   : > { %4510 = vmatpush1.bf16.msra.mxu0 %v9303_v14  ;;  %4574 = vmatpush1.bf16.msra.mxu1 %v9304_v43  ;;  %v9314_v14 = vld [vmem:[#allocation79_spill] sm:$0xff] }
 0x262   : > { %4512 = vmatprep.subr.bf16.mxu0 %v9305_v38  ;;  %4576 = vmatprep.subr.bf16.mxu1 %v9306_v48 }
 0x265   : > { %4514 = vmatpush1.bf16.msra.mxu0 %v9307_v1  ;;  %4578 = vmatpush1.bf16.msra.mxu1 %v9308_v47 }
 0x266   : > { %4516 = vmatprep.subr.bf16.mxu0 %v9309_v28  ;;  %4580 = vmatprep.subr.bf16.mxu1 %v9310_v49  ;;  %v9317_v49 = vld [vmem:[#allocation83_spill] sm:$0xff] }
 0x269   : > { %4518 = vmatpush1.bf16.msra.mxu0 %v9311_v16  ;;  %4582 = vmatpush1.bf16.msra.mxu1 %v9312_v60  ;;  %v9318_v60 = vld [vmem:[#allocation84_spill] sm:$0xff] }
 0x26a   : > { %4584 = vmatprep.subr.bf16.mxu0 %v9313_v21  ;;  %4648 = vmatprep.subr.bf16.mxu1 %v9314_v14 }
 0x2bf   : > { %v945_v43 = vpop.f32.mrb[2].mxu0  ;;  %v1016_v38 = vpop.f32.mrb[2].mxu1 }
 0x2c0   : > { %v946_v48 = vadd.f32 %v945_v43, %v9315_v56  ;;  %v947_v8 = vpop.f32.mrb[3].mxu0  ;;  %v1018_v1 = vpop.f32.mrb[3].mxu1  ;;  %v1017_v16 = vadd.f32 %v1016_v38, %v9317_v49 }
 0x2c1   : > { %v948_v47 = vadd.f32 %v947_v8, %v9316_v30  ;;  %v1019_v45 = vadd.f32 %v1018_v1, %v9318_v60 }
 0x2c2   : > { %v3918_v2 = vmul.f32 -1.442695, %v946_v48  ;;  %v3920_v29 = vmul.f32 -1.442695, %v1017_v16 }
 0x2c3   : > { %v3919_v28 = vmul.f32 -1.442695, %v948_v47 }
 0x2c4   : > { %6250 = vpow2.f32 %v3918_v2 }
 0x2c5   : > { %6252 = vpow2.f32 %v3919_v28  ;;  %v9319_v28 = vld [vmem:[#allocation85_spill] sm:$0xff] }
 0x2c6   : > { %6254 = vpow2.f32 %v3920_v29 }
 0x2c7   : > { %6256 = vtanh.f32 %v1019_v45  ;;  %v1234_v45 = vld [vmem:[#allocation2 + $0x10] sm:$0xff] }
 0x2ce   : > { %v6251_v21 = vpop.eup %6250 }
 0x2cf   : > { %v6253_v14 = vpop.eup %6252  ;;  %v1030_v6 = vadd.f32 1.0, %v6251_v21  ;;  %v9326_v21 = vld [vmem:[#allocation91_spill] sm:$0xff] }
 0x2d0   : > { %v1031_v40 = vadd.f32 1.0, %v6253_v14  ;;  %v6255_v43 = vpop.eup %6254  ;;  %v9325_v14 = vld [vmem:[#allocation90_spill] sm:$0xff] }
 0x2d1   : > { %6258 = vrcp.f32 %v1030_v6  ;;  %v6257_v56 = vpop.eup %6256  ;;  %v1032_v48 = vadd.f32 1.0, %v6255_v43  ;;  %v9321_v6 = vld [vmem:[#allocation86_spill] sm:$0xff]  ;;  %v9327_v43 = vld [vmem:[#allocation92_spill] sm:$0xff] }
 0x2d2   : > { %6260 = vrcp.f32 %v1031_v40  ;;  %v9322_v40 = vld [vmem:[#allocation87_spill] sm:$0xff] }
 0x2d3   : > { %6262 = vrcp.f32 %v1032_v48  ;;  %v9329_v48 = vld [vmem:[#allocation94_spill] sm:$0xff] }
 0x2db   : > { %v6259_v8 = vpop.eup %6258 }
 0x2dc   : > { %v6261_v47 = vpop.eup %6260  ;;  %v1041_v2 = vmul.f32 %v6259_v8, %v6257_v56  ;;  %v9324_v56 = vld [vmem:[#allocation89_spill] sm:$0xff] }
 0x2dd   : > { %v1040_v30 = vmul.f32 %v6261_v47, %v9319_v28  ;;  %v6263_v29 = vpop.eup %6262  ;;  %v9328_v8 = vld [vmem:[#allocation93_spill] sm:$0xff]  ;;  %v9330_v47 = vld [vmem:[#allocation95_spill] sm:$0xff] }
 0x2de   : > { %v9332_v28 = vld [vmem:[#allocation97_spill] sm:$0xff] }
 0x2df   : > { %v7777_v38 = vadd.f32 %v1041_v2, %v1040_v30  ;;  %v9323_v30 = vld [vmem:[#allocation88_spill] sm:$0xff] }
 0x2e0   : > { %v9331_v2 = vld [vmem:[#allocation96_spill] sm:$0xff] }
 0x2e1   : > { %9320 = vst [vmem:[#allocation85_spill] sm:$0xff] %v7777_v38  ;;  %6264 = vtanh.f32 %v7777_v38  ;;  %v9344_v38 = vld [vmem:[#allocation104_spill] sm:$0xff] }
 0x2eb   : > { %v6265_v1 = vpop.eup %6264 }
 0x2ec   : > { %v7780_v16 = vmul.f32 %v6265_v1, %v6263_v29  ;;  %v3914_v29 = vld [vmem:[%s6922_s4 + $0x4] sm:$0xf] }
 0x2ed   : > { %v9333_v1 = vld [vmem:[#allocation98_spill] sm:$0xff] }
 0x2ee   : > { %1299 = vmatprep.mubr.f32.mxu0 %v7780_v16  ;;  %1370 = vmatprep.mubr.f32.mxu1 %v7780_v16 }
 0x2ef   : > { %1300 = vmatmul.mubr.f32.vlgmr.msra.gmra.mrb[6].mxu0 %v1234_v45  ;;  %1371 = vmatmul.mubr.f32.vlgmr.msra.gmra.mrb[6].mxu1 %v1234_v45  ;;  %v9334_v45 = vld [vmem:[#allocation99_spill] sm:$0xff] }
 0x2f0   : > { %4586 = vmatpush1.bf16.msra.mxu0 %v9321_v6  ;;  %4650 = vmatpush1.bf16.msra.mxu1 %v9322_v40  ;;  %v9342_v6 = vld [vmem:[#allocation102_spill] sm:$0xff] }
 0x2f1   : > { %4588 = vmatprep.subr.bf16.mxu0 %v9323_v30  ;;  %4652 = vmatprep.subr.bf16.mxu1 %v9324_v56 }
 0x2f4   : > { %4590 = vmatpush1.bf16.msra.mxu0 %v9325_v14  ;;  %4654 = vmatpush1.bf16.msra.mxu1 %v9326_v21  ;;  %v9335_v14 = vld [vmem:[#allocation80_spill] sm:$0xff] }
 0x2f5   : > { %4592 = vmatprep.subr.bf16.mxu0 %v9327_v43  ;;  %4656 = vmatprep.subr.bf16.mxu1 %v9328_v8  ;;  %v9336_v56 = vsub.s32 0, %v9335_v14  ;;  %v9338_v43 = vld [vmem:[#allocation100_spill] sm:$0xff]  ;;  %v9339_v8 = vld [vmem:[#allocation101_spill] sm:$0xff] }
 0x2f7   : > { %v7801_v21 = vrot.slane %v3914_v29, %v9336_v56 }
 0x2f8   : > { %4594 = vmatpush1.bf16.msra.mxu0 %v9329_v48  ;;  %4658 = vmatpush1.bf16.msra.mxu1 %v9330_v47  ;;  %v9340_v48 = vsub.s32 1, %v9335_v14 }
 0x2f9   : > { %4596 = vmatprep.subr.bf16.mxu0 %v9331_v2  ;;  %4660 = vmatprep.subr.bf16.mxu1 %v9332_v28  ;;  %9337 = vst [vmem:[#allocation80_spill] sm:$0xff] %v7801_v21 }
 0x2fa   : > { %v7807_v47 = vrot.slane %v3914_v29, %v9340_v48  ;;  %v9346_v48 = vsub.s32 2, %v9335_v14 }
 0x2fc   : > { %4598 = vmatpush1.bf16.msra.mxu0 %v9333_v1  ;;  %4662 = vmatpush1.bf16.msra.mxu1 %v9334_v45  ;;  %9341 = vst [vmem:[#allocation147_spill] sm:$0xff] %v7807_v47  ;;  %v9343_v45 = vld [vmem:[#allocation103_spill] sm:$0xff]  ;;  %v7817_v49 = vrot.slane %v3914_v29, %v9346_v48  ;;  %v9356_v48 = vld [vmem:[#allocation112_spill] sm:$0xff] }
 0x2fd   : > { %4600 = vmatprep.subr.bf16.mxu0 %v9338_v43  ;;  %4664 = vmatprep.subr.bf16.mxu1 %v9339_v8  ;;  %v9345_v43 = vld [vmem:[#allocation105_spill] sm:$0xff] }
 0x2fe   : > { %9347 = vst [vmem:[#allocation148_spill] sm:$0xff] %v7817_v49 }
 0x2ff   : > { %v1132_v2 = vpop.f32.mrb[4].mxu0  ;;  %v1203_v30 = vpop.f32.mrb[4].mxu1 }
 0x300   : > { %v1133_v28 = vadd.f32 %v1132_v2, %v7801_v21  ;;  %v1134_v40 = vpop.f32.mrb[5].mxu0  ;;  %v1205_v1 = vpop.f32.mrb[5].mxu1  ;;  %4602 = vmatpush1.bf16.msra.mxu0 %v9342_v6  ;;  %4666 = vmatpush1.bf16.msra.mxu1 %v9343_v45  ;;  %v9348_v2 = vld [vmem:[#allocation106_spill] sm:$0xff]  ;;  %v9349_v21 = vld [vmem:[#allocation107_spill] sm:$0xff]  ;;  %v9350_v6 = vld [vmem:[#allocation108_spill] sm:$0xff] }
 0x301   : > { %v1135_v56 = vadd.f32 %v1134_v40, %v7807_v47  ;;  %4604 = vmatprep.subr.bf16.mxu0 %v9344_v38  ;;  %4668 = vmatprep.subr.bf16.mxu1 %v9345_v43  ;;  %v9351_v45 = vld [vmem:[#allocation109_spill] sm:$0xff]  ;;  %v9352_v40 = vsub.s32 3, %v9335_v14  ;;  %v9358_v43 = vld [vmem:[#allocation114_spill] sm:$0xff]  ;;  %v9360_v14 = vld [vmem:[#allocation116_spill] sm:$0xff] }
 0x302   : > { %v3921_v8 = vmul.f32 -1.442695, %v1133_v28  ;;  %v1204_v28 = vadd.f32 %v1203_v30, %v7817_v49 }
 0x303   : > { %v3922_v60 = vmul.f32 -1.442695, %v1135_v56  ;;  %v7825_v47 = vrot.slane %v3914_v29, %v9352_v40  ;;  %v9355_v56 = vld [vmem:[#allocation111_spill] sm:$0xff]  ;;  %v9361_v29 = vld [vmem:[#allocation117_spill] sm:$0xff] }
 0x304   : > { %6266 = vpow2.f32 %v3921_v8  ;;  %4606 = vmatpush1.bf16.msra.mxu0 %v9348_v2  ;;  %4670 = vmatpush1.bf16.msra.mxu1 %v9349_v21  ;;  %v9354_v8 = vld [vmem:[#allocation110_spill] sm:$0xff]  ;;  %v9357_v2 = vld [vmem:[#allocation113_spill] sm:$0xff] }
 0x305   : > { %4608 = vmatprep.subr.bf16.mxu0 %v9350_v6  ;;  %4672 = vmatprep.subr.bf16.mxu1 %v9351_v45  ;;  %6268 = vpow2.f32 %v3922_v60  ;;  %9353 = vst [vmem:[#allocation149_spill] sm:$0xff] %v7825_v47  ;;  %v1206_v21 = vadd.f32 %v1205_v1, %v7825_v47  ;;  %v3923_v6 = vmul.f32 -1.442695, %v1204_v28  ;;  %v9359_v60 = vld [vmem:[#allocation115_spill] sm:$0xff]  ;;  %v9364_v28 = vld [vmem:[#allocation120_spill] sm:$0xff] }
 0x306   : > { %v9376_v47 = vld [vmem:[#allocation132_spill] sm:$0xff] }
 0x307   : > { %6270 = vtanh.f32 %v1206_v21  ;;  %v9369_v21 = vld [vmem:[#allocation125_spill] sm:$0xff] }
 0x308   : > { %4610 = vmatpush1.bf16.msra.mxu0 %v9354_v8  ;;  %4674 = vmatpush1.bf16.msra.mxu1 %v9355_v56  ;;  %6272 = vpow2.f32 %v3923_v6  ;;  %v9362_v56 = vld [vmem:[#allocation118_spill] sm:$0xff] }
 0x309   : > { %4612 = vmatprep.subr.bf16.mxu0 %v9356_v48  ;;  %4676 = vmatprep.subr.bf16.mxu1 %v9357_v2  ;;  %v9363_v48 = vld [vmem:[#allocation119_spill] sm:$0xff]  ;;  %v9370_v6 = vld [vmem:[#allocation126_spill] sm:$0xff] }
 0x30a   : > { %v9378_v2 = vld [vmem:[#allocation134_spill] sm:$0xff] }
 0x30c   : > { %4614 = vmatpush1.bf16.msra.mxu0 %v9358_v43  ;;  %4678 = vmatpush1.bf16.msra.mxu1 %v9359_v60  ;;  %v9365_v43 = vld [vmem:[#allocation121_spill] sm:$0xff]  ;;  %v9366_v60 = vld [vmem:[#allocation122_spill] sm:$0xff] }
 0x30d   : > { %4616 = vmatprep.subr.bf16.mxu0 %v9360_v14  ;;  %4680 = vmatprep.subr.bf16.mxu1 %v9361_v29  ;;  %v9367_v14 = vld [vmem:[#allocation123_spill] sm:$0xff]  ;;  %v9368_v29 = vld [vmem:[#allocation124_spill] sm:$0xff] }
 0x30e   : > { %v6267_v30 = vpop.eup %6266 }
 0x30f   : > { %v1217_v40 = vadd.f32 1.0, %v6267_v30  ;;  %v6269_v49 = vpop.eup %6268  ;;  %v9371_v30 = vld [vmem:[#allocation127_spill] sm:$0xff] }
 0x310   : > { %4618 = vmatpush1.bf16.msra.mxu0 %v9362_v56  ;;  %4682 = vmatpush1.bf16.msra.mxu1 %v9363_v48  ;;  %v1218_v1 = vadd.f32 1.0, %v6269_v49  ;;  %v9373_v49 = vld [vmem:[#allocation129_spill] sm:$0xff]  ;;  %v9374_v56 = vld [vmem:[#allocation130_spill] sm:$0xff] }
 0x311   : > { %6274 = vrcp.f32 %v1217_v40  ;;  %4620 = vmatprep.subr.bf16.mxu0 %v9364_v28  ;;  %4684 = vmatprep.subr.bf16.mxu1 %v9365_v43  ;;  %v6271_v48 = vpop.eup %6270  ;;  %v9372_v40 = vld [vmem:[#allocation128_spill] sm:$0xff] }
 0x312   : > { %6276 = vrcp.f32 %v1218_v1  ;;  %v6273_v28 = vpop.eup %6272 }
 0x314   : > { %4622 = vmatpush1.bf16.msra.mxu0 %v9366_v60  ;;  %4686 = vmatpush1.bf16.msra.mxu1 %v9367_v14  ;;  %v9375_v60 = vld [vmem:[#allocation131_spill] sm:$0xff] }
 0x315   : > { %4624 = vmatprep.subr.bf16.mxu0 %v9368_v29  ;;  %4688 = vmatprep.subr.bf16.mxu1 %v9369_v21  ;;  %v1219_v29 = vadd.f32 1.0, %v6273_v28  ;;  %v9377_v21 = vld [vmem:[#allocation133_spill] sm:$0xff]  ;;  %v9383_v28 = vld [vmem:[#allocation47_spill] sm:$0xff] }
 0x317   : > { %6278 = vrcp.f32 %v1219_v29 }
 0x318   : > { %4626 = vmatpush1.bf16.msra.mxu0 %v9370_v6  ;;  %4690 = vmatpush1.bf16.msra.mxu1 %v9371_v30 }
 0x319   : > { %4628 = vmatprep.subr.bf16.mxu0 %v9372_v40  ;;  %4692 = vmatprep.subr.bf16.mxu1 %v9373_v49  ;;  %v9379_v40 = vld [vmem:[#allocation135_spill] sm:$0xff]  ;;  %v9380_v49 = vld [vmem:[#allocation136_spill] sm:$0xff] }
 0x31b   : > { %v6275_v43 = vpop.eup %6274 }
 0x31c   : > { %v1228_v1 = vmul.f32 %v6275_v43, %v6271_v48  ;;  %4630 = vmatpush1.bf16.msra.mxu0 %v9374_v56  ;;  %4694 = vmatpush1.bf16.msra.mxu1 %v9375_v60  ;;  %v6277_v14 = vpop.eup %6276  ;;  %v9381_v43 = vld [vmem:[#allocation137_spill] sm:$0xff] }
 0x31d   : > { %4632 = vmatprep.subr.bf16.mxu0 %v9376_v47  ;;  %4696 = vmatprep.subr.bf16.mxu1 %v9377_v21  ;;  %v1227_v6 = vmul.f32 0.0, %v6277_v14 }
 0x31f   : > { %v7853_v30 = vadd.f32 %v1228_v1, %v1227_v6  ;;  %v9384_v6 = vld [vmem:[#allocation53_spill] sm:$0xff]  ;;  %v9385_v1 = vld [vmem:[#allocation50_spill] sm:$0xff] }
 0x320   : > { %4634 = vmatpush1.bf16.msra.mxu0 %v9378_v2  ;;  %4698 = vmatpush1.bf16.msra.mxu1 %v9379_v40 }
 0x321   : > { %4636 = vmatprep.subr.bf16.mxu0 %v9380_v49  ;;  %4700 = vmatprep.subr.bf16.mxu1 %v9381_v43  ;;  %6280 = vtanh.f32 %v7853_v30  ;;  %v6279_v48 = vpop.eup %6278 }
 0x324   : > { %4638 = vmatpush1.bf16.msra.mxu0 %v7660_v58  ;;  %4702 = vmatpush1.bf16.msra.mxu1 %v7662_v63 }
 0x325   : > { %4640 = vmatprep.subr.bf16.mxu0 %v7668_v37  ;;  %4704 = vmatprep.subr.bf16.mxu1 %v7670_v4 }
 0x328   : > { %4642 = vmatpush1.bf16.msra.mxu0 %v7680_v32  ;;  %4706 = vmatpush1.bf16.msra.mxu1 %v7682_v22 }
 0x329   : > { %4644 = vmatprep.subr.bf16.mxu0 %v7687_v53  ;;  %4708 = vmatprep.subr.bf16.mxu1 %v7689_v10 }
 0x32b   : > { %v6281_v14 = vpop.eup %6280 }
 0x32c   : > { %4646 = vmatpush1.bf16.msra.mxu0 %v7696_v25  ;;  %4710 = vmatpush1.bf16.msra.mxu1 %v7698_v11  ;;  %v1231_v29 = vmul.f32 %v6281_v14, %v6279_v48  ;;  %v9386_v48 = vld [vmem:[#allocation56_spill] sm:$0xff]  ;;  %v9387_v14 = vld [vmem:[#allocation51_spill] sm:$0xff] }
 0x32d   : > { %4712 = vmatprep.subr.bf16.mxu0 %v6965_v12  ;;  %4776 = vmatprep.subr.bf16.mxu1 %v6993_v31 }
 0x32e   : > { %1232 = vst [vmem:[#allocation2] sm:$0xff] %v1231_v29  ;;  %1465 = vmatprep.mubr.f32.mxu0 %v1231_v29  ;;  %1536 = vmatprep.mubr.f32.mxu1 %v1231_v29  ;;  %v9388_v29 = vld [vmem:[#allocation57_spill] sm:$0xff] }
 0x32f   : > { %1466 = vmatmul.mubr.f32.vlgmr.msra.gmra.mrb[8].mxu0 %v7780_v16  ;;  %1537 = vmatmul.mubr.f32.vlgmr.msra.gmra.mrb[8].mxu1 %v7780_v16  ;;  %v9382_v16 = vld [vmem:[#allocation52_spill] sm:$0xff] }
 0x330   : > { %4714 = vmatpush1.bf16.msra.mxu0 %v6972_v17  ;;  %4778 = vmatpush1.bf16.msra.mxu1 %v6997_v34 }
 0x331   : > { %4716 = vmatprep.subr.bf16.mxu0 %v6974_v18  ;;  %4780 = vmatprep.subr.bf16.mxu1 %v7012_v42 }
 0x334   : > { %4718 = vmatpush1.bf16.msra.mxu0 %v6982_v23  ;;  %4782 = vmatpush1.bf16.msra.mxu1 %v7017_v46 }
 0x335   : > { %4720 = vmatprep.subr.bf16.mxu0 %v6987_v26  ;;  %4784 = vmatprep.subr.bf16.mxu1 %v7029_v54 }
 0x338   : > { %4722 = vmatpush1.bf16.msra.mxu0 %v7000_v35  ;;  %4786 = vmatpush1.bf16.msra.mxu1 %v7036_v57 }
 0x339   : > { %4724 = vmatprep.subr.bf16.mxu0 %v7007_v39  ;;  %4788 = vmatprep.subr.bf16.mxu1 %v7042_v61 }
 0x33c   : > { %4726 = vmatpush1.bf16.msra.mxu0 %v7025_v51  ;;  %4790 = vmatpush1.bf16.msra.mxu1 %v7058_v7 }
 0x33d   : > { %4728 = vmatprep.subr.bf16.mxu0 %v7032_v55  ;;  %4792 = vmatprep.subr.bf16.mxu1 %v7062_v9 }
 0x340   : > { %4730 = vmatpush1.bf16.msra.mxu0 %v7047_v0  ;;  %4794 = vmatpush1.bf16.msra.mxu1 %v7078_v24 }
 0x341   : > { %4732 = vmatprep.subr.bf16.mxu0 %v7052_v3  ;;  %4796 = vmatprep.subr.bf16.mxu1 %v7082_v27 }
 0x344   : > { %4734 = vmatpush1.bf16.msra.mxu0 %v7069_v15  ;;  %4798 = vmatpush1.bf16.msra.mxu1 %v7098_v41 }
 0x345   : > { %4736 = vmatprep.subr.bf16.mxu0 %v7072_v19  ;;  %4800 = vmatprep.subr.bf16.mxu1 %v7102_v44 }
 0x348   : > { %4738 = vmatpush1.bf16.msra.mxu0 %v7089_v33  ;;  %4802 = vmatpush1.bf16.msra.mxu1 %v7118_v59 }
 0x349   : > { %4740 = vmatprep.subr.bf16.mxu0 %v7092_v36  ;;  %4804 = vmatprep.subr.bf16.mxu1 %v7122_v62  ;;  %v9414_v36 = vld [vmem:[#allocation82_spill] sm:$0xff] }
 0x34c   : > { %4742 = vmatpush1.bf16.msra.mxu0 %v7109_v50  ;;  %4806 = vmatpush1.bf16.msra.mxu1 %v7138_v13  ;;  %v9389_v13 = vld [vmem:[#allocation54_spill] sm:$0xff]  ;;  %v9413_v50 = vld [vmem:[#allocation81_spill] sm:$0xff] }
 0x34d   : > { %4744 = vmatprep.subr.bf16.mxu0 %v7112_v52  ;;  %4808 = vmatprep.subr.bf16.mxu1 %v7142_v20  ;;  %v9390_v52 = vld [vmem:[#allocation60_spill] sm:$0xff]  ;;  %v9391_v20 = vld [vmem:[#allocation55_spill] sm:$0xff] }
 0x350   : > { %4746 = vmatpush1.bf16.msra.mxu0 %v7129_v5  ;;  %4810 = vmatpush1.bf16.msra.mxu1 %v9382_v16  ;;  %v9392_v5 = vld [vmem:[#allocation61_spill] sm:$0xff]  ;;  %v9393_v16 = vld [vmem:[#allocation58_spill] sm:$0xff] }
 0x351   : > { %4748 = vmatprep.subr.bf16.mxu0 %v9383_v28  ;;  %4812 = vmatprep.subr.bf16.mxu1 %v9384_v6  ;;  %v9394_v28 = vld [vmem:[#allocation64_spill] sm:$0xff]  ;;  %v9395_v6 = vld [vmem:[#allocation59_spill] sm:$0xff] }
 0x354   : > { %4750 = vmatpush1.bf16.msra.mxu0 %v9385_v1  ;;  %4814 = vmatpush1.bf16.msra.mxu1 %v9386_v48  ;;  %v9396_v1 = vld [vmem:[#allocation65_spill] sm:$0xff]  ;;  %v9397_v48 = vld [vmem:[#allocation62_spill] sm:$0xff] }
 0x355   : > { %4752 = vmatprep.subr.bf16.mxu0 %v9387_v14  ;;  %4816 = vmatprep.subr.bf16.mxu1 %v9388_v29  ;;  %v9398_v14 = vld [vmem:[#allocation68_spill] sm:$0xff]  ;;  %v9399_v29 = vld [vmem:[#allocation63_spill] sm:$0xff] }
 0x358   : > { %4754 = vmatpush1.bf16.msra.mxu0 %v9389_v13  ;;  %4818 = vmatpush1.bf16.msra.mxu1 %v9390_v52  ;;  %v9400_v13 = vld [vmem:[#allocation69_spill] sm:$0xff]  ;;  %v9401_v52 = vld [vmem:[#allocation66_spill] sm:$0xff] }
 0x359   : > { %4756 = vmatprep.subr.bf16.mxu0 %v9391_v20  ;;  %4820 = vmatprep.subr.bf16.mxu1 %v9392_v5  ;;  %v9402_v20 = vld [vmem:[#allocation72_spill] sm:$0xff]  ;;  %v9403_v5 = vld [vmem:[#allocation67_spill] sm:$0xff] }
 0x35c   : > { %4758 = vmatpush1.bf16.msra.mxu0 %v9393_v16  ;;  %4822 = vmatpush1.bf16.msra.mxu1 %v9394_v28  ;;  %v9404_v16 = vld [vmem:[#allocation73_spill] sm:$0xff]  ;;  %v9405_v28 = vld [vmem:[#allocation70_spill] sm:$0xff] }
 0x35d   : > { %4760 = vmatprep.subr.bf16.mxu0 %v9395_v6  ;;  %4824 = vmatprep.subr.bf16.mxu1 %v9396_v1  ;;  %v9406_v6 = vld [vmem:[#allocation75_spill] sm:$0xff] }
 0x35e   : > { %v9407_v1 = vld [vmem:[#allocation71_spill] sm:$0xff] }
 0x360   : > { %4762 = vmatpush1.bf16.msra.mxu0 %v9397_v48  ;;  %4826 = vmatpush1.bf16.msra.mxu1 %v9398_v14  ;;  %v9408_v48 = vld [vmem:[#allocation76_spill] sm:$0xff]  ;;  %v9409_v14 = vld [vmem:[#allocation74_spill] sm:$0xff] }
 0x361   : > { %4764 = vmatprep.subr.bf16.mxu0 %v9399_v29  ;;  %4828 = vmatprep.subr.bf16.mxu1 %v9400_v13  ;;  %v9410_v29 = vld [vmem:[#allocation77_spill] sm:$0xff]  ;;  %v9411_v13 = vld [vmem:[#allocation78_spill] sm:$0xff] }
 0x364   : > { %4766 = vmatpush1.bf16.msra.mxu0 %v9401_v52  ;;  %4830 = vmatpush1.bf16.msra.mxu1 %v9402_v20  ;;  %v9412_v52 = vld [vmem:[#allocation79_spill] sm:$0xff] }
 0x365   : > { %4768 = vmatprep.subr.bf16.mxu0 %v9403_v5  ;;  %4832 = vmatprep.subr.bf16.mxu1 %v9404_v16 }
 0x368   : > { %4770 = vmatpush1.bf16.msra.mxu0 %v9405_v28  ;;  %4834 = vmatpush1.bf16.msra.mxu1 %v9406_v6 }
 0x369   : > { %4772 = vmatprep.subr.bf16.mxu0 %v9407_v1  ;;  %4836 = vmatprep.subr.bf16.mxu1 %v9408_v48  ;;  %v9415_v48 = vld [vmem:[#allocation83_spill] sm:$0xff] }
 0x36c   : > { %4774 = vmatpush1.bf16.msra.mxu0 %v9409_v14  ;;  %4838 = vmatpush1.bf16.msra.mxu1 %v9410_v29  ;;  %v9416_v29 = vld [vmem:[#allocation84_spill] sm:$0xff] }
 0x36d   : > { %4840 = vmatprep.subr.bf16.mxu0 %v9411_v13  ;;  %4904 = vmatprep.subr.bf16.mxu1 %v9412_v52 }
 0x3c2   : > { %v1301_v20 = vpop.f32.mrb[6].mxu0  ;;  %v1372_v5 = vpop.f32.mrb[6].mxu1 }
 0x3c3   : > { %v1302_v16 = vadd.f32 %v1301_v20, %v9413_v50  ;;  %v1303_v62 = vpop.f32.mrb[7].mxu0  ;;  %v1374_v28 = vpop.f32.mrb[7].mxu1  ;;  %v1373_v14 = vadd.f32 %v1372_v5, %v9415_v48 }
 0x3c4   : > { %v1304_v6 = vadd.f32 %v1303_v62, %v9414_v36  ;;  %v1375_v44 = vadd.f32 %v1374_v28, %v9416_v29 }
 0x3c5   : > { %v3924_v59 = vmul.f32 -1.442695, %v1302_v16  ;;  %v3926_v33 = vmul.f32 -1.442695, %v1373_v14  ;;  %v9423_v14 = vld [vmem:[#allocation91_spill] sm:$0xff] }
 0x3c6   : > { %v3925_v1 = vmul.f32 -1.442695, %v1304_v6 }
 0x3c7   : > { %6282 = vpow2.f32 %v3924_v59 }
 0x3c8   : > { %6284 = vpow2.f32 %v3925_v1  ;;  %v9417_v1 = vld [vmem:[#allocation85_spill] sm:$0xff] }
 0x3c9   : > { %6286 = vpow2.f32 %v3926_v33 }
 0x3ca   : > { %6288 = vtanh.f32 %v1375_v44  ;;  %v1569_v44 = vld [vmem:[#allocation2 + $0x18] sm:$0xff] }
 0x3d1   : > { %v6283_v13 = vpop.eup %6282 }
 0x3d2   : > { %v6285_v52 = vpop.eup %6284  ;;  %v1386_v19 = vadd.f32 1.0, %v6283_v13 }
 0x3d3   : > { %v1387_v41 = vadd.f32 1.0, %v6285_v52  ;;  %v6287_v20 = vpop.eup %6286  ;;  %v9422_v52 = vld [vmem:[#allocation90_spill] sm:$0xff] }
 0x3d4   : > { %6290 = vrcp.f32 %v1386_v19  ;;  %v6289_v50 = vpop.eup %6288  ;;  %v1388_v16 = vadd.f32 1.0, %v6287_v20  ;;  %v9418_v19 = vld [vmem:[#allocation86_spill] sm:$0xff]  ;;  %v9424_v20 = vld [vmem:[#allocation92_spill] sm:$0xff] }
 0x3d5   : > { %6292 = vrcp.f32 %v1387_v41  ;;  %v9419_v41 = vld [vmem:[#allocation87_spill] sm:$0xff] }
 0x3d6   : > { %6294 = vrcp.f32 %v1388_v16  ;;  %v9426_v16 = vld [vmem:[#allocation94_spill] sm:$0xff] }
 0x3de   : > { %v6291_v62 = vpop.eup %6290 }
 0x3df   : > { %v6293_v6 = vpop.eup %6292  ;;  %v1397_v59 = vmul.f32 %v6291_v62, %v6289_v50  ;;  %v9420_v50 = vld [vmem:[#allocation88_spill] sm:$0xff]  ;;  %v9425_v62 = vld [vmem:[#allocation93_spill] sm:$0xff] }
 0x3e0   : > { %v1396_v36 = vmul.f32 %v6293_v6, %v9417_v1  ;;  %v6295_v33 = vpop.eup %6294  ;;  %v9427_v6 = vld [vmem:[#allocation95_spill] sm:$0xff]  ;;  %v9429_v1 = vld [vmem:[#allocation97_spill] sm:$0xff] }
 0x3e2   : > { %v7943_v5 = vadd.f32 %v1397_v59, %v1396_v36  ;;  %v9421_v36 = vld [vmem:[#allocation89_spill] sm:$0xff]  ;;  %v9428_v59 = vld [vmem:[#allocation96_spill] sm:$0xff] }
 0x3e4   : > { %6296 = vtanh.f32 %v7943_v5 }
 0x3ee   : > { %v6297_v28 = vpop.eup %6296 }
 0x3ef   : > { %v7946_v13 = vmul.f32 %v6297_v28, %v6295_v33  ;;  %v9430_v33 = vld [vmem:[#allocation98_spill] sm:$0xff]  ;;  %v9431_v28 = vld [vmem:[#allocation99_spill] sm:$0xff] }
 0x3f1   : > { %1634 = vmatprep.mubr.f32.mxu0 %v7946_v13  ;;  %1705 = vmatprep.mubr.f32.mxu1 %v7946_v13 }
 0x3f2   : > { %1635 = vmatmul.mubr.f32.vlgmr.msra.gmra.mrb[10].mxu0 %v1569_v44  ;;  %1706 = vmatmul.mubr.f32.vlgmr.msra.gmra.mrb[10].mxu1 %v1569_v44  ;;  %v9432_v44 = vld [vmem:[#allocation100_spill] sm:$0xff] }
 0x3f3   : > { %4842 = vmatpush1.bf16.msra.mxu0 %v9418_v19  ;;  %4906 = vmatpush1.bf16.msra.mxu1 %v9419_v41  ;;  %v9439_v19 = vld [vmem:[#allocation106_spill] sm:$0xff] }
 0x3f4   : > { %4844 = vmatprep.subr.bf16.mxu0 %v9420_v50  ;;  %4908 = vmatprep.subr.bf16.mxu1 %v9421_v36  ;;  %v9434_v36 = vld [vmem:[#allocation102_spill] sm:$0xff] }
 0x3f7   : > { %4846 = vmatpush1.bf16.msra.mxu0 %v9422_v52  ;;  %4910 = vmatpush1.bf16.msra.mxu1 %v9423_v14  ;;  %v9433_v52 = vld [vmem:[#allocation101_spill] sm:$0xff] }
 0x3f8   : > { %4848 = vmatprep.subr.bf16.mxu0 %v9424_v20  ;;  %4912 = vmatprep.subr.bf16.mxu1 %v9425_v62  ;;  %v9435_v62 = vld [vmem:[#allocation103_spill] sm:$0xff] }
 0x3fb   : > { %4850 = vmatpush1.bf16.msra.mxu0 %v9426_v16  ;;  %4914 = vmatpush1.bf16.msra.mxu1 %v9427_v6  ;;  %v9436_v16 = vld [vmem:[#allocation80_spill] sm:$0xff] }
 0x3fc   : > { %4852 = vmatprep.subr.bf16.mxu0 %v9428_v59  ;;  %4916 = vmatprep.subr.bf16.mxu1 %v9429_v1  ;;  %v9437_v1 = vld [vmem:[#allocation105_spill] sm:$0xff] }
 0x3ff   : > { %4854 = vmatpush1.bf16.msra.mxu0 %v9430_v33  ;;  %4918 = vmatpush1.bf16.msra.mxu1 %v9431_v28  ;;  %v9438_v33 = vld [vmem:[#allocation147_spill] sm:$0xff] }
 0x400   : > { %4856 = vmatprep.subr.bf16.mxu0 %v9432_v44  ;;  %4920 = vmatprep.subr.bf16.mxu1 %v9433_v52  ;;  %v9440_v52 = vld [vmem:[#allocation107_spill] sm:$0xff] }
 0x402   : > { %v1467_v14 = vpop.f32.mrb[8].mxu0  ;;  %v1538_v20 = vpop.f32.mrb[8].mxu1 }
 0x403   : > { %4858 = vmatpush1.bf16.msra.mxu0 %v9434_v36  ;;  %4922 = vmatpush1.bf16.msra.mxu1 %v9435_v62  ;;  %v1468_v6 = vadd.f32 %v1467_v14, %v9436_v16  ;;  %v1469_v50 = vpop.f32.mrb[9].mxu0  ;;  %v1540_v59 = vpop.f32.mrb[9].mxu1  ;;  %v9441_v36 = vld [vmem:[#allocation108_spill] sm:$0xff]  ;;  %v9442_v14 = vld [vmem:[#allocation111_spill] sm:$0xff] }
 0x404   : > { %4860 = vmatprep.subr.bf16.mxu0 %v9344_v38  ;;  %4924 = vmatprep.subr.bf16.mxu1 %v9437_v1  ;;  %v1470_v28 = vadd.f32 %v1469_v50, %v9438_v33  ;;  %v9443_v16 = vld [vmem:[#allocation148_spill] sm:$0xff]  ;;  %v9445_v50 = vld [vmem:[#allocation113_spill] sm:$0xff] }
 0x405   : > { %v3927_v41 = vmul.f32 -1.442695, %v1468_v6  ;;  %v1539_v1 = vadd.f32 %v1538_v20, %v9443_v16  ;;  %v9444_v38 = vld [vmem:[#allocation112_spill] sm:$0xff]  ;;  %v9446_v6 = vld [vmem:[#allocation149_spill] sm:$0xff]  ;;  %v9452_v20 = vld [vmem:[#allocation119_spill] sm:$0xff] }
 0x406   : > { %v3928_v44 = vmul.f32 -1.442695, %v1470_v28  ;;  %v1541_v28 = vadd.f32 %v1540_v59, %v9446_v6  ;;  %v9454_v59 = vld [vmem:[#allocation121_spill] sm:$0xff] }
 0x407   : > { %4862 = vmatpush1.bf16.msra.mxu0 %v9439_v19  ;;  %4926 = vmatpush1.bf16.msra.mxu1 %v9440_v52  ;;  %6298 = vpow2.f32 %v3927_v41  ;;  %v9447_v19 = vld [vmem:[#allocation114_spill] sm:$0xff]  ;;  %v9448_v41 = vld [vmem:[#allocation115_spill] sm:$0xff]  ;;  %v9449_v52 = vld [vmem:[#allocation116_spill] sm:$0xff] }
 0x408   : > { %4864 = vmatprep.subr.bf16.mxu0 %v9441_v36  ;;  %4928 = vmatprep.subr.bf16.mxu1 %v9351_v45  ;;  %6300 = vpow2.f32 %v3928_v44  ;;  %v3929_v36 = vmul.f32 -1.442695, %v1539_v1  ;;  %v9450_v44 = vld [vmem:[#allocation117_spill] sm:$0xff]  ;;  %v9455_v1 = vld [vmem:[#allocation122_spill] sm:$0xff] }
 0x409   : > { %6302 = vtanh.f32 %v1541_v28  ;;  %v9459_v28 = vld [vmem:[#allocation126_spill] sm:$0xff] }
 0x40a   : > { %6304 = vpow2.f32 %v3929_v36  ;;  %v9461_v36 = vld [vmem:[#allocation128_spill] sm:$0xff] }
 0x40b   : > { %4866 = vmatpush1.bf16.msra.mxu0 %v9354_v8  ;;  %4930 = vmatpush1.bf16.msra.mxu1 %v9442_v14  ;;  %v9451_v14 = vld [vmem:[#allocation118_spill] sm:$0xff] }
 0x40c   : > { %4868 = vmatprep.subr.bf16.mxu0 %v9444_v38  ;;  %4932 = vmatprep.subr.bf16.mxu1 %v9445_v50  ;;  %v9453_v50 = vld [vmem:[#allocation120_spill] sm:$0xff] }
 0x40f   : > { %4870 = vmatpush1.bf16.msra.mxu0 %v9447_v19  ;;  %4934 = vmatpush1.bf16.msra.mxu1 %v9448_v41 }
 0x410   : > { %4872 = vmatprep.subr.bf16.mxu0 %v9449_v52  ;;  %4936 = vmatprep.subr.bf16.mxu1 %v9450_v44  ;;  %v9456_v52 = vld [vmem:[#allocation123_spill] sm:$0xff]  ;;  %v9457_v44 = vld [vmem:[#allocation124_spill] sm:$0xff] }
 0x411   : > { %v6299_v8 = vpop.eup %6298 }
 0x412   : > { %v1552_v45 = vadd.f32 1.0, %v6299_v8  ;;  %v6301_v16 = vpop.eup %6300  ;;  %v9458_v8 = vld [vmem:[#allocation125_spill] sm:$0xff] }
 0x413   : > { %4874 = vmatpush1.bf16.msra.mxu0 %v9451_v14  ;;  %4938 = vmatpush1.bf16.msra.mxu1 %v9452_v20  ;;  %v1553_v6 = vadd.f32 1.0, %v6301_v16  ;;  %v9460_v20 = vld [vmem:[#allocation127_spill] sm:$0xff] }
 0x414   : > { %4876 = vmatprep.subr.bf16.mxu0 %v9453_v50  ;;  %4940 = vmatprep.subr.bf16.mxu1 %v9454_v59  ;;  %6306 = vrcp.f32 %v1552_v45  ;;  %v9462_v50 = vld [vmem:[#allocation129_spill] sm:$0xff]  ;;  %v6303_v59 = vpop.eup %6302 }
 0x415   : > { %6308 = vrcp.f32 %v1553_v6  ;;  %v6305_v45 = vpop.eup %6304 }
 0x417   : > { %4878 = vmatpush1.bf16.msra.mxu0 %v9455_v1  ;;  %4942 = vmatpush1.bf16.msra.mxu1 %v9456_v52 }
 0x418   : > { %4880 = vmatprep.subr.bf16.mxu0 %v9457_v44  ;;  %4944 = vmatprep.subr.bf16.mxu1 %v9458_v8 }
 0x41b   : > { %4882 = vmatpush1.bf16.msra.mxu0 %v9459_v28  ;;  %4946 = vmatpush1.bf16.msra.mxu1 %v9460_v20  ;;  %v1554_v28 = vadd.f32 1.0, %v6305_v45  ;;  %v9466_v45 = vld [vmem:[#allocation38_spill] sm:$0xff] }
 0x41c   : > { %4884 = vmatprep.subr.bf16.mxu0 %v9461_v36  ;;  %4948 = vmatprep.subr.bf16.mxu1 %v9462_v50 }
 0x41d   : > { %6310 = vrcp.f32 %v1554_v28  ;;  %v9465_v28 = vld [vmem:[#allocation41_spill] sm:$0xff] }
 0x41e   : > { %v6307_v16 = vpop.eup %6306 }
 0x41f   : > { %4886 = vmatpush1.bf16.msra.mxu0 %v9374_v56  ;;  %4950 = vmatpush1.bf16.msra.mxu1 %v9375_v60  ;;  %v1563_v6 = vmul.f32 %v6307_v16, %v6303_v59  ;;  %v6309_v8 = vpop.eup %6308  ;;  %v9467_v16 = vld [vmem:[#allocation44_spill] sm:$0xff] }
 0x420   : > { %4888 = vmatprep.subr.bf16.mxu0 %v9376_v47  ;;  %4952 = vmatprep.subr.bf16.mxu1 %v9377_v21  ;;  %v1562_v20 = vmul.f32 %v6309_v8, %v7853_v30  ;;  %v9464_v8 = vld [vmem:[#allocation35_spill] sm:$0xff] }
 0x422   : > { %v8005_v50 = vadd.f32 %v1563_v6, %v1562_v20  ;;  %v9468_v6 = vld [vmem:[#allocation39_spill] sm:$0xff] }
 0x423   : > { %4890 = vmatpush1.bf16.msra.mxu0 %v9378_v2  ;;  %4954 = vmatpush1.bf16.msra.mxu1 %v9379_v40 }
 0x424   : > { %4892 = vmatprep.subr.bf16.mxu0 %v9380_v49  ;;  %4956 = vmatprep.subr.bf16.mxu1 %v9381_v43  ;;  %6312 = vtanh.f32 %v8005_v50 }
 0x427   : > { %4894 = vmatpush1.bf16.msra.mxu0 %v7660_v58  ;;  %4958 = vmatpush1.bf16.msra.mxu1 %v7662_v63  ;;  %v6311_v30 = vpop.eup %6310 }
 0x428   : > { %4896 = vmatprep.subr.bf16.mxu0 %v7668_v37  ;;  %4960 = vmatprep.subr.bf16.mxu1 %v7670_v4 }
 0x42b   : > { %4898 = vmatpush1.bf16.msra.mxu0 %v7680_v32  ;;  %4962 = vmatpush1.bf16.msra.mxu1 %v7682_v22 }
 0x42c   : > { %4900 = vmatprep.subr.bf16.mxu0 %v7687_v53  ;;  %4964 = vmatprep.subr.bf16.mxu1 %v7689_v10 }
 0x42e   : > { %v6313_v20 = vpop.eup %6312 }
 0x42f   : > { %4902 = vmatpush1.bf16.msra.mxu0 %v7696_v25  ;;  %4966 = vmatpush1.bf16.msra.mxu1 %v7698_v11  ;;  %v1566_v59 = vmul.f32 %v6313_v20, %v6311_v30  ;;  %v9469_v30 = vld [vmem:[#allocation45_spill] sm:$0xff]  ;;  %v9470_v20 = vld [vmem:[#allocation42_spill] sm:$0xff] }
 0x430   : > { %4968 = vmatprep.subr.bf16.mxu0 %v6965_v12  ;;  %5032 = vmatprep.subr.bf16.mxu1 %v6993_v31 }
 0x431   : > { %1567 = vst [vmem:[#allocation2 + $0x8] sm:$0xff] %v1566_v59  ;;  %1800 = vmatprep.mubr.f32.mxu0 %v1566_v59  ;;  %1871 = vmatprep.mubr.f32.mxu1 %v1566_v59  ;;  %v9471_v59 = vld [vmem:[#allocation48_spill] sm:$0xff] }
 0x432   : > { %1801 = vmatmul.mubr.f32.vlgmr.msra.gmra.mrb[12].mxu0 %v7946_v13  ;;  %1872 = vmatmul.mubr.f32.vlgmr.msra.gmra.mrb[12].mxu1 %v7946_v13  ;;  %v9463_v13 = vld [vmem:[#allocation40_spill] sm:$0xff] }
 0x433   : > { %4970 = vmatpush1.bf16.msra.mxu0 %v6972_v17  ;;  %5034 = vmatpush1.bf16.msra.mxu1 %v6997_v34 }
 0x434   : > { %4972 = vmatprep.subr.bf16.mxu0 %v6974_v18  ;;  %5036 = vmatprep.subr.bf16.mxu1 %v7012_v42 }
 0x437   : > { %4974 = vmatpush1.bf16.msra.mxu0 %v6982_v23  ;;  %5038 = vmatpush1.bf16.msra.mxu1 %v7017_v46 }
 0x438   : > { %4976 = vmatprep.subr.bf16.mxu0 %v6987_v26  ;;  %5040 = vmatprep.subr.bf16.mxu1 %v7029_v54 }
 0x43b   : > { %4978 = vmatpush1.bf16.msra.mxu0 %v7000_v35  ;;  %5042 = vmatpush1.bf16.msra.mxu1 %v7036_v57 }
 0x43c   : > { %4980 = vmatprep.subr.bf16.mxu0 %v7007_v39  ;;  %5044 = vmatprep.subr.bf16.mxu1 %v7042_v61 }
 0x43f   : > { %4982 = vmatpush1.bf16.msra.mxu0 %v7025_v51  ;;  %5046 = vmatpush1.bf16.msra.mxu1 %v7058_v7 }
 0x440   : > { %4984 = vmatprep.subr.bf16.mxu0 %v7032_v55  ;;  %5048 = vmatprep.subr.bf16.mxu1 %v7062_v9 }
 0x443   : > { %4986 = vmatpush1.bf16.msra.mxu0 %v7047_v0  ;;  %5050 = vmatpush1.bf16.msra.mxu1 %v7078_v24  ;;  %v9507_v0 = vld [vmem:[#allocation82_spill] sm:$0xff] }
 0x444   : > { %4988 = vmatprep.subr.bf16.mxu0 %v7052_v3  ;;  %5052 = vmatprep.subr.bf16.mxu1 %v7082_v27  ;;  %v9472_v27 = vld [vmem:[#allocation43_spill] sm:$0xff]  ;;  %v9506_v3 = vld [vmem:[#allocation81_spill] sm:$0xff] }
 0x447   : > { %4990 = vmatpush1.bf16.msra.mxu0 %v7069_v15  ;;  %5054 = vmatpush1.bf16.msra.mxu1 %v9463_v13  ;;  %v9473_v15 = vld [vmem:[#allocation49_spill] sm:$0xff]  ;;  %v9474_v13 = vld [vmem:[#allocation46_spill] sm:$0xff] }
 0x448   : > { %4992 = vmatprep.subr.bf16.mxu0 %v9464_v8  ;;  %5056 = vmatprep.subr.bf16.mxu1 %v9465_v28  ;;  %v9475_v8 = vld [vmem:[#allocation52_spill] sm:$0xff]  ;;  %v9476_v28 = vld [vmem:[#allocation47_spill] sm:$0xff] }
 0x44b   : > { %4994 = vmatpush1.bf16.msra.mxu0 %v9466_v45  ;;  %5058 = vmatpush1.bf16.msra.mxu1 %v9467_v16  ;;  %v9477_v45 = vld [vmem:[#allocation53_spill] sm:$0xff]  ;;  %v9478_v16 = vld [vmem:[#allocation50_spill] sm:$0xff] }
 0x44c   : > { %4996 = vmatprep.subr.bf16.mxu0 %v9468_v6  ;;  %5060 = vmatprep.subr.bf16.mxu1 %v9469_v30  ;;  %v9479_v6 = vld [vmem:[#allocation56_spill] sm:$0xff]  ;;  %v9480_v30 = vld [vmem:[#allocation51_spill] sm:$0xff] }
 0x44f   : > { %4998 = vmatpush1.bf16.msra.mxu0 %v9470_v20  ;;  %5062 = vmatpush1.bf16.msra.mxu1 %v9471_v59  ;;  %v9481_v20 = vld [vmem:[#allocation57_spill] sm:$0xff]  ;;  %v9482_v59 = vld [vmem:[#allocation54_spill] sm:$0xff] }
 0x450   : > { %5000 = vmatprep.subr.bf16.mxu0 %v9472_v27  ;;  %5064 = vmatprep.subr.bf16.mxu1 %v9473_v15  ;;  %v9483_v27 = vld [vmem:[#allocation60_spill] sm:$0xff]  ;;  %v9484_v15 = vld [vmem:[#allocation55_spill] sm:$0xff] }
 0x453   : > { %5002 = vmatpush1.bf16.msra.mxu0 %v9474_v13  ;;  %5066 = vmatpush1.bf16.msra.mxu1 %v9475_v8  ;;  %v9485_v13 = vld [vmem:[#allocation61_spill] sm:$0xff]  ;;  %v9486_v8 = vld [vmem:[#allocation58_spill] sm:$0xff] }
 0x454   : > { %5004 = vmatprep.subr.bf16.mxu0 %v9476_v28  ;;  %5068 = vmatprep.subr.bf16.mxu1 %v9477_v45  ;;  %v9487_v28 = vld [vmem:[#allocation64_spill] sm:$0xff]  ;;  %v9488_v45 = vld [vmem:[#allocation59_spill] sm:$0xff] }
 0x457   : > { %5006 = vmatpush1.bf16.msra.mxu0 %v9478_v16  ;;  %5070 = vmatpush1.bf16.msra.mxu1 %v9479_v6  ;;  %v9489_v16 = vld [vmem:[#allocation65_spill] sm:$0xff]  ;;  %v9490_v6 = vld [vmem:[#allocation62_spill] sm:$0xff] }
 0x458   : > { %5008 = vmatprep.subr.bf16.mxu0 %v9480_v30  ;;  %5072 = vmatprep.subr.bf16.mxu1 %v9481_v20  ;;  %v9491_v30 = vld [vmem:[#allocation68_spill] sm:$0xff]  ;;  %v9492_v20 = vld [vmem:[#allocation63_spill] sm:$0xff] }
 0x45b   : > { %5010 = vmatpush1.bf16.msra.mxu0 %v9482_v59  ;;  %5074 = vmatpush1.bf16.msra.mxu1 %v9483_v27  ;;  %v9493_v59 = vld [vmem:[#allocation69_spill] sm:$0xff]  ;;  %v9494_v27 = vld [vmem:[#allocation66_spill] sm:$0xff] }
 0x45c   : > { %5012 = vmatprep.subr.bf16.mxu0 %v9484_v15  ;;  %5076 = vmatprep.subr.bf16.mxu1 %v9485_v13  ;;  %v9495_v15 = vld [vmem:[#allocation72_spill] sm:$0xff]  ;;  %v9496_v13 = vld [vmem:[#allocation67_spill] sm:$0xff] }
 0x45f   : > { %5014 = vmatpush1.bf16.msra.mxu0 %v9486_v8  ;;  %5078 = vmatpush1.bf16.msra.mxu1 %v9487_v28  ;;  %v9497_v8 = vld [vmem:[#allocation73_spill] sm:$0xff]  ;;  %v9498_v28 = vld [vmem:[#allocation70_spill] sm:$0xff] }
 0x460   : > { %5016 = vmatprep.subr.bf16.mxu0 %v9488_v45  ;;  %5080 = vmatprep.subr.bf16.mxu1 %v9489_v16  ;;  %v9499_v45 = vld [vmem:[#allocation75_spill] sm:$0xff] }
 0x461   : > { %v9500_v16 = vld [vmem:[#allocation71_spill] sm:$0xff] }
 0x463   : > { %5018 = vmatpush1.bf16.msra.mxu0 %v9490_v6  ;;  %5082 = vmatpush1.bf16.msra.mxu1 %v9491_v30  ;;  %v9501_v6 = vld [vmem:[#allocation76_spill] sm:$0xff]  ;;  %v9502_v30 = vld [vmem:[#allocation74_spill] sm:$0xff] }
 0x464   : > { %5020 = vmatprep.subr.bf16.mxu0 %v9492_v20  ;;  %5084 = vmatprep.subr.bf16.mxu1 %v9493_v59  ;;  %v9503_v20 = vld [vmem:[#allocation77_spill] sm:$0xff]  ;;  %v9504_v59 = vld [vmem:[#allocation78_spill] sm:$0xff] }
 0x467   : > { %5022 = vmatpush1.bf16.msra.mxu0 %v9494_v27  ;;  %5086 = vmatpush1.bf16.msra.mxu1 %v9495_v15  ;;  %v9505_v27 = vld [vmem:[#allocation79_spill] sm:$0xff] }
 0x468   : > { %5024 = vmatprep.subr.bf16.mxu0 %v9496_v13  ;;  %5088 = vmatprep.subr.bf16.mxu1 %v9497_v8 }
 0x46b   : > { %5026 = vmatpush1.bf16.msra.mxu0 %v9498_v28  ;;  %5090 = vmatpush1.bf16.msra.mxu1 %v9499_v45 }
 0x46c   : > { %5028 = vmatprep.subr.bf16.mxu0 %v9500_v16  ;;  %5092 = vmatprep.subr.bf16.mxu1 %v9501_v6 }
 0x46f   : > { %5030 = vmatpush1.bf16.msra.mxu0 %v9502_v30  ;;  %5094 = vmatpush1.bf16.msra.mxu1 %v9503_v20 }
 0x470   : > { %5096 = vmatprep.subr.bf16.mxu0 %v9504_v59  ;;  %5160 = vmatprep.subr.bf16.mxu1 %v9505_v27 }
 0x4c5   : > { %v1636_v15 = vpop.f32.mrb[10].mxu0  ;;  %v1707_v13 = vpop.f32.mrb[10].mxu1 }
 0x4c6   : > { %v1637_v8 = vadd.f32 %v1636_v15, %v9506_v3  ;;  %v1638_v24 = vpop.f32.mrb[11].mxu0  ;;  %v1709_v28 = vpop.f32.mrb[11].mxu1  ;;  %v1708_v30 = vadd.f32 %v1707_v13, %v9415_v48 }
 0x4c7   : > { %v1639_v45 = vadd.f32 %v1638_v24, %v9507_v0  ;;  %v1710_v20 = vadd.f32 %v1709_v28, %v9416_v29 }
 0x4c8   : > { %v3930_v9 = vmul.f32 -1.442695, %v1637_v8  ;;  %v3932_v6 = vmul.f32 -1.442695, %v1708_v30 }
 0x4c9   : > { %v3931_v16 = vmul.f32 -1.442695, %v1639_v45 }
 0x4ca   : > { %6314 = vpow2.f32 %v3930_v9 }
 0x4cb   : > { %6316 = vpow2.f32 %v3931_v16 }
 0x4cc   : > { %6318 = vpow2.f32 %v3932_v6 }
 0x4cd   : > { %6320 = vtanh.f32 %v1710_v20  ;;  %v9512_v20 = vld [vmem:[#allocation90_spill] sm:$0xff] }
 0x4d4   : > { %v6315_v59 = vpop.eup %6314 }
 0x4d5   : > { %v6317_v27 = vpop.eup %6316  ;;  %v1721_v55 = vadd.f32 1.0, %v6315_v59  ;;  %v9513_v59 = vld [vmem:[#allocation91_spill] sm:$0xff] }
 0x4d6   : > { %v1722_v7 = vadd.f32 1.0, %v6317_v27  ;;  %v6319_v15 = vpop.eup %6318  ;;  %v1904_v27 = vld [vmem:[#allocation2 + $0x20] sm:$0xff] }
 0x4d7   : > { %6322 = vrcp.f32 %v1721_v55  ;;  %v6321_v3 = vpop.eup %6320  ;;  %v1723_v8 = vadd.f32 1.0, %v6319_v15  ;;  %v9508_v55 = vld [vmem:[#allocation86_spill] sm:$0xff]  ;;  %v9514_v15 = vld [vmem:[#allocation92_spill] sm:$0xff] }
 0x4d8   : > { %6324 = vrcp.f32 %v1722_v7  ;;  %v9510_v7 = vld [vmem:[#allocation88_spill] sm:$0xff] }
 0x4d9   : > { %6326 = vrcp.f32 %v1723_v8  ;;  %v9516_v8 = vld [vmem:[#allocation94_spill] sm:$0xff] }
 0x4e1   : > { %v6323_v24 = vpop.eup %6322 }
 0x4e2   : > { %v6325_v45 = vpop.eup %6324  ;;  %v1732_v9 = vmul.f32 %v6323_v24, %v6321_v3  ;;  %v9509_v3 = vld [vmem:[#allocation87_spill] sm:$0xff]  ;;  %v9515_v24 = vld [vmem:[#allocation93_spill] sm:$0xff] }
 0x4e3   : > { %v1731_v16 = vmul.f32 %v6325_v45, %v7943_v5  ;;  %v6327_v28 = vpop.eup %6326  ;;  %v9511_v5 = vld [vmem:[#allocation89_spill] sm:$0xff]  ;;  %v9517_v45 = vld [vmem:[#allocation95_spill] sm:$0xff] }
 0x4e5   : > { %v8093_v13 = vadd.f32 %v1732_v9, %v1731_v16  ;;  %v9518_v9 = vld [vmem:[#allocation96_spill] sm:$0xff]  ;;  %v9519_v16 = vld [vmem:[#allocation97_spill] sm:$0xff] }
 0x4e7   : > { %6328 = vtanh.f32 %v8093_v13 }
 0x4f1   : > { %v6329_v6 = vpop.eup %6328 }
 0x4f2   : > { %v8096_v30 = vmul.f32 %v6329_v6, %v6327_v28  ;;  %v9520_v28 = vld [vmem:[#allocation98_spill] sm:$0xff]  ;;  %v9521_v6 = vld [vmem:[#allocation99_spill] sm:$0xff] }
 0x4f4   : > { %1969 = vmatprep.mubr.f32.mxu0 %v8096_v30  ;;  %2040 = vmatprep.mubr.f32.mxu1 %v8096_v30 }
 0x4f5   : > { %1970 = vmatmul.mubr.f32.vlgmr.msra.gmra.mrb[14].mxu0 %v1904_v27  ;;  %2041 = vmatmul.mubr.f32.vlgmr.msra.gmra.mrb[14].mxu1 %v1904_v27  ;;  %v9522_v27 = vld [vmem:[#allocation100_spill] sm:$0xff] }
 0x4f6   : > { %5098 = vmatpush1.bf16.msra.mxu0 %v9508_v55  ;;  %5162 = vmatpush1.bf16.msra.mxu1 %v9509_v3  ;;  %v9530_v3 = vld [vmem:[#allocation108_spill] sm:$0xff] }
 0x4f7   : > { %5100 = vmatprep.subr.bf16.mxu0 %v9510_v7  ;;  %5164 = vmatprep.subr.bf16.mxu1 %v9511_v5 }
 0x4fa   : > { %5102 = vmatpush1.bf16.msra.mxu0 %v9512_v20  ;;  %5166 = vmatpush1.bf16.msra.mxu1 %v9513_v59  ;;  %v9523_v20 = vld [vmem:[#allocation101_spill] sm:$0xff]  ;;  %v9524_v59 = vld [vmem:[#allocation102_spill] sm:$0xff] }
 0x4fb   : > { %5104 = vmatprep.subr.bf16.mxu0 %v9514_v15  ;;  %5168 = vmatprep.subr.bf16.mxu1 %v9515_v24  ;;  %v9525_v15 = vld [vmem:[#allocation104_spill] sm:$0xff] }
 0x4fe   : > { %5106 = vmatpush1.bf16.msra.mxu0 %v9516_v8  ;;  %5170 = vmatpush1.bf16.msra.mxu1 %v9517_v45  ;;  %v9526_v45 = vld [vmem:[#allocation105_spill] sm:$0xff] }
 0x4ff   : > { %5108 = vmatprep.subr.bf16.mxu0 %v9518_v9  ;;  %5172 = vmatprep.subr.bf16.mxu1 %v9519_v16  ;;  %v9527_v9 = vld [vmem:[#allocation80_spill] sm:$0xff] }
 0x502   : > { %5110 = vmatpush1.bf16.msra.mxu0 %v9520_v28  ;;  %5174 = vmatpush1.bf16.msra.mxu1 %v9521_v6 }
 0x503   : > { %5112 = vmatprep.subr.bf16.mxu0 %v9522_v27  ;;  %5176 = vmatprep.subr.bf16.mxu1 %v9523_v20  ;;  %v9528_v27 = vld [vmem:[#allocation106_spill] sm:$0xff]  ;;  %v9529_v20 = vld [vmem:[#allocation107_spill] sm:$0xff] }
 0x505   : > { %v1802_v24 = vpop.f32.mrb[12].mxu0  ;;  %v1873_v8 = vpop.f32.mrb[12].mxu1 }
 0x506   : > { %5114 = vmatpush1.bf16.msra.mxu0 %v9524_v59  ;;  %5178 = vmatpush1.bf16.msra.mxu1 %v9435_v62  ;;  %v1803_v16 = vadd.f32 %v1802_v24, %v9527_v9  ;;  %v1804_v5 = vpop.f32.mrb[13].mxu0  ;;  %v1875_v28 = vpop.f32.mrb[13].mxu1  ;;  %v9531_v62 = vld [vmem:[#allocation109_spill] sm:$0xff] }
 0x507   : > { %5116 = vmatprep.subr.bf16.mxu0 %v9525_v15  ;;  %5180 = vmatprep.subr.bf16.mxu1 %v9526_v45  ;;  %v1805_v6 = vadd.f32 %v1804_v5, %v9438_v33  ;;  %v9532_v15 = vld [vmem:[#allocation110_spill] sm:$0xff]  ;;  %v9533_v45 = vld [vmem:[#allocation111_spill] sm:$0xff]  ;;  %v9534_v24 = vld [vmem:[#allocation113_spill] sm:$0xff] }
 0x508   : > { %v3933_v7 = vmul.f32 -1.442695, %v1803_v16  ;;  %v9535_v5 = vld [vmem:[#allocation148_spill] sm:$0xff] }
 0x509   : > { %v3934_v59 = vmul.f32 -1.442695, %v1805_v6  ;;  %v1874_v16 = vadd.f32 %v1873_v8, %v9535_v5  ;;  %v9536_v6 = vld [vmem:[#allocation149_spill] sm:$0xff] }
 0x50a   : > { %5118 = vmatpush1.bf16.msra.mxu0 %v9528_v27  ;;  %5182 = vmatpush1.bf16.msra.mxu1 %v9529_v20  ;;  %6330 = vpow2.f32 %v3933_v7  ;;  %v9537_v20 = vld [vmem:[#allocation116_spill] sm:$0xff]  ;;  %v9538_v7 = vld [vmem:[#allocation117_spill] sm:$0xff] }
 0x50b   : > { %5120 = vmatprep.subr.bf16.mxu0 %v9530_v3  ;;  %5184 = vmatprep.subr.bf16.mxu1 %v9531_v62  ;;  %6332 = vpow2.f32 %v3934_v59  ;;  %v1876_v3 = vadd.f32 %v1875_v28, %v9536_v6  ;;  %v3935_v59 = vmul.f32 -1.442695, %v1874_v16  ;;  %v9541_v8 = vld [vmem:[#allocation121_spill] sm:$0xff] }
 0x50c   : > { %v9542_v16 = vld [vmem:[#allocation125_spill] sm:$0xff] }
 0x50d   : > { %6334 = vtanh.f32 %v1876_v3  ;;  %v9544_v3 = vld [vmem:[#allocation127_spill] sm:$0xff] }
 0x50e   : > { %5122 = vmatpush1.bf16.msra.mxu0 %v9532_v15  ;;  %5186 = vmatpush1.bf16.msra.mxu1 %v9533_v45  ;;  %v9539_v45 = vld [vmem:[#allocation119_spill] sm:$0xff]  ;;  %6336 = vpow2.f32 %v3935_v59 }
 0x50f   : > { %5124 = vmatprep.subr.bf16.mxu0 %v9444_v38  ;;  %5188 = vmatprep.subr.bf16.mxu1 %v9534_v24  ;;  %v9540_v24 = vld [vmem:[#allocation120_spill] sm:$0xff] }
 0x512   : > { %5126 = vmatpush1.bf16.msra.mxu0 %v9447_v19  ;;  %5190 = vmatpush1.bf16.msra.mxu1 %v9448_v41 }
 0x513   : > { %5128 = vmatprep.subr.bf16.mxu0 %v9537_v20  ;;  %5192 = vmatprep.subr.bf16.mxu1 %v9538_v7 }
 0x514   : > { %v6331_v15 = vpop.eup %6330 }
 0x515   : > { %v1887_v38 = vadd.f32 1.0, %v6331_v15  ;;  %v6333_v19 = vpop.eup %6332  ;;  %v9545_v15 = vld [vmem:[#allocation129_spill] sm:$0xff] }
 0x516   : > { %5130 = vmatpush1.bf16.msra.mxu0 %v9451_v14  ;;  %5194 = vmatpush1.bf16.msra.mxu1 %v9539_v45  ;;  %v1888_v28 = vadd.f32 1.0, %v6333_v19  ;;  %v9543_v45 = vld [vmem:[#allocation126_spill] sm:$0xff] }
 0x517   : > { %5132 = vmatprep.subr.bf16.mxu0 %v9540_v24  ;;  %5196 = vmatprep.subr.bf16.mxu1 %v9541_v8  ;;  %6338 = vrcp.f32 %v1887_v38  ;;  %v6335_v59 = vpop.eup %6334 }
 0x518   : > { %6340 = vrcp.f32 %v1888_v28  ;;  %v6337_v38 = vpop.eup %6336 }
 0x51a   : > { %5134 = vmatpush1.bf16.msra.mxu0 %v9455_v1  ;;  %5198 = vmatpush1.bf16.msra.mxu1 %v9456_v52 }
 0x51b   : > { %5136 = vmatprep.subr.bf16.mxu0 %v9457_v44  ;;  %5200 = vmatprep.subr.bf16.mxu1 %v9542_v16 }
 0x51e   : > { %5138 = vmatpush1.bf16.msra.mxu0 %v9543_v45  ;;  %5202 = vmatpush1.bf16.msra.mxu1 %v9544_v3  ;;  %v1889_v45 = vadd.f32 1.0, %v6337_v38  ;;  %v9549_v38 = vld [vmem:[#allocation30_spill] sm:$0xff] }
 0x51f   : > { %5140 = vmatprep.subr.bf16.mxu0 %v9461_v36  ;;  %5204 = vmatprep.subr.bf16.mxu1 %v9545_v15 }
 0x520   : > { %6342 = vrcp.f32 %v1889_v45 }
 0x521   : > { %v6339_v19 = vpop.eup %6338 }
 0x522   : > { %5142 = vmatpush1.bf16.msra.mxu0 %v9374_v56  ;;  %5206 = vmatpush1.bf16.msra.mxu1 %v9375_v60  ;;  %v1898_v28 = vmul.f32 %v6339_v19, %v6335_v59  ;;  %v6341_v16 = vpop.eup %6340  ;;  %v9548_v59 = vld [vmem:[#allocation33_spill] sm:$0xff]  ;;  %v9550_v19 = vld [vmem:[#allocation36_spill] sm:$0xff] }
 0x523   : > { %5144 = vmatprep.subr.bf16.mxu0 %v9376_v47  ;;  %5208 = vmatprep.subr.bf16.mxu1 %v9377_v21  ;;  %v1897_v3 = vmul.f32 %v6341_v16, %v8005_v50 }
 0x525   : > { %v8157_v56 = vadd.f32 %v1898_v28, %v1897_v3  ;;  %v9547_v3 = vld [vmem:[#allocation27_spill] sm:$0xff] }
 0x526   : > { %5146 = vmatpush1.bf16.msra.mxu0 %v9378_v2  ;;  %5210 = vmatpush1.bf16.msra.mxu1 %v9379_v40  ;;  %v9551_v28 = vld [vmem:[#allocation31_spill] sm:$0xff] }
 0x527   : > { %5148 = vmatprep.subr.bf16.mxu0 %v9380_v49  ;;  %5212 = vmatprep.subr.bf16.mxu1 %v9381_v43  ;;  %6344 = vtanh.f32 %v8157_v56 }
 0x52a   : > { %5150 = vmatpush1.bf16.msra.mxu0 %v7660_v58  ;;  %5214 = vmatpush1.bf16.msra.mxu1 %v7662_v63  ;;  %v6343_v50 = vpop.eup %6342 }
 0x52b   : > { %5152 = vmatprep.subr.bf16.mxu0 %v7668_v37  ;;  %5216 = vmatprep.subr.bf16.mxu1 %v7670_v4 }
 0x52e   : > { %5154 = vmatpush1.bf16.msra.mxu0 %v7680_v32  ;;  %5218 = vmatpush1.bf16.msra.mxu1 %v7682_v22 }
 0x52f   : > { %5156 = vmatprep.subr.bf16.mxu0 %v7687_v53  ;;  %5220 = vmatprep.subr.bf16.mxu1 %v7689_v10 }
 0x531   : > { %v6345_v45 = vpop.eup %6344 }
 0x532   : > { %5158 = vmatpush1.bf16.msra.mxu0 %v7696_v25  ;;  %5222 = vmatpush1.bf16.msra.mxu1 %v7698_v11  ;;  %v1901_v16 = vmul.f32 %v6345_v45, %v6343_v50  ;;  %v9552_v50 = vld [vmem:[#allocation37_spill] sm:$0xff]  ;;  %v9553_v45 = vld [vmem:[#allocation34_spill] sm:$0xff] }
 0x533   : > { %5224 = vmatprep.subr.bf16.mxu0 %v6965_v12  ;;  %5288 = vmatprep.subr.bf16.mxu1 %v6993_v31 }
 0x534   : > { %1902 = vst [vmem:[#allocation2 + $0x10] sm:$0xff] %v1901_v16  ;;  %2135 = vmatprep.mubr.f32.mxu0 %v1901_v16  ;;  %2206 = vmatprep.mubr.f32.mxu1 %v1901_v16  ;;  %v9554_v16 = vld [vmem:[#allocation40_spill] sm:$0xff] }
 0x535   : > { %2136 = vmatmul.mubr.f32.vlgmr.msra.gmra.mrb[16].mxu0 %v8096_v30  ;;  %2207 = vmatmul.mubr.f32.vlgmr.msra.gmra.mrb[16].mxu1 %v8096_v30  ;;  %v9546_v30 = vld [vmem:[#allocation32_spill] sm:$0xff] }
 0x536   : > { %5226 = vmatpush1.bf16.msra.mxu0 %v6972_v17  ;;  %5290 = vmatpush1.bf16.msra.mxu1 %v6997_v34 }
 0x537   : > { %5228 = vmatprep.subr.bf16.mxu0 %v6974_v18  ;;  %5292 = vmatprep.subr.bf16.mxu1 %v7012_v42 }
 0x53a   : > { %5230 = vmatpush1.bf16.msra.mxu0 %v6982_v23  ;;  %5294 = vmatpush1.bf16.msra.mxu1 %v7017_v46 }
 0x53b   : > { %5232 = vmatprep.subr.bf16.mxu0 %v6987_v26  ;;  %5296 = vmatprep.subr.bf16.mxu1 %v7029_v54 }
 0x53e   : > { %5234 = vmatpush1.bf16.msra.mxu0 %v7000_v35  ;;  %5298 = vmatpush1.bf16.msra.mxu1 %v7036_v57 }
 0x53f   : > { %5236 = vmatprep.subr.bf16.mxu0 %v7007_v39  ;;  %5300 = vmatprep.subr.bf16.mxu1 %v7042_v61  ;;  %v9555_v61 = vld [vmem:[#allocation35_spill] sm:$0xff]  ;;  %v9597_v39 = vld [vmem:[#allocation81_spill] sm:$0xff] }
 0x542   : > { %5238 = vmatpush1.bf16.msra.mxu0 %v7025_v51  ;;  %5302 = vmatpush1.bf16.msra.mxu1 %v9546_v30  ;;  %v9556_v51 = vld [vmem:[#allocation41_spill] sm:$0xff]  ;;  %v9557_v30 = vld [vmem:[#allocation38_spill] sm:$0xff] }
 0x543   : > { %5240 = vmatprep.subr.bf16.mxu0 %v9547_v3  ;;  %5304 = vmatprep.subr.bf16.mxu1 %v9548_v59  ;;  %v9558_v3 = vld [vmem:[#allocation44_spill] sm:$0xff]  ;;  %v9559_v59 = vld [vmem:[#allocation39_spill] sm:$0xff] }
 0x546   : > { %5242 = vmatpush1.bf16.msra.mxu0 %v9549_v38  ;;  %5306 = vmatpush1.bf16.msra.mxu1 %v9550_v19  ;;  %v9560_v38 = vld [vmem:[#allocation45_spill] sm:$0xff]  ;;  %v9561_v19 = vld [vmem:[#allocation42_spill] sm:$0xff] }
 0x547   : > { %5244 = vmatprep.subr.bf16.mxu0 %v9551_v28  ;;  %5308 = vmatprep.subr.bf16.mxu1 %v9552_v50  ;;  %v9562_v28 = vld [vmem:[#allocation48_spill] sm:$0xff]  ;;  %v9563_v50 = vld [vmem:[#allocation43_spill] sm:$0xff] }
 0x54a   : > { %5246 = vmatpush1.bf16.msra.mxu0 %v9553_v45  ;;  %5310 = vmatpush1.bf16.msra.mxu1 %v9554_v16  ;;  %v9564_v45 = vld [vmem:[#allocation49_spill] sm:$0xff]  ;;  %v9565_v16 = vld [vmem:[#allocation46_spill] sm:$0xff] }
 0x54b   : > { %5248 = vmatprep.subr.bf16.mxu0 %v9555_v61  ;;  %5312 = vmatprep.subr.bf16.mxu1 %v9556_v51  ;;  %v9566_v61 = vld [vmem:[#allocation52_spill] sm:$0xff]  ;;  %v9567_v51 = vld [vmem:[#allocation47_spill] sm:$0xff] }
 0x54e   : > { %5250 = vmatpush1.bf16.msra.mxu0 %v9557_v30  ;;  %5314 = vmatpush1.bf16.msra.mxu1 %v9558_v3  ;;  %v9568_v30 = vld [vmem:[#allocation53_spill] sm:$0xff]  ;;  %v9569_v3 = vld [vmem:[#allocation50_spill] sm:$0xff] }
 0x54f   : > { %5252 = vmatprep.subr.bf16.mxu0 %v9559_v59  ;;  %5316 = vmatprep.subr.bf16.mxu1 %v9560_v38  ;;  %v9570_v59 = vld [vmem:[#allocation56_spill] sm:$0xff]  ;;  %v9571_v38 = vld [vmem:[#allocation51_spill] sm:$0xff] }
 0x552   : > { %5254 = vmatpush1.bf16.msra.mxu0 %v9561_v19  ;;  %5318 = vmatpush1.bf16.msra.mxu1 %v9562_v28  ;;  %v9572_v19 = vld [vmem:[#allocation57_spill] sm:$0xff]  ;;  %v9573_v28 = vld [vmem:[#allocation54_spill] sm:$0xff] }
 0x553   : > { %5256 = vmatprep.subr.bf16.mxu0 %v9563_v50  ;;  %5320 = vmatprep.subr.bf16.mxu1 %v9564_v45  ;;  %v9574_v50 = vld [vmem:[#allocation60_spill] sm:$0xff]  ;;  %v9575_v45 = vld [vmem:[#allocation55_spill] sm:$0xff] }
 0x556   : > { %5258 = vmatpush1.bf16.msra.mxu0 %v9565_v16  ;;  %5322 = vmatpush1.bf16.msra.mxu1 %v9566_v61  ;;  %v9576_v16 = vld [vmem:[#allocation61_spill] sm:$0xff]  ;;  %v9577_v61 = vld [vmem:[#allocation58_spill] sm:$0xff] }
 0x557   : > { %5260 = vmatprep.subr.bf16.mxu0 %v9567_v51  ;;  %5324 = vmatprep.subr.bf16.mxu1 %v9568_v30  ;;  %v9578_v51 = vld [vmem:[#allocation64_spill] sm:$0xff]  ;;  %v9579_v30 = vld [vmem:[#allocation59_spill] sm:$0xff] }
 0x55a   : > { %5262 = vmatpush1.bf16.msra.mxu0 %v9569_v3  ;;  %5326 = vmatpush1.bf16.msra.mxu1 %v9570_v59  ;;  %v9580_v3 = vld [vmem:[#allocation65_spill] sm:$0xff]  ;;  %v9581_v59 = vld [vmem:[#allocation62_spill] sm:$0xff] }
 0x55b   : > { %5264 = vmatprep.subr.bf16.mxu0 %v9571_v38  ;;  %5328 = vmatprep.subr.bf16.mxu1 %v9572_v19  ;;  %v9582_v38 = vld [vmem:[#allocation68_spill] sm:$0xff]  ;;  %v9583_v19 = vld [vmem:[#allocation63_spill] sm:$0xff] }
 0x55e   : > { %5266 = vmatpush1.bf16.msra.mxu0 %v9573_v28  ;;  %5330 = vmatpush1.bf16.msra.mxu1 %v9574_v50  ;;  %v9584_v28 = vld [vmem:[#allocation69_spill] sm:$0xff]  ;;  %v9585_v50 = vld [vmem:[#allocation66_spill] sm:$0xff] }
 0x55f   : > { %5268 = vmatprep.subr.bf16.mxu0 %v9575_v45  ;;  %5332 = vmatprep.subr.bf16.mxu1 %v9576_v16  ;;  %v9586_v45 = vld [vmem:[#allocation72_spill] sm:$0xff]  ;;  %v9587_v16 = vld [vmem:[#allocation67_spill] sm:$0xff] }
 0x562   : > { %5270 = vmatpush1.bf16.msra.mxu0 %v9577_v61  ;;  %5334 = vmatpush1.bf16.msra.mxu1 %v9578_v51  ;;  %v9588_v61 = vld [vmem:[#allocation73_spill] sm:$0xff]  ;;  %v9589_v51 = vld [vmem:[#allocation70_spill] sm:$0xff] }
 0x563   : > { %5272 = vmatprep.subr.bf16.mxu0 %v9579_v30  ;;  %5336 = vmatprep.subr.bf16.mxu1 %v9580_v3  ;;  %v9590_v30 = vld [vmem:[#allocation75_spill] sm:$0xff] }
 0x564   : > { %v9591_v3 = vld [vmem:[#allocation71_spill] sm:$0xff] }
 0x566   : > { %5274 = vmatpush1.bf16.msra.mxu0 %v9581_v59  ;;  %5338 = vmatpush1.bf16.msra.mxu1 %v9582_v38  ;;  %v9592_v59 = vld [vmem:[#allocation76_spill] sm:$0xff]  ;;  %v9593_v38 = vld [vmem:[#allocation74_spill] sm:$0xff] }
 0x567   : > { %5276 = vmatprep.subr.bf16.mxu0 %v9583_v19  ;;  %5340 = vmatprep.subr.bf16.mxu1 %v9584_v28  ;;  %v9594_v19 = vld [vmem:[#allocation77_spill] sm:$0xff]  ;;  %v9595_v28 = vld [vmem:[#allocation78_spill] sm:$0xff] }
 0x56a   : > { %5278 = vmatpush1.bf16.msra.mxu0 %v9585_v50  ;;  %5342 = vmatpush1.bf16.msra.mxu1 %v9586_v45  ;;  %v9596_v50 = vld [vmem:[#allocation79_spill] sm:$0xff] }
 0x56b   : > { %5280 = vmatprep.subr.bf16.mxu0 %v9587_v16  ;;  %5344 = vmatprep.subr.bf16.mxu1 %v9588_v61 }
 0x56e   : > { %5282 = vmatpush1.bf16.msra.mxu0 %v9589_v51  ;;  %5346 = vmatpush1.bf16.msra.mxu1 %v9590_v30 }
 0x56f   : > { %5284 = vmatprep.subr.bf16.mxu0 %v9591_v3  ;;  %5348 = vmatprep.subr.bf16.mxu1 %v9592_v59 }
 0x572   : > { %5286 = vmatpush1.bf16.msra.mxu0 %v9593_v38  ;;  %5350 = vmatpush1.bf16.msra.mxu1 %v9594_v19 }
 0x573   : > { %5352 = vmatprep.subr.bf16.mxu0 %v9595_v28  ;;  %5416 = vmatprep.subr.bf16.mxu1 %v9596_v50 }
 0x5c8   : > { %v1971_v45 = vpop.f32.mrb[14].mxu0  ;;  %v2042_v16 = vpop.f32.mrb[14].mxu1 }
 0x5c9   : > { %v1972_v61 = vadd.f32 %v1971_v45, %v9597_v39  ;;  %v1973_v57 = vpop.f32.mrb[15].mxu0  ;;  %v2044_v51 = vpop.f32.mrb[15].mxu1  ;;  %v2043_v38 = vadd.f32 %v2042_v16, %v9415_v48  ;;  %v9603_v16 = vld [vmem:[#allocation92_spill] sm:$0xff] }
 0x5ca   : > { %v1974_v30 = vadd.f32 %v1973_v57, %v9507_v0  ;;  %v2045_v19 = vadd.f32 %v2044_v51, %v9416_v29 }
 0x5cb   : > { %v3936_v35 = vmul.f32 -1.442695, %v1972_v61  ;;  %v3938_v59 = vmul.f32 -1.442695, %v2043_v38 }
 0x5cc   : > { %v3937_v3 = vmul.f32 -1.442695, %v1974_v30 }
 0x5cd   : > { %6346 = vpow2.f32 %v3936_v35 }
 0x5ce   : > { %6348 = vpow2.f32 %v3937_v3 }
 0x5cf   : > { %6350 = vpow2.f32 %v3938_v59 }
 0x5d0   : > { %6352 = vtanh.f32 %v2045_v19  ;;  %v2239_v19 = vld [vmem:[#allocation2 + $0x28] sm:$0xff] }
 0x5d7   : > { %v6347_v28 = vpop.eup %6346 }
 0x5d8   : > { %v6349_v50 = vpop.eup %6348  ;;  %v2056_v54 = vadd.f32 1.0, %v6347_v28 }
 0x5d9   : > { %v2057_v26 = vadd.f32 1.0, %v6349_v50  ;;  %v6351_v45 = vpop.eup %6350  ;;  %v9602_v50 = vld [vmem:[#allocation91_spill] sm:$0xff] }
 0x5da   : > { %6354 = vrcp.f32 %v2056_v54  ;;  %v6353_v39 = vpop.eup %6352  ;;  %v2058_v61 = vadd.f32 1.0, %v6351_v45  ;;  %v9600_v54 = vld [vmem:[#allocation89_spill] sm:$0xff] }
 0x5db   : > { %6356 = vrcp.f32 %v2057_v26  ;;  %v9598_v26 = vld [vmem:[#allocation87_spill] sm:$0xff]  ;;  %v9604_v45 = vld [vmem:[#allocation93_spill] sm:$0xff] }
 0x5dc   : > { %6358 = vrcp.f32 %v2058_v61  ;;  %v9606_v61 = vld [vmem:[#allocation95_spill] sm:$0xff] }
 0x5e4   : > { %v6355_v57 = vpop.eup %6354 }
 0x5e5   : > { %v6357_v30 = vpop.eup %6356  ;;  %v2067_v35 = vmul.f32 %v6355_v57, %v6353_v39  ;;  %v9599_v39 = vld [vmem:[#allocation88_spill] sm:$0xff]  ;;  %v9605_v57 = vld [vmem:[#allocation94_spill] sm:$0xff] }
 0x5e6   : > { %v2066_v3 = vmul.f32 %v6357_v30, %v8093_v13  ;;  %v6359_v51 = vpop.eup %6358  ;;  %v9601_v13 = vld [vmem:[#allocation90_spill] sm:$0xff]  ;;  %v9607_v30 = vld [vmem:[#allocation96_spill] sm:$0xff] }
 0x5e8   : > { %v8243_v38 = vadd.f32 %v2067_v35, %v2066_v3  ;;  %v9608_v35 = vld [vmem:[#allocation97_spill] sm:$0xff]  ;;  %v9609_v3 = vld [vmem:[#allocation98_spill] sm:$0xff] }
 0x5ea   : > { %6360 = vtanh.f32 %v8243_v38 }
 0x5f4   : > { %v6361_v59 = vpop.eup %6360 }
 0x5f5   : > { %v8246_v28 = vmul.f32 %v6361_v59, %v6359_v51  ;;  %v9610_v51 = vld [vmem:[#allocation99_spill] sm:$0xff]  ;;  %v9611_v59 = vld [vmem:[#allocation100_spill] sm:$0xff] }
 0x5f7   : > { %2304 = vmatprep.mubr.f32.mxu0 %v8246_v28  ;;  %2375 = vmatprep.mubr.f32.mxu1 %v8246_v28 }
 0x5f8   : > { %2305 = vmatmul.mubr.f32.vlgmr.msra.gmra.mrb[18].mxu0 %v2239_v19  ;;  %2376 = vmatmul.mubr.f32.vlgmr.msra.gmra.mrb[18].mxu1 %v2239_v19  ;;  %v9612_v19 = vld [vmem:[#allocation101_spill] sm:$0xff] }
 0x5f9   : > { %5354 = vmatpush1.bf16.msra.mxu0 %v9508_v55  ;;  %5418 = vmatpush1.bf16.msra.mxu1 %v9598_v26 }
 0x5fa   : > { %5356 = vmatprep.subr.bf16.mxu0 %v9599_v39  ;;  %5420 = vmatprep.subr.bf16.mxu1 %v9600_v54 }
 0x5fd   : > { %5358 = vmatpush1.bf16.msra.mxu0 %v9601_v13  ;;  %5422 = vmatpush1.bf16.msra.mxu1 %v9602_v50  ;;  %v9613_v50 = vld [vmem:[#allocation102_spill] sm:$0xff] }
 0x5fe   : > { %5360 = vmatprep.subr.bf16.mxu0 %v9603_v16  ;;  %5424 = vmatprep.subr.bf16.mxu1 %v9604_v45  ;;  %v9614_v16 = vld [vmem:[#allocation103_spill] sm:$0xff]  ;;  %v9615_v45 = vld [vmem:[#allocation104_spill] sm:$0xff] }
 0x601   : > { %5362 = vmatpush1.bf16.msra.mxu0 %v9605_v57  ;;  %5426 = vmatpush1.bf16.msra.mxu1 %v9606_v61  ;;  %v9616_v57 = vld [vmem:[#allocation105_spill] sm:$0xff] }
 0x602   : > { %5364 = vmatprep.subr.bf16.mxu0 %v9607_v30  ;;  %5428 = vmatprep.subr.bf16.mxu1 %v9608_v35 }
 0x605   : > { %5366 = vmatpush1.bf16.msra.mxu0 %v9609_v3  ;;  %5430 = vmatpush1.bf16.msra.mxu1 %v9610_v51 }
 0x606   : > { %5368 = vmatprep.subr.bf16.mxu0 %v9611_v59  ;;  %5432 = vmatprep.subr.bf16.mxu1 %v9612_v19  ;;  %v9617_v59 = vld [vmem:[#allocation107_spill] sm:$0xff] }
 0x608   : > { %v2137_v61 = vpop.f32.mrb[16].mxu0  ;;  %v2208_v30 = vpop.f32.mrb[16].mxu1 }
 0x609   : > { %5370 = vmatpush1.bf16.msra.mxu0 %v9613_v50  ;;  %5434 = vmatpush1.bf16.msra.mxu1 %v9614_v16  ;;  %v2138_v35 = vadd.f32 %v2137_v61, %v9527_v9  ;;  %v2139_v13 = vpop.f32.mrb[17].mxu0  ;;  %v2210_v3 = vpop.f32.mrb[17].mxu1  ;;  %v9618_v50 = vld [vmem:[#allocation108_spill] sm:$0xff]  ;;  %v9620_v16 = vld [vmem:[#allocation111_spill] sm:$0xff]  ;;  %v9622_v9 = vld [vmem:[#allocation113_spill] sm:$0xff] }
 0x60a   : > { %5372 = vmatprep.subr.bf16.mxu0 %v9615_v45  ;;  %5436 = vmatprep.subr.bf16.mxu1 %v9616_v57  ;;  %v2140_v51 = vadd.f32 %v2139_v13, %v9438_v33  ;;  %v9619_v57 = vld [vmem:[#allocation110_spill] sm:$0xff]  ;;  %v9621_v61 = vld [vmem:[#allocation112_spill] sm:$0xff]  ;;  %v2209_v13 = vadd.f32 %v2208_v30, %v9535_v5 }
 0x60b   : > { %v3939_v19 = vmul.f32 -1.442695, %v2138_v35  ;;  %v9623_v33 = vld [vmem:[#allocation114_spill] sm:$0xff]  ;;  %v2211_v35 = vadd.f32 %v2210_v3, %v9536_v6  ;;  %v9625_v3 = vld [vmem:[#allocation125_spill] sm:$0xff] }
 0x60c   : > { %v3940_v45 = vmul.f32 -1.442695, %v2140_v51  ;;  %v3941_v51 = vmul.f32 -1.442695, %v2209_v13  ;;  %v9626_v13 = vld [vmem:[#allocation126_spill] sm:$0xff] }
 0x60d   : > { %5374 = vmatpush1.bf16.msra.mxu0 %v9528_v27  ;;  %5438 = vmatpush1.bf16.msra.mxu1 %v9617_v59  ;;  %6362 = vpow2.f32 %v3939_v19 }
 0x60e   : > { %5376 = vmatprep.subr.bf16.mxu0 %v9618_v50  ;;  %5440 = vmatprep.subr.bf16.mxu1 %v9531_v62  ;;  %6364 = vpow2.f32 %v3940_v45  ;;  %v9624_v45 = vld [vmem:[#allocation119_spill] sm:$0xff] }
 0x60f   : > { %6366 = vtanh.f32 %v2211_v35 }
 0x610   : > { %6368 = vpow2.f32 %v3941_v51  ;;  %v9628_v51 = vld [vmem:[#allocation130_spill] sm:$0xff] }
 0x611   : > { %5378 = vmatpush1.bf16.msra.mxu0 %v9619_v57  ;;  %5442 = vmatpush1.bf16.msra.mxu1 %v9620_v16 }
 0x612   : > { %5380 = vmatprep.subr.bf16.mxu0 %v9621_v61  ;;  %5444 = vmatprep.subr.bf16.mxu1 %v9622_v9 }
 0x615   : > { %5382 = vmatpush1.bf16.msra.mxu0 %v9623_v33  ;;  %5446 = vmatpush1.bf16.msra.mxu1 %v9448_v41 }
 0x616   : > { %5384 = vmatprep.subr.bf16.mxu0 %v9537_v20  ;;  %5448 = vmatprep.subr.bf16.mxu1 %v9538_v7 }
 0x617   : > { %v6363_v19 = vpop.eup %6362 }
 0x618   : > { %v2222_v30 = vadd.f32 1.0, %v6363_v19  ;;  %v6365_v33 = vpop.eup %6364 }
 0x619   : > { %5386 = vmatpush1.bf16.msra.mxu0 %v9451_v14  ;;  %5450 = vmatpush1.bf16.msra.mxu1 %v9624_v45  ;;  %v2223_v20 = vadd.f32 1.0, %v6365_v33  ;;  %v6367_v35 = vpop.eup %6366 }
 0x61a   : > { %5388 = vmatprep.subr.bf16.mxu0 %v9540_v24  ;;  %5452 = vmatprep.subr.bf16.mxu1 %v9541_v8  ;;  %6370 = vrcp.f32 %v2222_v30  ;;  %v9627_v24 = vld [vmem:[#allocation127_spill] sm:$0xff]  ;;  %v6369_v33 = vpop.eup %6368 }
 0x61b   : > { %6372 = vrcp.f32 %v2223_v20 }
 0x61d   : > { %5390 = vmatpush1.bf16.msra.mxu0 %v9455_v1  ;;  %5454 = vmatpush1.bf16.msra.mxu1 %v9456_v52 }
 0x61e   : > { %5392 = vmatprep.subr.bf16.mxu0 %v9457_v44  ;;  %5456 = vmatprep.subr.bf16.mxu1 %v9625_v3 }
 0x621   : > { %5394 = vmatpush1.bf16.msra.mxu0 %v9626_v13  ;;  %5458 = vmatpush1.bf16.msra.mxu1 %v9627_v24  ;;  %v2224_v13 = vadd.f32 1.0, %v6369_v33  ;;  %v9630_v33 = vld [vmem:[#allocation26_spill] sm:$0xff] }
 0x622   : > { %5396 = vmatprep.subr.bf16.mxu0 %v9461_v36  ;;  %5460 = vmatprep.subr.bf16.mxu1 %v9545_v15 }
 0x623   : > { %6374 = vrcp.f32 %v2224_v13 }
 0x624   : > { %v6371_v19 = vpop.eup %6370 }
 0x625   : > { %5398 = vmatpush1.bf16.msra.mxu0 %v9628_v51  ;;  %5462 = vmatpush1.bf16.msra.mxu1 %v9375_v60  ;;  %v2233_v20 = vmul.f32 %v6371_v19, %v6367_v35  ;;  %v6373_v30 = vpop.eup %6372  ;;  %v9629_v35 = vld [vmem:[#allocation18_spill] sm:$0xff]  ;;  %v9631_v19 = vld [vmem:[#allocation21_spill] sm:$0xff] }
 0x626   : > { %5400 = vmatprep.subr.bf16.mxu0 %v9376_v47  ;;  %5464 = vmatprep.subr.bf16.mxu1 %v9377_v21  ;;  %v2232_v15 = vmul.f32 %v6373_v30, %v8157_v56  ;;  %v9634_v30 = vld [vmem:[#allocation29_spill] sm:$0xff] }
 0x628   : > { %v8307_v60 = vadd.f32 %v2233_v20, %v2232_v15  ;;  %v9632_v20 = vld [vmem:[#allocation28_spill] sm:$0xff] }
 0x629   : > { %5402 = vmatpush1.bf16.msra.mxu0 %v9378_v2  ;;  %5466 = vmatpush1.bf16.msra.mxu1 %v9379_v40 }
 0x62a   : > { %5404 = vmatprep.subr.bf16.mxu0 %v9380_v49  ;;  %5468 = vmatprep.subr.bf16.mxu1 %v9381_v43  ;;  %6376 = vtanh.f32 %v8307_v60 }
 0x62d   : > { %5406 = vmatpush1.bf16.msra.mxu0 %v7660_v58  ;;  %5470 = vmatpush1.bf16.msra.mxu1 %v7662_v63  ;;  %v6375_v56 = vpop.eup %6374 }
 0x62e   : > { %5408 = vmatprep.subr.bf16.mxu0 %v7668_v37  ;;  %5472 = vmatprep.subr.bf16.mxu1 %v7670_v4 }
 0x631   : > { %5410 = vmatpush1.bf16.msra.mxu0 %v7680_v32  ;;  %5474 = vmatpush1.bf16.msra.mxu1 %v7682_v22 }
 0x632   : > { %5412 = vmatprep.subr.bf16.mxu0 %v7687_v53  ;;  %5476 = vmatprep.subr.bf16.mxu1 %v7689_v10 }
 0x634   : > { %v6377_v15 = vpop.eup %6376 }
 0x635   : > { %5414 = vmatpush1.bf16.msra.mxu0 %v7696_v25  ;;  %5478 = vmatpush1.bf16.msra.mxu1 %v7698_v11  ;;  %v2236_v13 = vmul.f32 %v6377_v15, %v6375_v56  ;;  %v9635_v56 = vld [vmem:[#allocation25_spill] sm:$0xff]  ;;  %v9636_v15 = vld [vmem:[#allocation32_spill] sm:$0xff] }
 0x636   : > { %5480 = vmatprep.subr.bf16.mxu0 %v6965_v12  ;;  %5544 = vmatprep.subr.bf16.mxu1 %v6993_v31 }
 0x637   : > { %2237 = vst [vmem:[#allocation2 + $0x18] sm:$0xff] %v2236_v13  ;;  %2470 = vmatprep.mubr.f32.mxu0 %v2236_v13  ;;  %2541 = vmatprep.mubr.f32.mxu1 %v2236_v13  ;;  %v9637_v13 = vld [vmem:[#allocation27_spill] sm:$0xff] }
 0x638   : > { %2471 = vmatmul.mubr.f32.vlgmr.msra.gmra.mrb[20].mxu0 %v8246_v28  ;;  %2542 = vmatmul.mubr.f32.vlgmr.msra.gmra.mrb[20].mxu1 %v8246_v28  ;;  %v9633_v28 = vld [vmem:[#allocation22_spill] sm:$0xff] }
 0x639   : > { %5482 = vmatpush1.bf16.msra.mxu0 %v6972_v17  ;;  %5546 = vmatpush1.bf16.msra.mxu1 %v6997_v34 }
 0x63a   : > { %5484 = vmatprep.subr.bf16.mxu0 %v6974_v18  ;;  %5548 = vmatprep.subr.bf16.mxu1 %v7012_v42  ;;  %v9687_v42 = vld [vmem:[#allocation81_spill] sm:$0xff] }
 0x63d   : > { %5486 = vmatpush1.bf16.msra.mxu0 %v6982_v23  ;;  %5550 = vmatpush1.bf16.msra.mxu1 %v7017_v46  ;;  %v9638_v23 = vld [vmem:[#allocation33_spill] sm:$0xff]  ;;  %v9639_v46 = vld [vmem:[#allocation30_spill] sm:$0xff] }
 0x63e   : > { %5488 = vmatprep.subr.bf16.mxu0 %v9629_v35  ;;  %5552 = vmatprep.subr.bf16.mxu1 %v9630_v33  ;;  %v9640_v35 = vld [vmem:[#allocation36_spill] sm:$0xff]  ;;  %v9641_v33 = vld [vmem:[#allocation31_spill] sm:$0xff] }
 0x641   : > { %5490 = vmatpush1.bf16.msra.mxu0 %v9631_v19  ;;  %5554 = vmatpush1.bf16.msra.mxu1 %v9632_v20  ;;  %v9642_v19 = vld [vmem:[#allocation37_spill] sm:$0xff]  ;;  %v9643_v20 = vld [vmem:[#allocation34_spill] sm:$0xff] }
 0x642   : > { %5492 = vmatprep.subr.bf16.mxu0 %v9633_v28  ;;  %5556 = vmatprep.subr.bf16.mxu1 %v9634_v30  ;;  %v9644_v28 = vld [vmem:[#allocation40_spill] sm:$0xff]  ;;  %v9645_v30 = vld [vmem:[#allocation35_spill] sm:$0xff] }
 0x645   : > { %5494 = vmatpush1.bf16.msra.mxu0 %v9635_v56  ;;  %5558 = vmatpush1.bf16.msra.mxu1 %v9636_v15  ;;  %v9646_v56 = vld [vmem:[#allocation41_spill] sm:$0xff]  ;;  %v9647_v15 = vld [vmem:[#allocation38_spill] sm:$0xff] }
 0x646   : > { %5496 = vmatprep.subr.bf16.mxu0 %v9637_v13  ;;  %5560 = vmatprep.subr.bf16.mxu1 %v9638_v23  ;;  %v9648_v13 = vld [vmem:[#allocation44_spill] sm:$0xff]  ;;  %v9649_v23 = vld [vmem:[#allocation39_spill] sm:$0xff] }
 0x649   : > { %5498 = vmatpush1.bf16.msra.mxu0 %v9639_v46  ;;  %5562 = vmatpush1.bf16.msra.mxu1 %v9640_v35  ;;  %v9650_v46 = vld [vmem:[#allocation45_spill] sm:$0xff]  ;;  %v9651_v35 = vld [vmem:[#allocation42_spill] sm:$0xff] }
 0x64a   : > { %5500 = vmatprep.subr.bf16.mxu0 %v9641_v33  ;;  %5564 = vmatprep.subr.bf16.mxu1 %v9642_v19  ;;  %v9652_v33 = vld [vmem:[#allocation48_spill] sm:$0xff]  ;;  %v9653_v19 = vld [vmem:[#allocation43_spill] sm:$0xff] }
 0x64d   : > { %5502 = vmatpush1.bf16.msra.mxu0 %v9643_v20  ;;  %5566 = vmatpush1.bf16.msra.mxu1 %v9644_v28  ;;  %v9654_v20 = vld [vmem:[#allocation49_spill] sm:$0xff]  ;;  %v9655_v28 = vld [vmem:[#allocation46_spill] sm:$0xff] }
 0x64e   : > { %5504 = vmatprep.subr.bf16.mxu0 %v9645_v30  ;;  %5568 = vmatprep.subr.bf16.mxu1 %v9646_v56  ;;  %v9656_v30 = vld [vmem:[#allocation52_spill] sm:$0xff]  ;;  %v9657_v56 = vld [vmem:[#allocation47_spill] sm:$0xff] }
 0x651   : > { %5506 = vmatpush1.bf16.msra.mxu0 %v9647_v15  ;;  %5570 = vmatpush1.bf16.msra.mxu1 %v9648_v13  ;;  %v9658_v15 = vld [vmem:[#allocation53_spill] sm:$0xff]  ;;  %v9659_v13 = vld [vmem:[#allocation50_spill] sm:$0xff] }
 0x652   : > { %5508 = vmatprep.subr.bf16.mxu0 %v9649_v23  ;;  %5572 = vmatprep.subr.bf16.mxu1 %v9650_v46  ;;  %v9660_v23 = vld [vmem:[#allocation56_spill] sm:$0xff]  ;;  %v9661_v46 = vld [vmem:[#allocation51_spill] sm:$0xff] }
 0x655   : > { %5510 = vmatpush1.bf16.msra.mxu0 %v9651_v35  ;;  %5574 = vmatpush1.bf16.msra.mxu1 %v9652_v33  ;;  %v9662_v35 = vld [vmem:[#allocation57_spill] sm:$0xff]  ;;  %v9663_v33 = vld [vmem:[#allocation54_spill] sm:$0xff] }
 0x656   : > { %5512 = vmatprep.subr.bf16.mxu0 %v9653_v19  ;;  %5576 = vmatprep.subr.bf16.mxu1 %v9654_v20  ;;  %v9664_v19 = vld [vmem:[#allocation60_spill] sm:$0xff]  ;;  %v9665_v20 = vld [vmem:[#allocation55_spill] sm:$0xff] }
 0x659   : > { %5514 = vmatpush1.bf16.msra.mxu0 %v9655_v28  ;;  %5578 = vmatpush1.bf16.msra.mxu1 %v9656_v30  ;;  %v9666_v28 = vld [vmem:[#allocation61_spill] sm:$0xff]  ;;  %v9667_v30 = vld [vmem:[#allocation58_spill] sm:$0xff] }
 0x65a   : > { %5516 = vmatprep.subr.bf16.mxu0 %v9657_v56  ;;  %5580 = vmatprep.subr.bf16.mxu1 %v9658_v15  ;;  %v9668_v56 = vld [vmem:[#allocation64_spill] sm:$0xff]  ;;  %v9669_v15 = vld [vmem:[#allocation59_spill] sm:$0xff] }
 0x65d   : > { %5518 = vmatpush1.bf16.msra.mxu0 %v9659_v13  ;;  %5582 = vmatpush1.bf16.msra.mxu1 %v9660_v23  ;;  %v9670_v13 = vld [vmem:[#allocation65_spill] sm:$0xff]  ;;  %v9671_v23 = vld [vmem:[#allocation62_spill] sm:$0xff] }
 0x65e   : > { %5520 = vmatprep.subr.bf16.mxu0 %v9661_v46  ;;  %5584 = vmatprep.subr.bf16.mxu1 %v9662_v35  ;;  %v9672_v46 = vld [vmem:[#allocation68_spill] sm:$0xff]  ;;  %v9673_v35 = vld [vmem:[#allocation63_spill] sm:$0xff] }
 0x661   : > { %5522 = vmatpush1.bf16.msra.mxu0 %v9663_v33  ;;  %5586 = vmatpush1.bf16.msra.mxu1 %v9664_v19  ;;  %v9674_v33 = vld [vmem:[#allocation69_spill] sm:$0xff]  ;;  %v9675_v19 = vld [vmem:[#allocation66_spill] sm:$0xff] }
 0x662   : > { %5524 = vmatprep.subr.bf16.mxu0 %v9665_v20  ;;  %5588 = vmatprep.subr.bf16.mxu1 %v9666_v28  ;;  %v9676_v20 = vld [vmem:[#allocation72_spill] sm:$0xff]  ;;  %v9677_v28 = vld [vmem:[#allocation67_spill] sm:$0xff] }
 0x665   : > { %5526 = vmatpush1.bf16.msra.mxu0 %v9667_v30  ;;  %5590 = vmatpush1.bf16.msra.mxu1 %v9668_v56  ;;  %v9678_v30 = vld [vmem:[#allocation73_spill] sm:$0xff]  ;;  %v9679_v56 = vld [vmem:[#allocation70_spill] sm:$0xff] }
 0x666   : > { %5528 = vmatprep.subr.bf16.mxu0 %v9669_v15  ;;  %5592 = vmatprep.subr.bf16.mxu1 %v9670_v13  ;;  %v9680_v15 = vld [vmem:[#allocation75_spill] sm:$0xff] }
 0x667   : > { %v9681_v13 = vld [vmem:[#allocation71_spill] sm:$0xff] }
 0x669   : > { %5530 = vmatpush1.bf16.msra.mxu0 %v9671_v23  ;;  %5594 = vmatpush1.bf16.msra.mxu1 %v9672_v46  ;;  %v9682_v23 = vld [vmem:[#allocation76_spill] sm:$0xff]  ;;  %v9683_v46 = vld [vmem:[#allocation74_spill] sm:$0xff] }
 0x66a   : > { %5532 = vmatprep.subr.bf16.mxu0 %v9673_v35  ;;  %5596 = vmatprep.subr.bf16.mxu1 %v9674_v33  ;;  %v9684_v35 = vld [vmem:[#allocation77_spill] sm:$0xff]  ;;  %v9685_v33 = vld [vmem:[#allocation78_spill] sm:$0xff] }
 0x66d   : > { %5534 = vmatpush1.bf16.msra.mxu0 %v9675_v19  ;;  %5598 = vmatpush1.bf16.msra.mxu1 %v9676_v20  ;;  %v9686_v19 = vld [vmem:[#allocation79_spill] sm:$0xff] }
 0x66e   : > { %5536 = vmatprep.subr.bf16.mxu0 %v9677_v28  ;;  %5600 = vmatprep.subr.bf16.mxu1 %v9678_v30 }
 0x671   : > { %5538 = vmatpush1.bf16.msra.mxu0 %v9679_v56  ;;  %5602 = vmatpush1.bf16.msra.mxu1 %v9680_v15 }
 0x672   : > { %5540 = vmatprep.subr.bf16.mxu0 %v9681_v13  ;;  %5604 = vmatprep.subr.bf16.mxu1 %v9682_v23 }
 0x675   : > { %5542 = vmatpush1.bf16.msra.mxu0 %v9683_v46  ;;  %5606 = vmatpush1.bf16.msra.mxu1 %v9684_v35 }
 0x676   : > { %5608 = vmatprep.subr.bf16.mxu0 %v9685_v33  ;;  %5672 = vmatprep.subr.bf16.mxu1 %v9686_v19 }
 0x6cb   : > { %v2306_v20 = vpop.f32.mrb[18].mxu0  ;;  %v2377_v28 = vpop.f32.mrb[18].mxu1 }
 0x6cc   : > { %v2307_v30 = vadd.f32 %v2306_v20, %v9687_v42  ;;  %v2308_v18 = vpop.f32.mrb[19].mxu0  ;;  %v2379_v56 = vpop.f32.mrb[19].mxu1  ;;  %v2378_v46 = vadd.f32 %v2377_v28, %v9415_v48 }
 0x6cd   : > { %v2309_v15 = vadd.f32 %v2308_v18, %v9507_v0  ;;  %v2380_v35 = vadd.f32 %v2379_v56, %v9416_v29  ;;  %v9693_v56 = vld [vmem:[#allocation95_spill] sm:$0xff] }
 0x6ce   : > { %v3942_v34 = vmul.f32 -1.442695, %v2307_v30  ;;  %v3944_v23 = vmul.f32 -1.442695, %v2378_v46 }
 0x6cf   : > { %v3943_v13 = vmul.f32 -1.442695, %v2309_v15 }
 0x6d0   : > { %6378 = vpow2.f32 %v3942_v34 }
 0x6d1   : > { %6380 = vpow2.f32 %v3943_v13 }
 0x6d2   : > { %6382 = vpow2.f32 %v3944_v23 }
 0x6d3   : > { %6384 = vtanh.f32 %v2380_v35  ;;  %v2574_v35 = vld [vmem:[#allocation2 + $0x30] sm:$0xff] }
 0x6da   : > { %v6379_v33 = vpop.eup %6378 }
 0x6db   : > { %v6381_v19 = vpop.eup %6380  ;;  %v2391_v17 = vadd.f32 1.0, %v6379_v33 }
 0x6dc   : > { %v2392_v31 = vadd.f32 1.0, %v6381_v19  ;;  %v6383_v20 = vpop.eup %6382  ;;  %v9692_v19 = vld [vmem:[#allocation94_spill] sm:$0xff] }
 0x6dd   : > { %6386 = vrcp.f32 %v2391_v17  ;;  %v6385_v42 = vpop.eup %6384  ;;  %v2393_v30 = vadd.f32 1.0, %v6383_v20  ;;  %v9688_v17 = vld [vmem:[#allocation90_spill] sm:$0xff]  ;;  %v9694_v20 = vld [vmem:[#allocation96_spill] sm:$0xff] }
 0x6de   : > { %6388 = vrcp.f32 %v2392_v31  ;;  %v9689_v31 = vld [vmem:[#allocation91_spill] sm:$0xff] }
 0x6df   : > { %6390 = vrcp.f32 %v2393_v30  ;;  %v9696_v30 = vld [vmem:[#allocation98_spill] sm:$0xff] }
 0x6e7   : > { %v6387_v18 = vpop.eup %6386 }
 0x6e8   : > { %v6389_v15 = vpop.eup %6388  ;;  %v2402_v34 = vmul.f32 %v6387_v18, %v6385_v42  ;;  %v9690_v42 = vld [vmem:[#allocation92_spill] sm:$0xff]  ;;  %v9695_v18 = vld [vmem:[#allocation97_spill] sm:$0xff] }
 0x6e9   : > { %v2401_v13 = vmul.f32 %v6389_v15, %v8243_v38  ;;  %v6391_v23 = vpop.eup %6390  ;;  %v9691_v38 = vld [vmem:[#allocation93_spill] sm:$0xff]  ;;  %v9697_v15 = vld [vmem:[#allocation99_spill] sm:$0xff] }
 0x6eb   : > { %v8393_v46 = vadd.f32 %v2402_v34, %v2401_v13  ;;  %v9698_v34 = vld [vmem:[#allocation100_spill] sm:$0xff]  ;;  %v9699_v13 = vld [vmem:[#allocation101_spill] sm:$0xff] }
 0x6ed   : > { %6392 = vtanh.f32 %v8393_v46 }
 0x6f7   : > { %v6393_v28 = vpop.eup %6392 }
 0x6f8   : > { %v8396_v33 = vmul.f32 %v6393_v28, %v6391_v23  ;;  %v9700_v23 = vld [vmem:[#allocation102_spill] sm:$0xff]  ;;  %v9701_v28 = vld [vmem:[#allocation103_spill] sm:$0xff] }
 0x6fa   : > { %2639 = vmatprep.mubr.f32.mxu0 %v8396_v33  ;;  %2710 = vmatprep.mubr.f32.mxu1 %v8396_v33 }
 0x6fb   : > { %2640 = vmatmul.mubr.f32.vlgmr.msra.gmra.mrb[22].mxu0 %v2574_v35  ;;  %2711 = vmatmul.mubr.f32.vlgmr.msra.gmra.mrb[22].mxu1 %v2574_v35  ;;  %v9702_v35 = vld [vmem:[#allocation104_spill] sm:$0xff] }
 0x6fc   : > { %5610 = vmatpush1.bf16.msra.mxu0 %v9508_v55  ;;  %5674 = vmatpush1.bf16.msra.mxu1 %v9598_v26 }
 0x6fd   : > { %5612 = vmatprep.subr.bf16.mxu0 %v9599_v39  ;;  %5676 = vmatprep.subr.bf16.mxu1 %v9600_v54 }
 0x700   : > { %5614 = vmatpush1.bf16.msra.mxu0 %v9688_v17  ;;  %5678 = vmatpush1.bf16.msra.mxu1 %v9689_v31 }
 0x701   : > { %5616 = vmatprep.subr.bf16.mxu0 %v9690_v42  ;;  %5680 = vmatprep.subr.bf16.mxu1 %v9691_v38  ;;  %v9704_v38 = vld [vmem:[#allocation80_spill] sm:$0xff] }
 0x704   : > { %5618 = vmatpush1.bf16.msra.mxu0 %v9692_v19  ;;  %5682 = vmatpush1.bf16.msra.mxu1 %v9693_v56  ;;  %v9703_v19 = vld [vmem:[#allocation105_spill] sm:$0xff] }
 0x705   : > { %5620 = vmatprep.subr.bf16.mxu0 %v9694_v20  ;;  %5684 = vmatprep.subr.bf16.mxu1 %v9695_v18 }
 0x708   : > { %5622 = vmatpush1.bf16.msra.mxu0 %v9696_v30  ;;  %5686 = vmatpush1.bf16.msra.mxu1 %v9697_v15 }
 0x709   : > { %5624 = vmatprep.subr.bf16.mxu0 %v9698_v34  ;;  %5688 = vmatprep.subr.bf16.mxu1 %v9699_v13  ;;  %v9705_v34 = vld [vmem:[#allocation147_spill] sm:$0xff] }
 0x70b   : > { %v2472_v56 = vpop.f32.mrb[20].mxu0  ;;  %v2543_v20 = vpop.f32.mrb[20].mxu1 }
 0x70c   : > { %5626 = vmatpush1.bf16.msra.mxu0 %v9700_v23  ;;  %5690 = vmatpush1.bf16.msra.mxu1 %v9701_v28  ;;  %v2473_v18 = vadd.f32 %v2472_v56, %v9704_v38  ;;  %v2474_v42 = vpop.f32.mrb[21].mxu0  ;;  %v2545_v30 = vpop.f32.mrb[21].mxu1  ;;  %v2544_v56 = vadd.f32 %v2543_v20, %v9535_v5  ;;  %v9706_v38 = vld [vmem:[#allocation114_spill] sm:$0xff] }
 0x70d   : > { %5628 = vmatprep.subr.bf16.mxu0 %v9702_v35  ;;  %5692 = vmatprep.subr.bf16.mxu1 %v9703_v19  ;;  %v2475_v13 = vadd.f32 %v2474_v42, %v9705_v34  ;;  %v9707_v42 = vld [vmem:[#allocation116_spill] sm:$0xff] }
 0x70e   : > { %v3945_v28 = vmul.f32 -1.442695, %v2473_v18  ;;  %v2546_v18 = vadd.f32 %v2545_v30, %v9536_v6 }
 0x70f   : > { %v3946_v35 = vmul.f32 -1.442695, %v2475_v13  ;;  %v3947_v13 = vmul.f32 -1.442695, %v2544_v56  ;;  %v9709_v56 = vld [vmem:[#allocation126_spill] sm:$0xff] }
 0x710   : > { %5630 = vmatpush1.bf16.msra.mxu0 %v9528_v27  ;;  %5694 = vmatpush1.bf16.msra.mxu1 %v9617_v59  ;;  %6394 = vpow2.f32 %v3945_v28  ;;  %v9708_v28 = vld [vmem:[#allocation120_spill] sm:$0xff] }
 0x711   : > { %5632 = vmatprep.subr.bf16.mxu0 %v9618_v50  ;;  %5696 = vmatprep.subr.bf16.mxu1 %v9531_v62  ;;  %6396 = vpow2.f32 %v3946_v35 }
 0x712   : > { %6398 = vtanh.f32 %v2546_v18  ;;  %v9710_v18 = vld [vmem:[#allocation129_spill] sm:$0xff] }
 0x713   : > { %6400 = vpow2.f32 %v3947_v13  ;;  %v9711_v13 = vld [vmem:[#allocation131_spill] sm:$0xff] }
 0x714   : > { %5634 = vmatpush1.bf16.msra.mxu0 %v9619_v57  ;;  %5698 = vmatpush1.bf16.msra.mxu1 %v9620_v16 }
 0x715   : > { %5636 = vmatprep.subr.bf16.mxu0 %v9621_v61  ;;  %5700 = vmatprep.subr.bf16.mxu1 %v9622_v9 }
 0x718   : > { %5638 = vmatpush1.bf16.msra.mxu0 %v9706_v38  ;;  %5702 = vmatpush1.bf16.msra.mxu1 %v9448_v41 }
 0x719   : > { %5640 = vmatprep.subr.bf16.mxu0 %v9707_v42  ;;  %5704 = vmatprep.subr.bf16.mxu1 %v9538_v7 }
 0x71a   : > { %v6395_v20 = vpop.eup %6394 }
 0x71b   : > { %v2557_v35 = vadd.f32 1.0, %v6395_v20  ;;  %v6397_v5 = vpop.eup %6396 }
 0x71c   : > { %5642 = vmatpush1.bf16.msra.mxu0 %v9451_v14  ;;  %5706 = vmatpush1.bf16.msra.mxu1 %v9624_v45  ;;  %v2558_v30 = vadd.f32 1.0, %v6397_v5  ;;  %v6399_v20 = vpop.eup %6398 }
 0x71d   : > { %5644 = vmatprep.subr.bf16.mxu0 %v9708_v28  ;;  %5708 = vmatprep.subr.bf16.mxu1 %v9541_v8  ;;  %6402 = vrcp.f32 %v2557_v35  ;;  %v6401_v5 = vpop.eup %6400 }
 0x71e   : > { %6404 = vrcp.f32 %v2558_v30 }
 0x720   : > { %5646 = vmatpush1.bf16.msra.mxu0 %v9455_v1  ;;  %5710 = vmatpush1.bf16.msra.mxu1 %v9456_v52 }
 0x721   : > { %5648 = vmatprep.subr.bf16.mxu0 %v9457_v44  ;;  %5712 = vmatprep.subr.bf16.mxu1 %v9625_v3 }
 0x724   : > { %5650 = vmatpush1.bf16.msra.mxu0 %v9709_v56  ;;  %5714 = vmatpush1.bf16.msra.mxu1 %v9627_v24 }
 0x725   : > { %5652 = vmatprep.subr.bf16.mxu0 %v9461_v36  ;;  %5716 = vmatprep.subr.bf16.mxu1 %v9710_v18  ;;  %v2559_v36 = vadd.f32 1.0, %v6401_v5  ;;  %v9714_v5 = vld [vmem:[#allocation20_spill] sm:$0xff] }
 0x727   : > { %v6403_v35 = vpop.eup %6402  ;;  %6406 = vrcp.f32 %v2559_v36 }
 0x728   : > { %5654 = vmatpush1.bf16.msra.mxu0 %v9628_v51  ;;  %5718 = vmatpush1.bf16.msra.mxu1 %v9711_v13  ;;  %v2568_v30 = vmul.f32 %v6403_v35, %v6399_v20  ;;  %v6405_v24 = vpop.eup %6404  ;;  %v9713_v20 = vld [vmem:[#allocation15_spill] sm:$0xff]  ;;  %v9715_v35 = vld [vmem:[#allocation16_spill] sm:$0xff] }
 0x729   : > { %5656 = vmatprep.subr.bf16.mxu0 %v9376_v47  ;;  %5720 = vmatprep.subr.bf16.mxu1 %v9377_v21  ;;  %v2567_v13 = vmul.f32 %v6405_v24, %v8307_v60  ;;  %v9712_v60 = vld [vmem:[#allocation19_spill] sm:$0xff] }
 0x72b   : > { %v8457_v51 = vadd.f32 %v2568_v30, %v2567_v13  ;;  %v9716_v30 = vld [vmem:[#allocation23_spill] sm:$0xff] }
 0x72c   : > { %5658 = vmatpush1.bf16.msra.mxu0 %v9378_v2  ;;  %5722 = vmatpush1.bf16.msra.mxu1 %v9379_v40 }
 0x72d   : > { %5660 = vmatprep.subr.bf16.mxu0 %v9380_v49  ;;  %5724 = vmatprep.subr.bf16.mxu1 %v9381_v43  ;;  %6408 = vtanh.f32 %v8457_v51 }
 0x730   : > { %5662 = vmatpush1.bf16.msra.mxu0 %v7660_v58  ;;  %5726 = vmatpush1.bf16.msra.mxu1 %v7662_v63 }
 0x731   : > { %5664 = vmatprep.subr.bf16.mxu0 %v7668_v37  ;;  %5728 = vmatprep.subr.bf16.mxu1 %v7670_v4  ;;  %v6407_v36 = vpop.eup %6406 }
 0x734   : > { %5666 = vmatpush1.bf16.msra.mxu0 %v7680_v32  ;;  %5730 = vmatpush1.bf16.msra.mxu1 %v7682_v22 }
 0x735   : > { %5668 = vmatprep.subr.bf16.mxu0 %v7687_v53  ;;  %5732 = vmatprep.subr.bf16.mxu1 %v7689_v10 }
 0x737   : > { %v6409_v24 = vpop.eup %6408 }
 0x738   : > { %5670 = vmatpush1.bf16.msra.mxu0 %v7696_v25  ;;  %5734 = vmatpush1.bf16.msra.mxu1 %v7698_v11  ;;  %v2571_v13 = vmul.f32 %v6409_v24, %v6407_v36  ;;  %v9719_v36 = vld [vmem:[#allocation18_spill] sm:$0xff]  ;;  %v9722_v11 = vld [vmem:[#allocation28_spill] sm:$0xff]  ;;  %v9777_v25 = vld [vmem:[#allocation81_spill] sm:$0xff] }
 0x739   : > { %5736 = vmatprep.subr.bf16.mxu0 %v6965_v12  ;;  %5800 = vmatprep.subr.bf16.mxu1 %v9712_v60  ;;  %v9717_v12 = vld [vmem:[#allocation17_spill] sm:$0xff]  ;;  %v9718_v60 = vld [vmem:[#allocation24_spill] sm:$0xff]  ;;  %v9720_v24 = vld [vmem:[#allocation26_spill] sm:$0xff] }
 0x73a   : > { %2572 = vst [vmem:[#allocation2 + $0x20] sm:$0xff] %v2571_v13  ;;  %2805 = vmatprep.mubr.f32.mxu0 %v2571_v13  ;;  %2876 = vmatprep.mubr.f32.mxu1 %v2571_v13  ;;  %v9721_v13 = vld [vmem:[#allocation21_spill] sm:$0xff] }
 0x73b   : > { %2806 = vmatmul.mubr.f32.vlgmr.msra.gmra.mrb[24].mxu0 %v8396_v33  ;;  %2877 = vmatmul.mubr.f32.vlgmr.msra.gmra.mrb[24].mxu1 %v8396_v33  ;;  %v9723_v33 = vld [vmem:[#allocation22_spill] sm:$0xff] }
 0x73c   : > { %5738 = vmatpush1.bf16.msra.mxu0 %v9713_v20  ;;  %5802 = vmatpush1.bf16.msra.mxu1 %v9714_v5  ;;  %v9724_v20 = vld [vmem:[#allocation29_spill] sm:$0xff] }
 0x73d   : > { %5740 = vmatprep.subr.bf16.mxu0 %v9715_v35  ;;  %5804 = vmatprep.subr.bf16.mxu1 %v9716_v30  ;;  %v9725_v5 = vld [vmem:[#allocation25_spill] sm:$0xff]  ;;  %v9726_v35 = vld [vmem:[#allocation32_spill] sm:$0xff]  ;;  %v9727_v30 = vld [vmem:[#allocation27_spill] sm:$0xff] }
 0x740   : > { %5742 = vmatpush1.bf16.msra.mxu0 %v9717_v12  ;;  %5806 = vmatpush1.bf16.msra.mxu1 %v9718_v60  ;;  %v9728_v12 = vld [vmem:[#allocation33_spill] sm:$0xff]  ;;  %v9729_v60 = vld [vmem:[#allocation30_spill] sm:$0xff] }
 0x741   : > { %5744 = vmatprep.subr.bf16.mxu0 %v9719_v36  ;;  %5808 = vmatprep.subr.bf16.mxu1 %v9720_v24  ;;  %v9730_v36 = vld [vmem:[#allocation36_spill] sm:$0xff]  ;;  %v9731_v24 = vld [vmem:[#allocation31_spill] sm:$0xff] }
 0x744   : > { %5746 = vmatpush1.bf16.msra.mxu0 %v9721_v13  ;;  %5810 = vmatpush1.bf16.msra.mxu1 %v9722_v11  ;;  %v9732_v13 = vld [vmem:[#allocation37_spill] sm:$0xff]  ;;  %v9733_v11 = vld [vmem:[#allocation34_spill] sm:$0xff] }
 0x745   : > { %5748 = vmatprep.subr.bf16.mxu0 %v9723_v33  ;;  %5812 = vmatprep.subr.bf16.mxu1 %v9724_v20  ;;  %v9734_v33 = vld [vmem:[#allocation40_spill] sm:$0xff]  ;;  %v9735_v20 = vld [vmem:[#allocation35_spill] sm:$0xff] }
 0x748   : > { %5750 = vmatpush1.bf16.msra.mxu0 %v9725_v5  ;;  %5814 = vmatpush1.bf16.msra.mxu1 %v9726_v35  ;;  %v9736_v5 = vld [vmem:[#allocation41_spill] sm:$0xff]  ;;  %v9737_v35 = vld [vmem:[#allocation38_spill] sm:$0xff] }
 0x749   : > { %5752 = vmatprep.subr.bf16.mxu0 %v9727_v30  ;;  %5816 = vmatprep.subr.bf16.mxu1 %v9728_v12  ;;  %v9738_v30 = vld [vmem:[#allocation44_spill] sm:$0xff]  ;;  %v9739_v12 = vld [vmem:[#allocation39_spill] sm:$0xff] }
 0x74c   : > { %5754 = vmatpush1.bf16.msra.mxu0 %v9729_v60  ;;  %5818 = vmatpush1.bf16.msra.mxu1 %v9730_v36  ;;  %v9740_v60 = vld [vmem:[#allocation45_spill] sm:$0xff]  ;;  %v9741_v36 = vld [vmem:[#allocation42_spill] sm:$0xff] }
 0x74d   : > { %5756 = vmatprep.subr.bf16.mxu0 %v9731_v24  ;;  %5820 = vmatprep.subr.bf16.mxu1 %v9732_v13  ;;  %v9742_v24 = vld [vmem:[#allocation48_spill] sm:$0xff]  ;;  %v9743_v13 = vld [vmem:[#allocation43_spill] sm:$0xff] }
 0x750   : > { %5758 = vmatpush1.bf16.msra.mxu0 %v9733_v11  ;;  %5822 = vmatpush1.bf16.msra.mxu1 %v9734_v33  ;;  %v9744_v11 = vld [vmem:[#allocation49_spill] sm:$0xff]  ;;  %v9745_v33 = vld [vmem:[#allocation46_spill] sm:$0xff] }
 0x751   : > { %5760 = vmatprep.subr.bf16.mxu0 %v9735_v20  ;;  %5824 = vmatprep.subr.bf16.mxu1 %v9736_v5  ;;  %v9746_v20 = vld [vmem:[#allocation52_spill] sm:$0xff]  ;;  %v9747_v5 = vld [vmem:[#allocation47_spill] sm:$0xff] }
 0x754   : > { %5762 = vmatpush1.bf16.msra.mxu0 %v9737_v35  ;;  %5826 = vmatpush1.bf16.msra.mxu1 %v9738_v30  ;;  %v9748_v35 = vld [vmem:[#allocation53_spill] sm:$0xff]  ;;  %v9749_v30 = vld [vmem:[#allocation50_spill] sm:$0xff] }
 0x755   : > { %5764 = vmatprep.subr.bf16.mxu0 %v9739_v12  ;;  %5828 = vmatprep.subr.bf16.mxu1 %v9740_v60  ;;  %v9750_v12 = vld [vmem:[#allocation56_spill] sm:$0xff]  ;;  %v9751_v60 = vld [vmem:[#allocation51_spill] sm:$0xff] }
 0x758   : > { %5766 = vmatpush1.bf16.msra.mxu0 %v9741_v36  ;;  %5830 = vmatpush1.bf16.msra.mxu1 %v9742_v24  ;;  %v9752_v36 = vld [vmem:[#allocation57_spill] sm:$0xff]  ;;  %v9753_v24 = vld [vmem:[#allocation54_spill] sm:$0xff] }
 0x759   : > { %5768 = vmatprep.subr.bf16.mxu0 %v9743_v13  ;;  %5832 = vmatprep.subr.bf16.mxu1 %v9744_v11  ;;  %v9754_v13 = vld [vmem:[#allocation60_spill] sm:$0xff]  ;;  %v9755_v11 = vld [vmem:[#allocation55_spill] sm:$0xff] }
 0x75c   : > { %5770 = vmatpush1.bf16.msra.mxu0 %v9745_v33  ;;  %5834 = vmatpush1.bf16.msra.mxu1 %v9746_v20  ;;  %v9756_v33 = vld [vmem:[#allocation61_spill] sm:$0xff]  ;;  %v9757_v20 = vld [vmem:[#allocation58_spill] sm:$0xff] }
 0x75d   : > { %5772 = vmatprep.subr.bf16.mxu0 %v9747_v5  ;;  %5836 = vmatprep.subr.bf16.mxu1 %v9748_v35  ;;  %v9758_v5 = vld [vmem:[#allocation64_spill] sm:$0xff]  ;;  %v9759_v35 = vld [vmem:[#allocation59_spill] sm:$0xff] }
 0x760   : > { %5774 = vmatpush1.bf16.msra.mxu0 %v9749_v30  ;;  %5838 = vmatpush1.bf16.msra.mxu1 %v9750_v12  ;;  %v9760_v30 = vld [vmem:[#allocation65_spill] sm:$0xff]  ;;  %v9761_v12 = vld [vmem:[#allocation62_spill] sm:$0xff] }
 0x761   : > { %5776 = vmatprep.subr.bf16.mxu0 %v9751_v60  ;;  %5840 = vmatprep.subr.bf16.mxu1 %v9752_v36  ;;  %v9762_v60 = vld [vmem:[#allocation68_spill] sm:$0xff]  ;;  %v9763_v36 = vld [vmem:[#allocation63_spill] sm:$0xff] }
 0x764   : > { %5778 = vmatpush1.bf16.msra.mxu0 %v9753_v24  ;;  %5842 = vmatpush1.bf16.msra.mxu1 %v9754_v13  ;;  %v9764_v24 = vld [vmem:[#allocation69_spill] sm:$0xff]  ;;  %v9765_v13 = vld [vmem:[#allocation66_spill] sm:$0xff] }
 0x765   : > { %5780 = vmatprep.subr.bf16.mxu0 %v9755_v11  ;;  %5844 = vmatprep.subr.bf16.mxu1 %v9756_v33  ;;  %v9766_v11 = vld [vmem:[#allocation72_spill] sm:$0xff]  ;;  %v9767_v33 = vld [vmem:[#allocation67_spill] sm:$0xff] }
 0x768   : > { %5782 = vmatpush1.bf16.msra.mxu0 %v9757_v20  ;;  %5846 = vmatpush1.bf16.msra.mxu1 %v9758_v5  ;;  %v9768_v20 = vld [vmem:[#allocation73_spill] sm:$0xff]  ;;  %v9769_v5 = vld [vmem:[#allocation70_spill] sm:$0xff] }
 0x769   : > { %5784 = vmatprep.subr.bf16.mxu0 %v9759_v35  ;;  %5848 = vmatprep.subr.bf16.mxu1 %v9760_v30  ;;  %v9770_v35 = vld [vmem:[#allocation75_spill] sm:$0xff] }
 0x76a   : > { %v9771_v30 = vld [vmem:[#allocation71_spill] sm:$0xff] }
 0x76c   : > { %5786 = vmatpush1.bf16.msra.mxu0 %v9761_v12  ;;  %5850 = vmatpush1.bf16.msra.mxu1 %v9762_v60  ;;  %v9772_v12 = vld [vmem:[#allocation76_spill] sm:$0xff]  ;;  %v9773_v60 = vld [vmem:[#allocation74_spill] sm:$0xff] }
 0x76d   : > { %5788 = vmatprep.subr.bf16.mxu0 %v9763_v36  ;;  %5852 = vmatprep.subr.bf16.mxu1 %v9764_v24  ;;  %v9774_v36 = vld [vmem:[#allocation77_spill] sm:$0xff]  ;;  %v9775_v24 = vld [vmem:[#allocation78_spill] sm:$0xff] }
 0x770   : > { %5790 = vmatpush1.bf16.msra.mxu0 %v9765_v13  ;;  %5854 = vmatpush1.bf16.msra.mxu1 %v9766_v11  ;;  %v9776_v13 = vld [vmem:[#allocation79_spill] sm:$0xff] }
 0x771   : > { %5792 = vmatprep.subr.bf16.mxu0 %v9767_v33  ;;  %5856 = vmatprep.subr.bf16.mxu1 %v9768_v20 }
 0x774   : > { %5794 = vmatpush1.bf16.msra.mxu0 %v9769_v5  ;;  %5858 = vmatpush1.bf16.msra.mxu1 %v9770_v35 }
 0x775   : > { %5796 = vmatprep.subr.bf16.mxu0 %v9771_v30  ;;  %5860 = vmatprep.subr.bf16.mxu1 %v9772_v12 }
 0x778   : > { %5798 = vmatpush1.bf16.msra.mxu0 %v9773_v60  ;;  %5862 = vmatpush1.bf16.msra.mxu1 %v9774_v36 }
 0x779   : > { %5864 = vmatprep.subr.bf16.mxu0 %v9775_v24  ;;  %5928 = vmatprep.subr.bf16.mxu1 %v9776_v13 }
 0x7ce   : > { %v2641_v11 = vpop.f32.mrb[22].mxu0  ;;  %v2712_v33 = vpop.f32.mrb[22].mxu1 }
 0x7cf   : > { %v2642_v20 = vadd.f32 %v2641_v11, %v9777_v25  ;;  %v2643_v10 = vpop.f32.mrb[23].mxu0  ;;  %v2714_v5 = vpop.f32.mrb[23].mxu1  ;;  %v2713_v12 = vadd.f32 %v2712_v33, %v9415_v48 }
 0x7d0   : > { %v2644_v35 = vadd.f32 %v2643_v10, %v9507_v0  ;;  %v2715_v36 = vadd.f32 %v2714_v5, %v9416_v29 }
 0x7d1   : > { %v3948_v53 = vmul.f32 -1.442695, %v2642_v20  ;;  %v3950_v60 = vmul.f32 -1.442695, %v2713_v12 }
 0x7d2   : > { %v3949_v30 = vmul.f32 -1.442695, %v2644_v35 }
 0x7d3   : > { %6410 = vpow2.f32 %v3948_v53 }
 0x7d4   : > { %6412 = vpow2.f32 %v3949_v30 }
 0x7d5   : > { %6414 = vpow2.f32 %v3950_v60  ;;  %v9783_v60 = vld [vmem:[#allocation96_spill] sm:$0xff] }
 0x7d6   : > { %6416 = vtanh.f32 %v2715_v36  ;;  %v9784_v36 = vld [vmem:[#allocation97_spill] sm:$0xff] }
 0x7dd   : > { %v6411_v24 = vpop.eup %6410 }
 0x7de   : > { %v6413_v13 = vpop.eup %6412  ;;  %v2726_v22 = vadd.f32 1.0, %v6411_v24 }
 0x7df   : > { %v2727_v32 = vadd.f32 1.0, %v6413_v13  ;;  %v6415_v11 = vpop.eup %6414  ;;  %v2909_v13 = vld [vmem:[#allocation2 + $0x38] sm:$0xff] }
 0x7e0   : > { %6418 = vrcp.f32 %v2726_v22  ;;  %v6417_v25 = vpop.eup %6416  ;;  %v2728_v20 = vadd.f32 1.0, %v6415_v11  ;;  %v9779_v22 = vld [vmem:[#allocation92_spill] sm:$0xff]  ;;  %v9785_v11 = vld [vmem:[#allocation98_spill] sm:$0xff] }
 0x7e1   : > { %6420 = vrcp.f32 %v2727_v32  ;;  %v9780_v32 = vld [vmem:[#allocation93_spill] sm:$0xff] }
 0x7e2   : > { %6422 = vrcp.f32 %v2728_v20  ;;  %v9787_v20 = vld [vmem:[#allocation101_spill] sm:$0xff] }
 0x7ea   : > { %v6419_v10 = vpop.eup %6418 }
 0x7eb   : > { %v6421_v35 = vpop.eup %6420  ;;  %v2737_v53 = vmul.f32 %v6419_v10, %v6417_v25  ;;  %v9781_v25 = vld [vmem:[#allocation94_spill] sm:$0xff]  ;;  %v9786_v10 = vld [vmem:[#allocation100_spill] sm:$0xff] }
 0x7ec   : > { %v2736_v30 = vmul.f32 %v6421_v35, %v8393_v46  ;;  %v6423_v5 = vpop.eup %6422  ;;  %v9782_v46 = vld [vmem:[#allocation95_spill] sm:$0xff] }
 0x7ed   : > { %v9788_v35 = vld [vmem:[#allocation103_spill] sm:$0xff] }
 0x7ee   : > { %v8543_v33 = vadd.f32 %v2737_v53, %v2736_v30  ;;  %v9789_v53 = vld [vmem:[#allocation104_spill] sm:$0xff] }
 0x7f0   : > { %9778 = vst [vmem:[#allocation132_spill] sm:$0xff] %v8543_v33  ;;  %6424 = vtanh.f32 %v8543_v33 }
 0x7fa   : > { %v6425_v12 = vpop.eup %6424 }
 0x7fb   : > { %v8546_v24 = vmul.f32 %v6425_v12, %v6423_v5  ;;  %v9790_v12 = vld [vmem:[#allocation80_spill] sm:$0xff] }
 0x7fd   : > { %2974 = vmatprep.mubr.f32.mxu0 %v8546_v24  ;;  %3045 = vmatprep.mubr.f32.mxu1 %v8546_v24 }
 0x7fe   : > { %2975 = vmatmul.mubr.f32.vlgmr.msra.gmra.mrb[26].mxu0 %v2909_v13  ;;  %3046 = vmatmul.mubr.f32.vlgmr.msra.gmra.mrb[26].mxu1 %v2909_v13 }
 0x7ff   : > { %5866 = vmatpush1.bf16.msra.mxu0 %v9508_v55  ;;  %5930 = vmatpush1.bf16.msra.mxu1 %v9598_v26 }
 0x800   : > { %5868 = vmatprep.subr.bf16.mxu0 %v9599_v39  ;;  %5932 = vmatprep.subr.bf16.mxu1 %v9600_v54 }
 0x803   : > { %5870 = vmatpush1.bf16.msra.mxu0 %v9688_v17  ;;  %5934 = vmatpush1.bf16.msra.mxu1 %v9689_v31 }
 0x804   : > { %5872 = vmatprep.subr.bf16.mxu0 %v9779_v22  ;;  %5936 = vmatprep.subr.bf16.mxu1 %v9780_v32 }
 0x807   : > { %5874 = vmatpush1.bf16.msra.mxu0 %v9781_v25  ;;  %5938 = vmatpush1.bf16.msra.mxu1 %v9782_v46 }
 0x808   : > { %5876 = vmatprep.subr.bf16.mxu0 %v9783_v60  ;;  %5940 = vmatprep.subr.bf16.mxu1 %v9784_v36 }
 0x80b   : > { %5878 = vmatpush1.bf16.msra.mxu0 %v9785_v11  ;;  %5942 = vmatpush1.bf16.msra.mxu1 %v9697_v15 }
 0x80c   : > { %5880 = vmatprep.subr.bf16.mxu0 %v9786_v10  ;;  %5944 = vmatprep.subr.bf16.mxu1 %v9787_v20 }
 0x80e   : > { %v2807_v30 = vpop.f32.mrb[24].mxu0  ;;  %v2878_v5 = vpop.f32.mrb[24].mxu1 }
 0x80f   : > { %5882 = vmatpush1.bf16.msra.mxu0 %v9700_v23  ;;  %5946 = vmatpush1.bf16.msra.mxu1 %v9788_v35  ;;  %v2808_v13 = vadd.f32 %v2807_v30, %v9790_v12  ;;  %v2809_v33 = vpop.f32.mrb[25].mxu0  ;;  %v2880_v29 = vpop.f32.mrb[25].mxu1  ;;  %v9791_v30 = vld [vmem:[#allocation148_spill] sm:$0xff] }
 0x810   : > { %5884 = vmatprep.subr.bf16.mxu0 %v9789_v53  ;;  %5948 = vmatprep.subr.bf16.mxu1 %v9703_v19  ;;  %v2810_v48 = vadd.f32 %v2809_v33, %v9705_v34  ;;  %v2879_v12 = vadd.f32 %v2878_v5, %v9791_v30 }
 0x811   : > { %v3951_v0 = vmul.f32 -1.442695, %v2808_v13  ;;  %v9793_v13 = vld [vmem:[#allocation128_spill] sm:$0xff] }
 0x812   : > { %v3952_v53 = vmul.f32 -1.442695, %v2810_v48  ;;  %v2881_v48 = vadd.f32 %v2880_v29, %v9536_v6 }
 0x813   : > { %5886 = vmatpush1.bf16.msra.mxu0 %v9528_v27  ;;  %5950 = vmatpush1.bf16.msra.mxu1 %v9617_v59  ;;  %6426 = vpow2.f32 %v3951_v0  ;;  %v3953_v0 = vmul.f32 -1.442695, %v2879_v12  ;;  %v9792_v12 = vld [vmem:[#allocation127_spill] sm:$0xff] }
 0x814   : > { %5888 = vmatprep.subr.bf16.mxu0 %v9618_v50  ;;  %5952 = vmatprep.subr.bf16.mxu1 %v9531_v62  ;;  %6428 = vpow2.f32 %v3952_v53 }
 0x815   : > { %6430 = vtanh.f32 %v2881_v48  ;;  %v9794_v48 = vld [vmem:[#allocation130_spill] sm:$0xff] }
 0x816   : > { %6432 = vpow2.f32 %v3953_v0 }
 0x817   : > { %5890 = vmatpush1.bf16.msra.mxu0 %v9619_v57  ;;  %5954 = vmatpush1.bf16.msra.mxu1 %v9620_v16 }
 0x818   : > { %5892 = vmatprep.subr.bf16.mxu0 %v9621_v61  ;;  %5956 = vmatprep.subr.bf16.mxu1 %v9622_v9 }
 0x81b   : > { %5894 = vmatpush1.bf16.msra.mxu0 %v9706_v38  ;;  %5958 = vmatpush1.bf16.msra.mxu1 %v9448_v41 }
 0x81c   : > { %5896 = vmatprep.subr.bf16.mxu0 %v9707_v42  ;;  %5960 = vmatprep.subr.bf16.mxu1 %v9538_v7 }
 0x81d   : > { %v6427_v33 = vpop.eup %6426 }
 0x81e   : > { %v2892_v53 = vadd.f32 1.0, %v6427_v33  ;;  %v6429_v5 = vpop.eup %6428  ;;  %v9795_v33 = vld [vmem:[#allocation131_spill] sm:$0xff] }
 0x81f   : > { %5898 = vmatpush1.bf16.msra.mxu0 %v9451_v14  ;;  %5962 = vmatpush1.bf16.msra.mxu1 %v9624_v45  ;;  %v2893_v29 = vadd.f32 1.0, %v6429_v5  ;;  %v6431_v0 = vpop.eup %6430 }
 0x820   : > { %5900 = vmatprep.subr.bf16.mxu0 %v9708_v28  ;;  %5964 = vmatprep.subr.bf16.mxu1 %v9541_v8  ;;  %6434 = vrcp.f32 %v2892_v53  ;;  %v6433_v53 = vpop.eup %6432 }
 0x821   : > { %6436 = vrcp.f32 %v2893_v29  ;;  %v2894_v30 = vadd.f32 1.0, %v6433_v53  ;;  %v9798_v53 = vld [vmem:[#allocation143_spill] sm:$0xff] }
 0x823   : > { %5902 = vmatpush1.bf16.msra.mxu0 %v9455_v1  ;;  %5966 = vmatpush1.bf16.msra.mxu1 %v9456_v52  ;;  %6438 = vrcp.f32 %v2894_v30 }
 0x824   : > { %5904 = vmatprep.subr.bf16.mxu0 %v9457_v44  ;;  %5968 = vmatprep.subr.bf16.mxu1 %v9625_v3 }
 0x827   : > { %5906 = vmatpush1.bf16.msra.mxu0 %v9709_v56  ;;  %5970 = vmatpush1.bf16.msra.mxu1 %v9792_v12 }
 0x828   : > { %5908 = vmatprep.subr.bf16.mxu0 %v9793_v13  ;;  %5972 = vmatprep.subr.bf16.mxu1 %v9710_v18 }
 0x82a   : > { %v6435_v5 = vpop.eup %6434 }
 0x82b   : > { %5910 = vmatpush1.bf16.msra.mxu0 %v9794_v48  ;;  %5974 = vmatpush1.bf16.msra.mxu1 %v9795_v33  ;;  %v2903_v29 = vmul.f32 %v6435_v5, %v6431_v0  ;;  %v6437_v6 = vpop.eup %6436  ;;  %v9796_v0 = vld [vmem:[#allocation141_spill] sm:$0xff]  ;;  %v9797_v5 = vld [vmem:[#allocation142_spill] sm:$0xff] }
 0x82c   : > { %5912 = vmatprep.subr.bf16.mxu0 %v9376_v47  ;;  %5976 = vmatprep.subr.bf16.mxu1 %v9377_v21  ;;  %v2902_v34 = vmul.f32 %v6437_v6, %v8457_v51  ;;  %v9799_v6 = vld [vmem:[#allocation144_spill] sm:$0xff]  ;;  %v9800_v51 = vld [vmem:[#allocation145_spill] sm:$0xff] }
 0x82e   : > { %v8609_v21 = vadd.f32 %v2903_v29, %v2902_v34  ;;  %v9802_v34 = vld [vmem:[#allocation78_spill] sm:$0xff]  ;;  %v9803_v29 = vld [vmem:[#allocation79_spill] sm:$0xff] }
 0x82f   : > { %5914 = vmatpush1.bf16.msra.mxu0 %v9378_v2  ;;  %5978 = vmatpush1.bf16.msra.mxu1 %v9379_v40 }
 0x830   : > { %5916 = vmatprep.subr.bf16.mxu0 %v9380_v49  ;;  %5980 = vmatprep.subr.bf16.mxu1 %v9381_v43  ;;  %6440 = vtanh.f32 %v8609_v21 }
 0x833   : > { %5918 = vmatpush1.bf16.msra.mxu0 %v7660_v58  ;;  %5982 = vmatpush1.bf16.msra.mxu1 %v7662_v63  ;;  %v9801_v63 = vld [vmem:[#allocation146_spill] sm:$0xff] }
 0x834   : > { %5920 = vmatprep.subr.bf16.mxu0 %v7668_v37  ;;  %5984 = vmatprep.subr.bf16.mxu1 %v7670_v4  ;;  %v6439_v4 = vpop.eup %6438 }
 0x837   : > { %5922 = vmatpush1.bf16.msra.mxu0 %v9796_v0  ;;  %5986 = vmatpush1.bf16.msra.mxu1 %v9797_v5 }
 0x838   : > { %5924 = vmatprep.subr.bf16.mxu0 %v9798_v53  ;;  %5988 = vmatprep.subr.bf16.mxu1 %v9799_v6 }
 0x83a   : > { %v6441_v30 = vpop.eup %6440 }
 0x83b   : > { %5926 = vmatpush1.bf16.msra.mxu0 %v9800_v51  ;;  %5990 = vmatpush1.bf16.msra.mxu1 %v9801_v63  ;;  %v2906_v37 = vmul.f32 %v6441_v30, %v6439_v4  ;;  %v9805_v4 = vld [vmem:[#allocation133_spill] sm:$0xff] }
 0x83c   : > { %5992 = vmatprep.subr.bf16.mxu0 %v9802_v34  ;;  %6056 = vmatprep.subr.bf16.mxu1 %v9803_v29 }
 0x83d   : > { %2907 = vst [vmem:[#allocation2 + $0x28] sm:$0xff] %v2906_v37  ;;  %3140 = vmatprep.mubr.f32.mxu0 %v2906_v37  ;;  %3211 = vmatprep.mubr.f32.mxu1 %v2906_v37  ;;  %v9804_v37 = vld [vmem:[#allocation104_spill] sm:$0xff] }
 0x83e   : > { %3141 = vmatmul.mubr.f32.vlgmr.msra.gmra.mrb[28].mxu0 %v8546_v24  ;;  %3212 = vmatmul.mubr.f32.vlgmr.msra.gmra.mrb[28].mxu1 %v8546_v24 }
 0x83f   : > { %5994 = vmatpush1.bf16.msra.mxu0 %v9508_v55  ;;  %6058 = vmatpush1.bf16.msra.mxu1 %v9598_v26 }
 0x840   : > { %5996 = vmatprep.subr.bf16.mxu0 %v9599_v39  ;;  %6060 = vmatprep.subr.bf16.mxu1 %v9600_v54 }
 0x843   : > { %5998 = vmatpush1.bf16.msra.mxu0 %v9688_v17  ;;  %6062 = vmatpush1.bf16.msra.mxu1 %v9689_v31  ;;  %v9813_v17 = vld [vmem:[#allocation132_spill] sm:$0xff] }
 0x844   : > { %6000 = vmatprep.subr.bf16.mxu0 %v9779_v22  ;;  %6064 = vmatprep.subr.bf16.mxu1 %v9780_v32  ;;  %v9815_v32 = vld [vmem:[#allocation147_spill] sm:$0xff] }
 0x847   : > { %6002 = vmatpush1.bf16.msra.mxu0 %v9781_v25  ;;  %6066 = vmatpush1.bf16.msra.mxu1 %v9782_v46 }
 0x848   : > { %6004 = vmatprep.subr.bf16.mxu0 %v9783_v60  ;;  %6068 = vmatprep.subr.bf16.mxu1 %v9784_v36  ;;  %v9816_v36 = vld [vmem:[#allocation148_spill] sm:$0xff] }
 0x84b   : > { %6006 = vmatpush1.bf16.msra.mxu0 %v9785_v11  ;;  %6070 = vmatpush1.bf16.msra.mxu1 %v9697_v15 }
 0x84c   : > { %6008 = vmatprep.subr.bf16.mxu0 %v9786_v10  ;;  %6072 = vmatprep.subr.bf16.mxu1 %v9787_v20  ;;  %v9817_v10 = vld [vmem:[#allocation149_spill] sm:$0xff] }
 0x84f   : > { %6010 = vmatpush1.bf16.msra.mxu0 %v9700_v23  ;;  %6074 = vmatpush1.bf16.msra.mxu1 %v9788_v35 }
 0x850   : > { %6012 = vmatprep.subr.bf16.mxu0 %v9804_v37  ;;  %6076 = vmatprep.subr.bf16.mxu1 %v9703_v19 }
 0x853   : > { %6014 = vmatpush1.bf16.msra.mxu0 %v9528_v27  ;;  %6078 = vmatpush1.bf16.msra.mxu1 %v9617_v59 }
 0x854   : > { %6016 = vmatprep.subr.bf16.mxu0 %v9618_v50  ;;  %6080 = vmatprep.subr.bf16.mxu1 %v9531_v62  ;;  %v9807_v62 = vld [vmem:[#allocation139_spill] sm:$0xff] }
 0x857   : > { %6018 = vmatpush1.bf16.msra.mxu0 %v9619_v57  ;;  %6082 = vmatpush1.bf16.msra.mxu1 %v9620_v16 }
 0x858   : > { %6020 = vmatprep.subr.bf16.mxu0 %v9621_v61  ;;  %6084 = vmatprep.subr.bf16.mxu1 %v9622_v9  ;;  %v9811_v9 = vld [vmem:[#allocation83_spill] sm:$0xff] }
 0x85b   : > { %6022 = vmatpush1.bf16.msra.mxu0 %v9706_v38  ;;  %6086 = vmatpush1.bf16.msra.mxu1 %v9448_v41  ;;  %v9810_v41 = vld [vmem:[#allocation82_spill] sm:$0xff] }
 0x85c   : > { %6024 = vmatprep.subr.bf16.mxu0 %v9707_v42  ;;  %6088 = vmatprep.subr.bf16.mxu1 %v9538_v7 }
 0x85f   : > { %6026 = vmatpush1.bf16.msra.mxu0 %v9451_v14  ;;  %6090 = vmatpush1.bf16.msra.mxu1 %v9624_v45  ;;  %v9808_v14 = vld [vmem:[#allocation140_spill] sm:$0xff] }
 0x860   : > { %6028 = vmatprep.subr.bf16.mxu0 %v9708_v28  ;;  %6092 = vmatprep.subr.bf16.mxu1 %v9541_v8  ;;  %v9812_v8 = vld [vmem:[#allocation84_spill] sm:$0xff] }
 0x863   : > { %6030 = vmatpush1.bf16.msra.mxu0 %v9455_v1  ;;  %6094 = vmatpush1.bf16.msra.mxu1 %v9456_v52  ;;  %v9806_v52 = vld [vmem:[#allocation138_spill] sm:$0xff] }
 0x864   : > { %6032 = vmatprep.subr.bf16.mxu0 %v9457_v44  ;;  %6096 = vmatprep.subr.bf16.mxu1 %v9625_v3 }
 0x867   : > { %6034 = vmatpush1.bf16.msra.mxu0 %v9709_v56  ;;  %6098 = vmatpush1.bf16.msra.mxu1 %v9792_v12  ;;  %v9814_v56 = vld [vmem:[#allocation80_spill] sm:$0xff] }
 0x868   : > { %6036 = vmatprep.subr.bf16.mxu0 %v9793_v13  ;;  %6100 = vmatprep.subr.bf16.mxu1 %v9710_v18 }
 0x86b   : > { %6038 = vmatpush1.bf16.msra.mxu0 %v9794_v48  ;;  %6102 = vmatpush1.bf16.msra.mxu1 %v9795_v33 }
 0x86c   : > { %6040 = vmatprep.subr.bf16.mxu0 %v9376_v47  ;;  %6104 = vmatprep.subr.bf16.mxu1 %v9805_v4 }
 0x86f   : > { %6042 = vmatpush1.bf16.msra.mxu0 %v9378_v2  ;;  %6106 = vmatpush1.bf16.msra.mxu1 %v9379_v40  ;;  %v9809_v2 = vld [vmem:[#allocation81_spill] sm:$0xff] }
 0x870   : > { %6044 = vmatprep.subr.bf16.mxu0 %v9380_v49  ;;  %6108 = vmatprep.subr.bf16.mxu1 %v9381_v43 }
 0x873   : > { %6046 = vmatpush1.bf16.msra.mxu0 %v7660_v58  ;;  %6110 = vmatpush1.bf16.msra.mxu1 %v9806_v52 }
 0x874   : > { %6048 = vmatprep.subr.bf16.mxu0 %v9807_v62  ;;  %6112 = vmatprep.subr.bf16.mxu1 %v9808_v14 }
 0x877   : > { %6050 = vmatpush1.bf16.msra.mxu0 %v9796_v0  ;;  %6114 = vmatpush1.bf16.msra.mxu1 %v9797_v5 }
 0x878   : > { %6052 = vmatprep.subr.bf16.mxu0 %v9798_v53  ;;  %6116 = vmatprep.subr.bf16.mxu1 %v9799_v6 }
 0x87b   : > { %6054 = vmatpush1.bf16.msra.mxu0 %v9800_v51  ;;  %6118 = vmatpush1.bf16.msra.mxu1 %v9801_v63 }
 0x8d1   : > { %v2976_v47 = vpop.f32.mrb[26].mxu0  ;;  %v3047_v58 = vpop.f32.mrb[26].mxu1 }
 0x8d2   : > { %v2977_v40 = vadd.f32 %v2976_v47, %v9809_v2  ;;  %v2978_v49 = vpop.f32.mrb[27].mxu0  ;;  %v3049_v43 = vpop.f32.mrb[27].mxu1  ;;  %v3048_v27 = vadd.f32 %v3047_v58, %v9811_v9 }
 0x8d3   : > { %v2979_v44 = vadd.f32 %v2978_v49, %v9810_v41  ;;  %v3050_v26 = vadd.f32 %v3049_v43, %v9812_v8 }
 0x8d4   : > { %v3954_v1 = vmul.f32 -1.442695, %v2977_v40  ;;  %v3956_v7 = vmul.f32 -1.442695, %v3048_v27 }
 0x8d5   : > { %v3955_v55 = vmul.f32 -1.442695, %v2979_v44 }
 0x8d6   : > { %6442 = vpow2.f32 %v3954_v1 }
 0x8d7   : > { %6444 = vpow2.f32 %v3955_v55 }
 0x8d8   : > { %6446 = vpow2.f32 %v3956_v7 }
 0x8d9   : > { %6448 = vtanh.f32 %v3050_v26 }
 0x8e0   : > { %v6443_v39 = vpop.eup %6442 }
 0x8e1   : > { %v6445_v63 = vpop.eup %6444  ;;  %v3061_v54 = vadd.f32 1.0, %v6443_v39 }
 0x8e2   : > { %v3062_v50 = vadd.f32 1.0, %v6445_v63  ;;  %v6447_v16 = vpop.eup %6446 }
 0x8e3   : > { %6450 = vrcp.f32 %v3061_v54  ;;  %v6449_v57 = vpop.eup %6448  ;;  %v3063_v61 = vadd.f32 1.0, %v6447_v16 }
 0x8e4   : > { %6452 = vrcp.f32 %v3062_v50 }
 0x8e5   : > { %6454 = vrcp.f32 %v3063_v61 }
 0x8ed   : > { %v6451_v59 = vpop.eup %6450 }
 0x8ee   : > { %v6453_v45 = vpop.eup %6452  ;;  %v3072_v3 = vmul.f32 %v6451_v59, %v6449_v57 }
 0x8ef   : > { %v3071_v31 = vmul.f32 %v6453_v45, %v9813_v17  ;;  %v6455_v19 = vpop.eup %6454  ;;  %v3415_v45 = vld [vmem:[%s8828_s3] sm:$0xff] (!%p3963_p5)  ;;  %v3417_v17 = vld [vmem:[%s8828_s3 + $0x10] sm:$0xff] (!%p3963_p5) }
 0x8f1   : > { %v3073_v38 = vadd.f32 %v3072_v3, %v3071_v31  ;;  %v3416_v3 = vld [vmem:[%s8828_s3 + $0x8] sm:$0xff] (!%p3963_p5)  ;;  %v6663_v31 = vmov (!%p3963_p5), 0.0|0.0  }
 0x8f2   : > { %6119 = vmatprep.subr.bf16.mxu0 (!%p3963_p5), %v6663_v31  ;;  %6143 = vmatprep.subr.bf16.mxu1 (!%p3963_p5), %v6663_v31 }
 0x8f3   : > { %6456 = vtanh.f32 %v3073_v38  ;;  %v6120_v38 = vpack.c.bf16 (!%p3963_p5), %v3416_v3, %v3415_v45 }
 0x8fd   : > { %v6457_v15 = vpop.eup %6456 }
 0x8fe   : > { %v3075_v23 = vmul.f32 %v6457_v15, %v6455_v19  ;;  %v3418_v19 = vld [vmem:[%s8828_s3 + $0x18] sm:$0xff] (!%p3963_p5)  ;;  %v6665_v15 = vmov (!%p3963_p5), 0.0  }
 0x911   : > { %v3142_v42 = vpop.f32.mrb[28].mxu0  ;;  %v3213_v28 = vpop.f32.mrb[28].mxu1 }
 0x912   : > { %v3143_v18 = vadd.f32 %v3142_v42, %v9814_v56  ;;  %v3144_v24 = vpop.f32.mrb[29].mxu0  ;;  %v3215_v22 = vpop.f32.mrb[29].mxu1  ;;  %v3214_v11 = vadd.f32 %v3213_v28, %v9816_v36  ;;  %v3419_v42 = vld [vmem:[%s8828_s3 + $0x20] sm:$0xff] (!%p3963_p5)  ;;  %v3420_v28 = vld [vmem:[%s8828_s3 + $0x28] sm:$0xff] (!%p3963_p5) }
 0x913   : > { %v3145_v25 = vadd.f32 %v3144_v24, %v9815_v32  ;;  %v3216_v20 = vadd.f32 %v3215_v22, %v9817_v10  ;;  %v3511_v22 = vld [vmem:[%s8830_s5 + $0x10] sm:$0xff] (!%p3963_p5) }
 0x914   : > { %v3957_v46 = vmul.f32 -1.442695, %v3143_v18  ;;  %v3959_v35 = vmul.f32 -1.442695, %v3214_v11  ;;  %v3510_v18 = vld [vmem:[%s8830_s5 + $0x8] sm:$0xff] (!%p3963_p5)  ;;  %v3513_v11 = vld [vmem:[%s8830_s5 + $0x20] sm:$0xff] (!%p3963_p5) }
 0x915   : > { %v3958_v60 = vmul.f32 -1.442695, %v3145_v25  ;;  %v6126_v25 = vpack.c.bf16 (!%p3963_p5), %v3420_v28, %v3419_v42 }
 0x916   : > { %6458 = vpow2.f32 %v3957_v46  ;;  %v3421_v46 = vld [vmem:[%s8828_s3 + $0x30] sm:$0xff] (!%p3963_p5) }
 0x917   : > { %6460 = vpow2.f32 %v3958_v60  ;;  %v3422_v60 = vld [vmem:[%s8828_s3 + $0x38] sm:$0xff] (!%p3963_p5) }
 0x918   : > { %6462 = vtanh.f32 %v3216_v20  ;;  %v6129_v20 = vpack.c.bf16 (!%p3963_p5), %v3422_v60, %v3421_v46 }
 0x919   : > { %6464 = vpow2.f32 %v3959_v35  ;;  %v3423_v35 = vld [vmem:[%s8828_s3 + $0x40] sm:$0xff] (!%p3963_p5) }
 0x920   : > { %v6459_v12 = vpop.eup %6458 }
 0x921   : > { %v3227_v13 = vadd.f32 1.0, %v6459_v12  ;;  %v6461_v48 = vpop.eup %6460  ;;  %v3424_v12 = vld [vmem:[%s8828_s3 + $0x48] sm:$0xff] (!%p3963_p5) }
 0x922   : > { %v3228_v33 = vadd.f32 1.0, %v6461_v48  ;;  %v6463_v0 = vpop.eup %6462  ;;  %v6132_v48 = vpack.c.bf16 (!%p3963_p5), %v3424_v12, %v3423_v35 }
 0x923   : > { %6466 = vrcp.f32 %v3227_v13  ;;  %v6465_v5 = vpop.eup %6464 }
 0x924   : > { %6468 = vrcp.f32 %v3228_v33  ;;  %v3229_v34 = vadd.f32 1.0, %v6465_v5  ;;  %v3425_v33 = vld [vmem:[%s8828_s3 + $0x50] sm:$0xff] (!%p3963_p5) }
 0x926   : > { %6470 = vrcp.f32 %v3229_v34  ;;  %v3429_v34 = vld [vmem:[%s8828_s3 + $0x70] sm:$0xff] (!%p3963_p5) }
 0x92d   : > { %v6467_v53 = vpop.eup %6466 }
 0x92e   : > { %v3238_v6 = vmul.f32 %v6467_v53, %v6463_v0  ;;  %v6469_v51 = vpop.eup %6468  ;;  %v3426_v0 = vld [vmem:[%s8828_s3 + $0x58] sm:$0xff] (!%p3963_p5)  ;;  %v3427_v53 = vld [vmem:[%s8828_s3 + $0x60] sm:$0xff] (!%p3963_p5) }
 0x92f   : > { %v3237_v29 = vmul.f32 %v6469_v51, %v8609_v21  ;;  %v6135_v5 = vpack.c.bf16 (!%p3963_p5), %v3426_v0, %v3425_v33 }
 0x930   : > { %v6471_v37 = vpop.eup %6470 }
 0x931   : > { %v3239_v30 = vadd.f32 %v3238_v6, %v3237_v29  ;;  %v3428_v6 = vld [vmem:[%s8828_s3 + $0x68] sm:$0xff] (!%p3963_p5)  ;;  %v3430_v29 = vld [vmem:[%s8828_s3 + $0x78] sm:$0xff] (!%p3963_p5) }
 0x932   : > { %v6138_v51 = vpack.c.bf16 (!%p3963_p5), %v3428_v6, %v3427_v53 }
 0x933   : > { %6472 = vtanh.f32 %v3239_v30 }
 0x93d   : > { %v6473_v4 = vpop.eup %6472 }
 0x93e   : > { %v3241_v52 = vmul.f32 %v6473_v4, %v6471_v37  ;;  %v3515_v4 = vld [vmem:[%s8830_s5 + $0x30] sm:$0xff] (!%p3963_p5) }
 0x940   : > { %3242 = vst [vmem:[#allocation2 + $0x30] sm:$0xff] %v3241_v52  ;;  %3307 = vmatprep.mubr.f32.mxu0 %v3241_v52  ;;  %3378 = vmatprep.mubr.f32.mxu1 %v3241_v52  ;;  %v3516_v52 = vld [vmem:[%s8830_s5 + $0x38] sm:$0xff] (!%p3963_p5) }
 0x941   : > { %3308 = vmatmul.mubr.f32.vlgmr.msra.gmra.mrb[30].mxu0 %v3075_v23  ;;  %3379 = vmatmul.mubr.f32.vlgmr.msra.gmra.mrb[30].mxu1 %v3075_v23  ;;  %v6123_v23 = vpack.c.bf16 (!%p3963_p5), %v3418_v19, %v3417_v17 }
 0x942   : > { %4038 = vmatprep.mubr.msk.f32.mxu0 (!%p3963_p5), %vm6664_vm0, %v6665_v15  ;;  %4057 = vmatprep.mubr.msk.f32.mxu1 (!%p3963_p5), %vm6664_vm0, %v6665_v15 }
 0x943   : > { %6121 = vmatpush3.bf16.msra.mxu0 (!%p3963_p5), %v6120_v38 }
 0x944   : > { %6122 = vmatprep.subr.bf16.mxu0 (!%p3963_p5), %v6663_v31 }
 0x947   : > { %6124 = vmatpush3.bf16.msra.mxu0 (!%p3963_p5), %v6123_v23 }
 0x948   : > { %6125 = vmatprep.subr.bf16.mxu0 (!%p3963_p5), %v6663_v31 }
 0x94b   : > { %6127 = vmatpush3.bf16.msra.mxu0 (!%p3963_p5), %v6126_v25 }
 0x94c   : > { %6128 = vmatprep.subr.bf16.mxu0 (!%p3963_p5), %v6663_v31 }
 0x94f   : > { %6130 = vmatpush3.bf16.msra.mxu0 (!%p3963_p5), %v6129_v20 }
 0x950   : > { %6131 = vmatprep.subr.bf16.mxu0 (!%p3963_p5), %v6663_v31 }
 0x953   : > { %6133 = vmatpush3.bf16.msra.mxu0 (!%p3963_p5), %v6132_v48 }
 0x954   : > { %6134 = vmatprep.subr.bf16.mxu0 (!%p3963_p5), %v6663_v31 }
 0x957   : > { %6136 = vmatpush3.bf16.msra.mxu0 (!%p3963_p5), %v6135_v5 }
 0x958   : > { %6137 = vmatprep.subr.bf16.mxu0 (!%p3963_p5), %v6663_v31 }
 0x95b   : > { %6139 = vmatpush3.bf16.msra.mxu0 (!%p3963_p5), %v6138_v51 }
 0x95c   : > { %6140 = vmatprep.subr.bf16.mxu0 (!%p3963_p5), %v6663_v31 }
 0xa14   : > { %v3309_v62 = vpop.f32.mrb[30].mxu0  ;;  %v3380_v14 = vpop.f32.mrb[30].mxu1 }
 0xa15   : > { %v3310_v47 = vadd.f32 %v3309_v62, %v9814_v56  ;;  %v3311_v58 = vpop.f32.mrb[31].mxu0  ;;  %v3382_v2 = vpop.f32.mrb[31].mxu1  ;;  %v3381_v43 = vadd.f32 %v3380_v14, %v9816_v36  ;;  %v3509_v56 = vld [vmem:[%s8830_s5] sm:$0xff] (!%p3963_p5)  ;;  %v6153_v62 = vpack.c.bf16 (!%p3963_p5), %v3516_v52, %v3515_v4  ;;  %v3964_v14 = vld [vmem:[#allocation8] ss:$0 sm:$0xff] (!%p3963_p5) }
 0xa16   : > { %v3312_v40 = vadd.f32 %v3311_v58, %v9815_v32  ;;  %v3383_v41 = vadd.f32 %v3382_v2, %v9817_v10  ;;  %v6144_v24 = vpack.c.bf16 (!%p3963_p5), %v3510_v18, %v3509_v56  ;;  %v3512_v32 = vld [vmem:[%s8830_s5 + $0x18] sm:$0xff] (!%p3963_p5)  ;;  %v3514_v10 = vld [vmem:[%s8830_s5 + $0x28] sm:$0xff] (!%p3963_p5) }
 0xa17   : > { %v3960_v21 = vmul.f32 -1.442695, %v3310_v47  ;;  %v3962_v44 = vmul.f32 -1.442695, %v3381_v43  ;;  %v6147_v36 = vpack.c.bf16 (!%p3963_p5), %v3512_v32, %v3511_v22  ;;  %v6150_v13 = vpack.c.bf16 (!%p3963_p5), %v3514_v10, %v3513_v11  ;;  %v3599_v47 = vld [vmem:[%s8832_s7] sm:$0xff] (!%p3963_p5)  ;;  %v3600_v58 = vld [vmem:[%s8832_s7 + $0x8] sm:$0xff] (!%p3963_p5) }
 0xa18   : > { %v3961_v49 = vmul.f32 -1.442695, %v3312_v40  ;;  %6145 = vmatpush3.bf16.msra.mxu1 (!%p3963_p5), %v6144_v24 }
 0xa19   : > { %6474 = vpow2.f32 %v3960_v21  ;;  %6146 = vmatprep.subr.bf16.mxu1 (!%p3963_p5), %v6663_v31 }
 0xa1a   : > { %6476 = vpow2.f32 %v3961_v49  ;;  %v6156_v49 = vpack.c.bf16 (!%p3963_p5), %v3600_v58, %v3599_v47 }
 0xa1b   : > { %6478 = vtanh.f32 %v3383_v41  ;;  %v3601_v41 = vld [vmem:[%s8832_s7 + $0x10] sm:$0xff] (!%p3963_p5) }
 0xa1c   : > { %6480 = vpow2.f32 %v3962_v44  ;;  %6148 = vmatpush3.bf16.msra.mxu1 (!%p3963_p5), %v6147_v36  ;;  %v3602_v44 = vld [vmem:[%s8832_s7 + $0x18] sm:$0xff] (!%p3963_p5) }
 0xa1d   : > { %6149 = vmatprep.subr.bf16.mxu1 (!%p3963_p5), %v6663_v31 }
 0xa20   : > { %6151 = vmatpush3.bf16.msra.mxu1 (!%p3963_p5), %v6150_v13 }
 0xa21   : > { %6152 = vmatprep.subr.bf16.mxu1 (!%p3963_p5), %v6663_v31 }
 0xa23   : > { %v6475_v1 = vpop.eup %6474 }
 0xa24   : > { %v3394_v55 = vadd.f32 1.0, %v6475_v1  ;;  %v6477_v9 = vpop.eup %6476  ;;  %6154 = vmatpush3.bf16.msra.mxu1 (!%p3963_p5), %v6153_v62  ;;  %v6159_v1 = vpack.c.bf16 (!%p3963_p5), %v3602_v44, %v3601_v41 }
 0xa25   : > { %v3395_v27 = vadd.f32 1.0, %v6477_v9  ;;  %v6479_v7 = vpop.eup %6478  ;;  %6155 = vmatprep.subr.bf16.mxu1 (!%p3963_p5), %v6663_v31 }
 0xa26   : > { %6482 = vrcp.f32 %v3394_v55  ;;  %v6481_v8 = vpop.eup %6480  ;;  %v3965_v55 = vld [vmem:[#allocation9] ss:$0 sm:$0xff] (!%p3963_p5) }
 0xa27   : > { %6484 = vrcp.f32 %v3395_v27  ;;  %v3396_v54 = vadd.f32 1.0, %v6481_v8 }
 0xa29   : > { %6486 = vrcp.f32 %v3396_v54 }
 0xa30   : > { %v6483_v26 = vpop.eup %6482 }
 0xa31   : > { %v3405_v39 = vmul.f32 %v6483_v26, %v6479_v7  ;;  %v6485_v63 = vpop.eup %6484  ;;  %v3967_v26 = vld [vmem:[#allocation3] ss:$0 sm:$0xff] (!%p3963_p5) }
 0xa32   : > { %v3404_v50 = vmul.f32 %v6485_v63, %v3239_v30  ;;  %v6141_v30 = vpack.c.bf16 (!%p3963_p5), %v3430_v29, %v3429_v34 }
 0xa33   : > { %v6487_v57 = vpop.eup %6486 }
 0xa34   : > { %v3406_v16 = vadd.f32 %v3405_v39, %v3404_v50  ;;  %6142 = vmatpush3.bf16.msra.mxu0 (!%p3963_p5), %v6141_v30 }
 0xa36   : > { %6488 = vtanh.f32 %v3406_v16 }
 0xa3d   : > { %3413 = sbr.rel (%p3963_p5) target bundleno = 3276 (0xccc), region = 80 }
 0xa40   : > { %v6489_v59 = vpop.eup %6488 }
 0xa41   : > { %v8700_v61 = vmul.f32 %v6489_v59, %v6487_v57 }
 0xa43   : > { %3409 = vst [vmem:[#allocation2 + $0x38] sm:$0xff] %v8700_v61  ;;  %v3414_v37 = vmax.f32 (!%p3963_p5), %v8700_v61, 0.0 }
 0xa45   : > { %4039 = vmatmul.mubr.f32.vlgmr.msra.gmra.mrb[0].mxu0 %v3414_v37 }
 0xb18   : > { %v3504_v2 = vpop.f32.mrb[0].mxu0 }
 0xb19   : > { %v3505_v40 = vadd.f32 %v3964_v14, %v3504_v2  ;;  %v4040_v21 = vpop.f32.mrb[1].mxu0 }
 0xb1b   : > { %v3508_v43 = vmax.f32 %v3505_v40, 0.0 }
 0xb1d   : > { %4058 = vmatmul.mubr.msk.f32.vlgmr.msra.gmra.mrb[0].mxu1 %vm3524_vm1, %v3508_v43 }
 0xb1e   : > { %6157 = vmatpush3.bf16.msra.mxu1 %v6156_v49  ;;  %4068 = vmatprep.mubr.msk.f32.mxu1 %vm6664_vm0, %v6665_v15 }
 0xb1f   : > { %6158 = vmatprep.subr.bf16.mxu1 %v6663_v31 }
 0xb22   : > { %6160 = vmatpush3.bf16.msra.mxu1 %v6159_v1 }
 0xbf0   : > { %v3594_v9 = vpop.f32.mrb[0].mxu1 }
 0xbf1   : > { %v3595_v27 = vadd.f32 %v3965_v55, %v3594_v9  ;;  %v4059_v7 = vpop.f32.mrb[1].mxu1 }
 0xbf3   : > { %v3598_v8 = vmax.f32 %v3595_v27, 0.0 }
 0xbf5   : > { %4069 = vmatmul.mubr.msk.f32.vlgmr.msra.gmra.mrb[2].mxu1 %vm3610_vm2, %v3598_v8 }
 0xcc8   : > { %v3680_v39 = vpop.f32.mrb[2].mxu1 }
 0xcc9   : > { %v3681_v63 = vadd.f32 %v3967_v26, %v3680_v39  ;;  %v4070_v54 = vpop.f32.mrb[3].mxu1 }
 0xccb   : > { %3685 = vst.msk [vmem:[%s8834_s9] sm:$0xff] %vm3684_vm3, %v3681_v63 }
 0xccc PF: > { %p25_p9 = scmp.ge.s32.totalorder %s6741_s15, 7   ;;  %s9818_s11 = smov %s6644_s12 }
 0xccd   : > { %s9819_s12 = smov %s6648_s13  ;;  %s9820_s13 = smov %s6751_s18 }
 0xcce   : > { %s9821_s14 = smov %s6741_s15  ;;  %27 = sbr.rel (!%p25_p9) target bundleno = 10 (0xa), region = 130 }
 0xcd5   :  { %3697 = vsyncpa [#allocation5], 1 }
 0xcd6   :  { %3699 = vsyncpa [#allocation5 + $0x1], 1 }
 0xcd7   :  { %3700 = vsyncpa [#allocation7], 1 }
 0xcd8   :  { %3702 = vsyncpa [#allocation7 + $0x1], 1 }
 0xcd9   :  { %3703 = vsyncpa [#allocation10], 1 }

</bundles_post_ra>
